<compile_context>
chip_gen: v6e
topology: v6e:2x2x1
jax: 0.10.0
libtpu: 0.0.40
codegen_flags: <defaults>
</compile_context>

<pallas_src>
import functools

import numpy as np
import jax
import jax.numpy as jnp
from jax.experimental import pallas as pl
from jax.experimental.pallas import tpu as pltpu


# ----------------------------------------------------------------------------- host-side constants

def _dft_factors(M):
    """F_M[k, n] = exp(-2*pi*i*k*n/M) as (real, imag) float64 matrices (forward-DFT convention)."""
    k = np.arange(M, dtype=np.float64)
    ang = 2.0 * np.pi * np.outer(k, k) / M
    return np.cos(ang), -np.sin(ang)


def _dft2_flat_operator(H, W):
    """Dense 2-D DFT operator for row-major-flattened spatial data, as a right multiplication:
    fft2(x).flatten() == x.flatten() @ (Mr + i*Mi).  (Fh, Fw symmetric => kron(Fh, Fw) symmetric.)"""
    fhr, fhi = _dft_factors(H)
    fwr, fwi = _dft_factors(W)
    mr = np.kron(fhr, fwr) - np.kron(fhi, fwi)
    mi = np.kron(fhr, fwi) + np.kron(fhi, fwr)
    return mr, mi


def _upsample2_flat_matrix(H, W):
    """0/1 matrix R (H*W, 4*H*W): nearest-2x upsample of a row-major (H, W) image == x_flat @ R."""
    R = np.zeros((H * W, 4 * H * W), dtype=np.float64)
    p = np.arange(2 * H)[:, None]
    q = np.arange(2 * W)[None, :]
    src = ((p // 2) * W + (q // 2)).ravel()
    dst = (p * (2 * W) + q).ravel()
    R[src, dst] = 1.0
    return R


def _d_map(H, W):
    """|1 + e^{i pi i/H} + e^{i pi j/W} + e^{i pi (i/H + j/W)}| / 4   (pure-JAX reference only)."""
    i = np.arange(H, dtype=np.float64)[:, None]
    j = np.arange(W, dtype=np.float64)[None, :]
    a = np.pi * i / H
    b = np.pi * j / W
    re = 1.0 + np.cos(a) + np.cos(b) + np.cos(a + b)
    im = np.sin(a) + np.sin(b) + np.sin(a + b)
    return np.sqrt(re * re + im * im) / 4.0


def _atan_poly_coeffs(n_terms=7):
    """Least-squares odd polynomial: atan(t) ~= t * sum_k c[k]*(t^2)^k on t in [0, 1]."""
    t = np.linspace(0.0, 1.0, 4097)
    s = t * t
    y = np.ones_like(t)
    y[1:] = np.arctan(t[1:]) / t[1:]
    A = np.stack([s ** k for k in range(n_terms)], axis=1)
    c, *_ = np.linalg.lstsq(A, y, rcond=None)
    return tuple(float(v) for v in c)


# ----------------------------------------------------------------------------- kernel

def _atan2_approx(y, x, coeffs):
    """Quadrant-corrected polynomial atan2 (== torch.angle) built from Mosaic-safe VPU/EUP ops.
    TODO(synk): swap for jnp.arctan2 once Mosaic guarantees an atan2 lowering."""
    ax = jnp.abs(x)
    ay = jnp.abs(y)
    hi = jnp.maximum(ax, ay)
    lo = jnp.minimum(ax, ay)
    # divide -> EUP approximate reciprocal (frees the VALU in this VPU-bound stage)
    t = lo * pl.reciprocal(jnp.where(hi > 0.0, hi, 1.0), approx=True)
    s = t * t
    acc = coeffs[-1]
    for c in reversed(coeffs[:-1]):
        acc = acc * s + c
    base = acc * t                                          # atan(lo/hi) in [0, pi/4]
    ang = jnp.where(ay > ax, float(np.pi / 2.0) - base, base)
    ang = jnp.where(x < 0.0, float(np.pi) - ang, ang)
    return jnp.where(y < 0.0, -ang, ang)


def _freup_kernel(C, HW, atan_coeffs,
                  x_ref, fwd_ref, w1_ref, b1_ref, w2_ref, b2_ref,
                  inv_ref, wp_ref, bp_ref, rup_ref, out_ref):
    """One batch element; every tensor is a lane-dense (rows, H*W) slab."""
    bf = lambda a: a.astype(jnp.bfloat16)      # MXU operands in bf16, accumulate in f32
    xf = x_ref[0]                                                           # (C, HW) f32

    # ---- fft2: one dot with the dense 2-D DFT operator (lane split at HW is 128-aligned) ----
    f = jnp.dot(bf(xf), fwd_ref[...], preferred_element_type=jnp.float32)   # (C, 2*HW)
    fr = f[:, :HW]
    fi = f[:, HW:]

    # ---- magnitude / phase (lane-dense VPU/EUP) ----------------------------------------------
    mag = jnp.sqrt(fr * fr + fi * fi)
    pha = _atan2_approx(fi, fr, atan_coeffs)

    # ---- amp_fuse & pha_fuse: true channel contractions, both paths in one block-diag dot ----
    h = jnp.concatenate([mag, pha], axis=0)                                 # (2C, HW)
    h = jnp.dot(w1_ref[...], bf(h), preferred_element_type=jnp.float32) + b1_ref[...]
    h = jnp.where(h > 0.0, h, 0.1 * h)                                      # LeakyReLU(0.1)
    h = jnp.dot(w2_ref[...], bf(h), preferred_element_type=jnp.float32) + b2_ref[...]
    zr = h[:C] * jnp.cos(h[C:])                                             # fused spectrum (C, HW)
    zi = h[:C] * jnp.sin(h[C:])

    # ---- repeat_interleave(2,2) -> ifft2 -> [:H,:W] crop -> /d_map == |iDFT_{HxW}(Z)| --------
    z = jnp.concatenate([zr, zi], axis=0)                                   # (2C, HW)
    v = jnp.dot(bf(z), inv_ref[...], preferred_element_type=jnp.float32)    # (2C, 2*HW)
    cr = v[:C, :HW] - v[C:, HW:]
    ci = v[:C, HW:] + v[C:, :HW]
    crop = jnp.sqrt(cr * cr + ci * ci)                                      # (C, HW)

    # ---- post 1x1 conv (channel dot) then nearest-2x upsample as a 0/1 column-duplication ----
    p = jnp.dot(wp_ref[...], bf(crop), preferred_element_type=jnp.float32) + bp_ref[...]
    out_ref[0] = jnp.dot(bf(p), rup_ref[...], preferred_element_type=jnp.float32)   # (C, 4*HW)


# ----------------------------------------------------------------------------- params / forward

def init_params(key, C):
    """Deterministic Conv2d(C, C, 1) init (PyTorch-default-like uniform bounds)."""
    def conv_init(k):
        kw, kb = jax.random.split(k)
        bound = 1.0 / float(np.sqrt(C))
        w = jax.random.uniform(kw, (C, C), jnp.float32, -bound, bound)
        b = jax.random.uniform(kb, (C,), jnp.float32, -bound, bound)
        return w, b
    ks = jax.random.split(key, 5)
    wa1, ba1 = conv_init(ks[0])
    wa2, ba2 = conv_init(ks[1])
    wp1, bp1 = conv_init(ks[2])
    wp2, bp2 = conv_init(ks[3])
    wpo, bpo = conv_init(ks[4])
    return dict(wa1=wa1, ba1=ba1, wa2=wa2, ba2=ba2,
                wp1=wp1, bp1=bp1, wp2=wp2, bp2=bp2, wpo=wpo, bpo=bpo)


def freup_areainterp_v2(x, params, *, buffered_consts=True):
    N, C, H, W = x.shape
    HW = H * W
    bf16 = jnp.bfloat16

    # ---- fixed numeric residents (host numpy, baked at trace time, stored bf16) --------------
    mr, mi = _dft2_flat_operator(H, W)
    fwd = jnp.asarray(np.concatenate([mr, mi], axis=1), bf16)               # (HW, 2HW) fwd DFT
    inv = jnp.asarray(np.concatenate([mr, -mi], axis=1) / HW, bf16)         # (HW, 2HW) 1/HW-scaled iDFT
    rup = jnp.asarray(_upsample2_flat_matrix(H, W), bf16)                   # (HW, 4HW) nearest-2x

    # ---- parameter-derived residents (tiny XLA ops outside the kernel) -----------------------
    def blockdiag(a, b):
        z = jnp.zeros((C, C), jnp.float32)
        return jnp.concatenate([jnp.concatenate([a, z], axis=1),
                                jnp.concatenate([z, b], axis=1)], axis=0)
    w1 = blockdiag(params["wa1"], params["wp1"]).astype(bf16)               # (2C, 2C)
    w2 = blockdiag(params["wa2"], params["wp2"]).astype(bf16)               # (2C, 2C)
    b1 = jnp.concatenate([params["ba1"], params["bp1"]])[:, None]           # (2C, 1) f32
    b2 = jnp.concatenate([params["ba2"], params["bp2"]])[:, None]           # (2C, 1) f32
    wp = params["wpo"].astype(bf16)                                         # (C, C)
    bp = params["bpo"][:, None]                                             # (C, 1) f32

    atan_coeffs = _atan_poly_coeffs()

    # Constant-index_map residents are fetched once for the whole grid; pl.Buffered(1) drops the
    # pointless second pipeline buffer (they never change across grid steps).
    const_kwargs = dict(pipeline_mode=pl.Buffered(1)) if buffered_consts else {}
    const2d = lambda shape: pl.BlockSpec(shape, lambda n: (0, 0), **const_kwargs)

    call = pl.pallas_call(
        functools.partial(_freup_kernel, C, HW, atan_coeffs),
        grid=(N,),
        in_specs=[
            pl.BlockSpec((1, C, HW), lambda n: (n, 0, 0)),   # x, flattened (C, H*W)
            const2d((HW, 2 * HW)),                           # [Re | Im] dense 2-D DFT
            const2d((2 * C, 2 * C)),                         # amp|pha conv1 (block-diag channel dot)
            const2d((2 * C, 1)),                             # amp|pha bias1
            const2d((2 * C, 2 * C)),                         # amp|pha conv2
            const2d((2 * C, 1)),                             # amp|pha bias2
            const2d((HW, 2 * HW)),                           # [Re | Im] dense iDFT (1/HW folded in)
            const2d((C, C)),                                 # post 1x1 conv
            const2d((C, 1)),                                 # post bias
            const2d((HW, 4 * HW)),                           # nearest-2x column duplication
        ],
        out_specs=pl.BlockSpec((1, C, 4 * HW), lambda n: (n, 0, 0)),
        out_shape=jax.ShapeDtypeStruct((N, C, 4 * HW), jnp.float32),
        compiler_params=pltpu.CompilerParams(
            dimension_semantics=("parallel",),       # one batch element per TensorCore (v7x)
            vmem_limit_bytes=16 * 1024 * 1024,       # real working set ~2-3 MiB; generous headroom
        ),
    )
    out = call(x.reshape(N, C, HW), fwd, w1, b1, w2, b2, inv, wp, bp, rup)
    return out.reshape(N, C, 2 * H, 2 * W)           # row-major split of the flat spatial axis (free)


# ----------------------------------------------------------------------------- pure-JAX reference

def _reference(x, params):
    N, C, H, W = x.shape

    def conv1x1(z, w, b):
        return jnp.einsum('oc,nchw->nohw', w, z) + b[None, :, None, None]

    def lrelu(z):
        return jnp.where(z > 0, z, 0.1 * z)

    f = jnp.fft.fft2(x)
    mag = jnp.abs(f)
    pha = jnp.angle(f)
    Mag = conv1x1(lrelu(conv1x1(mag, params["wa1"], params["ba1"])), params["wa2"], params["ba2"])
    Pha = conv1x1(lrelu(conv1x1(pha, params["wp1"], params["bp1"])), params["wp2"], params["bp2"])
    amp = jnp.repeat(jnp.repeat(Mag, 2, axis=2), 2, axis=3)
    ph = jnp.repeat(jnp.repeat(Pha, 2, axis=2), 2, axis=3)
    spec = (amp * jnp.cos(ph)) + 1j * (amp * jnp.sin(ph))
    y = jnp.abs(jnp.fft.ifft2(spec))[:, :, :H, :W]
    crop = y / jnp.asarray(_d_map(H, W), jnp.float32)[None, None]
    up = jnp.repeat(jnp.repeat(crop, 2, axis=2), 2, axis=3)
    return conv1x1(up, params["wpo"], params["bpo"])


# ----------------------------------------------------------------------------- main

if __name__ == "__main__":
    N, C, H, W = 2, 4, 16, 16
    key = jax.random.PRNGKey(0)
    kx, kp = jax.random.split(key)
    x = jax.random.normal(kx, (N, C, H, W), dtype=jnp.float32)
    params = init_params(kp, C)

    fwd_fn = jax.jit(functools.partial(freup_areainterp_v2, buffered_consts=True))
    try:
        out = jax.block_until_ready(fwd_fn(x, params))
    except Exception:
        # If this Mosaic build rejects pipeline_mode=pl.Buffered(1), fall back to the default
        # double-buffered constants (identical numerics, ~1 MiB extra VMEM).
        fwd_fn = jax.jit(functools.partial(freup_areainterp_v2, buffered_consts=False))
        out = jax.block_until_ready(fwd_fn(x, params))

    assert out.shape == (N, C, 2 * H, 2 * W), out.shape
    assert out.dtype == jnp.float32
    assert bool(jnp.all(jnp.isfinite(out)))

    ref = _reference(x, params)
    rel_l2 = float(jnp.linalg.norm(out - ref) / (jnp.linalg.norm(ref) + 1e-12))
    # bf16-operand MXU dots + 7-term polynomial atan2 vs. the exact jnp.fft reference: a
    # few-percent relative L2 is the deliberate speed/accuracy tradeoff (same budget as v1).
    assert rel_l2 < 1e-1, rel_l2

    print("KERNEL_OK")
</pallas_src>

<mosaic_0001>
module attributes {stable_mosaic.version = 11 : i64} {
  func.func @_freup_kernel(%arg0: i32, %arg1: memref<1x4x256xf32, #tpu.memory_space<vmem>>, %arg2: memref<256x512xbf16, #tpu.memory_space<vmem>>, %arg3: memref<8x8xbf16, #tpu.memory_space<vmem>>, %arg4: memref<8x1xf32, #tpu.memory_space<vmem>>, %arg5: memref<8x8xbf16, #tpu.memory_space<vmem>>, %arg6: memref<8x1xf32, #tpu.memory_space<vmem>>, %arg7: memref<256x512xbf16, #tpu.memory_space<vmem>>, %arg8: memref<4x4xbf16, #tpu.memory_space<vmem>>, %arg9: memref<4x1xf32, #tpu.memory_space<vmem>>, %arg10: memref<256x1024xbf16, #tpu.memory_space<vmem>>, %arg11: memref<1x4x1024xf32, #tpu.memory_space<vmem>>) attributes {dimension_semantics = [#tpu.dimension_semantics<parallel>], iteration_bounds = array<i64: 2>, scalar_prefetch = 0 : i64, scratch_operands = 0 : i64, tpu.core_type = #tpu.core_type<tc>, window_params = [{transform_indices = @transform_0, window_bounds = array<i64: 1, 4, 256>}, {pipeline_mode = #tpu.pipeline_mode<synchronous>, transform_indices = @transform_1, window_bounds = array<i64: 256, 512>}, {pipeline_mode = #tpu.pipeline_mode<synchronous>, transform_indices = @transform_2, window_bounds = array<i64: 8, 8>}, {pipeline_mode = #tpu.pipeline_mode<synchronous>, transform_indices = @transform_3, window_bounds = array<i64: 8, 1>}, {pipeline_mode = #tpu.pipeline_mode<synchronous>, transform_indices = @transform_4, window_bounds = array<i64: 8, 8>}, {pipeline_mode = #tpu.pipeline_mode<synchronous>, transform_indices = @transform_5, window_bounds = array<i64: 8, 1>}, {pipeline_mode = #tpu.pipeline_mode<synchronous>, transform_indices = @transform_6, window_bounds = array<i64: 256, 512>}, {pipeline_mode = #tpu.pipeline_mode<synchronous>, transform_indices = @transform_7, window_bounds = array<i64: 4, 4>}, {pipeline_mode = #tpu.pipeline_mode<synchronous>, transform_indices = @transform_8, window_bounds = array<i64: 4, 1>}, {pipeline_mode = #tpu.pipeline_mode<synchronous>, transform_indices = @transform_9, window_bounds = array<i64: 256, 1024>}, {transform_indices = @transform_10, window_bounds = array<i64: 1, 4, 1024>}]} {
    %c0 = arith.constant 0 : index
    %c0_0 = arith.constant 0 : index
    %c0_1 = arith.constant 0 : index
    %0 = vector.load %arg1[%c0, %c0_0, %c0_1] : memref<1x4x256xf32, #tpu.memory_space<vmem>>, vector<1x4x256xf32>
    %1 = vector.shape_cast %0 : vector<1x4x256xf32> to vector<4x256xf32>
    %2 = arith.truncf %1 : vector<4x256xf32> to vector<4x256xbf16>
    %c0_2 = arith.constant 0 : index
    %c0_3 = arith.constant 0 : index
    %3 = vector.load %arg2[%c0_2, %c0_3] : memref<256x512xbf16, #tpu.memory_space<vmem>>, vector<256x512xbf16>
    %cst = arith.constant dense<0.000000e+00> : vector<4x512xf32>
    %4 = tpu.matmul %2, %3, %cst {dimension_numbers = #tpu.dot_dimension_numbers<[1], [0], [0], [1], [0, 0, 1, 1], [], []>} : vector<4x256xbf16>, vector<256x512xbf16>, vector<4x512xf32> -> vector<4x512xf32>
    %5 = vector.extract_strided_slice %4 {offsets = [0, 0], sizes = [4, 256], strides = [1, 1]} : vector<4x512xf32> to vector<4x256xf32>
    %6 = vector.extract_strided_slice %4 {offsets = [0, 256], sizes = [4, 256], strides = [1, 1]} : vector<4x512xf32> to vector<4x256xf32>
    %7 = arith.mulf %5, %5 : vector<4x256xf32>
    %8 = arith.mulf %6, %6 : vector<4x256xf32>
    %9 = arith.addf %7, %8 : vector<4x256xf32>
    %10 = math.sqrt %9 : vector<4x256xf32>
    %11 = math.absf %5 : vector<4x256xf32>
    %12 = math.absf %6 : vector<4x256xf32>
    %13 = arith.maximumf %11, %12 : vector<4x256xf32>
    %14 = arith.minimumf %11, %12 : vector<4x256xf32>
    %cst_4 = arith.constant 0.000000e+00 : f32
    %15 = vector.broadcast %cst_4 : f32 to vector<4x256xf32>
    %16 = arith.cmpf ogt, %13, %15 : vector<4x256xf32>
    %cst_5 = arith.constant 1.000000e+00 : f32
    %17 = vector.broadcast %cst_5 : f32 to vector<4x256xf32>
    %18 = arith.select %16, %13, %17 : vector<4x256xi1>, vector<4x256xf32>
    %19 = tpu.reciprocal %18 {approx = true} : vector<4x256xf32> -> vector<4x256xf32>
    %20 = arith.mulf %14, %19 : vector<4x256xf32>
    %21 = arith.mulf %20, %20 : vector<4x256xf32>
    %cst_6 = arith.constant 0.00840553176 : f32
    %22 = vector.broadcast %cst_6 : f32 to vector<4x256xf32>
    %23 = arith.mulf %22, %21 : vector<4x256xf32>
    %cst_7 = arith.constant -0.0385276601 : f32
    %24 = vector.broadcast %cst_7 : f32 to vector<4x256xf32>
    %25 = arith.addf %23, %24 : vector<4x256xf32>
    %26 = arith.mulf %25, %21 : vector<4x256xf32>
    %cst_8 = arith.constant 0.0854453667 : f32
    %27 = vector.broadcast %cst_8 : f32 to vector<4x256xf32>
    %28 = arith.addf %26, %27 : vector<4x256xf32>
    %29 = arith.mulf %28, %21 : vector<4x256xf32>
    %cst_9 = arith.constant -0.135618508 : f32
    %30 = vector.broadcast %cst_9 : f32 to vector<4x256xf32>
    %31 = arith.addf %29, %30 : vector<4x256xf32>
    %32 = arith.mulf %31, %21 : vector<4x256xf32>
    %cst_10 = arith.constant 0.198972866 : f32
    %33 = vector.broadcast %cst_10 : f32 to vector<4x256xf32>
    %34 = arith.addf %32, %33 : vector<4x256xf32>
    %35 = arith.mulf %34, %21 : vector<4x256xf32>
    %cst_11 = arith.constant -0.333277196 : f32
    %36 = vector.broadcast %cst_11 : f32 to vector<4x256xf32>
    %37 = arith.addf %35, %36 : vector<4x256xf32>
    %38 = arith.mulf %37, %21 : vector<4x256xf32>
    %cst_12 = arith.constant 0.999999463 : f32
    %39 = vector.broadcast %cst_12 : f32 to vector<4x256xf32>
    %40 = arith.addf %38, %39 : vector<4x256xf32>
    %41 = arith.mulf %40, %20 : vector<4x256xf32>
    %42 = arith.cmpf ogt, %12, %11 : vector<4x256xf32>
    %cst_13 = arith.constant 1.57079637 : f32
    %43 = vector.broadcast %cst_13 : f32 to vector<4x256xf32>
    %44 = arith.subf %43, %41 : vector<4x256xf32>
    %45 = arith.select %42, %44, %41 : vector<4x256xi1>, vector<4x256xf32>
    %cst_14 = arith.constant 0.000000e+00 : f32
    %46 = vector.broadcast %cst_14 : f32 to vector<4x256xf32>
    %47 = arith.cmpf olt, %5, %46 : vector<4x256xf32>
    %cst_15 = arith.constant 3.14159274 : f32
    %48 = vector.broadcast %cst_15 : f32 to vector<4x256xf32>
    %49 = arith.subf %48, %45 : vector<4x256xf32>
    %50 = arith.select %47, %49, %45 : vector<4x256xi1>, vector<4x256xf32>
    %cst_16 = arith.constant 0.000000e+00 : f32
    %51 = vector.broadcast %cst_16 : f32 to vector<4x256xf32>
    %52 = arith.cmpf olt, %6, %51 : vector<4x256xf32>
    %cst_17 = arith.constant 0.000000e+00 : f32
    %53 = vector.broadcast %cst_17 : f32 to vector<4x256xf32>
    %54 = arith.subf %53, %50 : vector<4x256xf32>
    %55 = arith.select %52, %54, %50 : vector<4x256xi1>, vector<4x256xf32>
    %56 = tpu.concatenate %10, %55 in 0 : vector<4x256xf32>, vector<4x256xf32> -> vector<8x256xf32>
    %c0_18 = arith.constant 0 : index
    %c0_19 = arith.constant 0 : index
    %57 = vector.load %arg3[%c0_18, %c0_19] : memref<8x8xbf16, #tpu.memory_space<vmem>>, vector<8x8xbf16>
    %58 = arith.truncf %56 : vector<8x256xf32> to vector<8x256xbf16>
    %cst_20 = arith.constant dense<0.000000e+00> : vector<8x256xf32>
    %59 = tpu.matmul %57, %58, %cst_20 {dimension_numbers = #tpu.dot_dimension_numbers<[1], [0], [0], [1], [0, 0, 1, 1], [], []>} : vector<8x8xbf16>, vector<8x256xbf16>, vector<8x256xf32> -> vector<8x256xf32>
    %c0_21 = arith.constant 0 : index
    %c0_22 = arith.constant 0 : index
    %60 = vector.load %arg4[%c0_21, %c0_22] : memref<8x1xf32, #tpu.memory_space<vmem>>, vector<8x1xf32>
    %61 = vector.broadcast %60 : vector<8x1xf32> to vector<8x256xf32>
    %62 = arith.addf %59, %61 : vector<8x256xf32>
    %cst_23 = arith.constant 0.000000e+00 : f32
    %63 = vector.broadcast %cst_23 : f32 to vector<8x256xf32>
    %64 = arith.cmpf ogt, %62, %63 : vector<8x256xf32>
    %cst_24 = arith.constant 1.000000e-01 : f32
    %65 = vector.broadcast %cst_24 : f32 to vector<8x256xf32>
    %66 = arith.mulf %65, %62 : vector<8x256xf32>
    %67 = arith.select %64, %62, %66 : vector<8x256xi1>, vector<8x256xf32>
    %c0_25 = arith.constant 0 : index
    %c0_26 = arith.constant 0 : index
    %68 = vector.load %arg5[%c0_25, %c0_26] : memref<8x8xbf16, #tpu.memory_space<vmem>>, vector<8x8xbf16>
    %69 = arith.truncf %67 : vector<8x256xf32> to vector<8x256xbf16>
    %cst_27 = arith.constant dense<0.000000e+00> : vector<8x256xf32>
    %70 = tpu.matmul %68, %69, %cst_27 {dimension_numbers = #tpu.dot_dimension_numbers<[1], [0], [0], [1], [0, 0, 1, 1], [], []>} : vector<8x8xbf16>, vector<8x256xbf16>, vector<8x256xf32> -> vector<8x256xf32>
    %c0_28 = arith.constant 0 : index
    %c0_29 = arith.constant 0 : index
    %71 = vector.load %arg6[%c0_28, %c0_29] : memref<8x1xf32, #tpu.memory_space<vmem>>, vector<8x1xf32>
    %72 = vector.broadcast %71 : vector<8x1xf32> to vector<8x256xf32>
    %73 = arith.addf %70, %72 : vector<8x256xf32>
    %74 = vector.extract_strided_slice %73 {offsets = [0, 0], sizes = [4, 256], strides = [1, 1]} : vector<8x256xf32> to vector<4x256xf32>
    %75 = vector.extract_strided_slice %73 {offsets = [4, 0], sizes = [4, 256], strides = [1, 1]} : vector<8x256xf32> to vector<4x256xf32>
    %76 = math.cos %75 : vector<4x256xf32>
    %77 = arith.mulf %74, %76 : vector<4x256xf32>
    %78 = vector.extract_strided_slice %73 {offsets = [0, 0], sizes = [4, 256], strides = [1, 1]} : vector<8x256xf32> to vector<4x256xf32>
    %79 = vector.extract_strided_slice %73 {offsets = [4, 0], sizes = [4, 256], strides = [1, 1]} : vector<8x256xf32> to vector<4x256xf32>
    %80 = math.sin %79 : vector<4x256xf32>
    %81 = arith.mulf %78, %80 : vector<4x256xf32>
    %82 = tpu.concatenate %77, %81 in 0 : vector<4x256xf32>, vector<4x256xf32> -> vector<8x256xf32>
    %83 = arith.truncf %82 : vector<8x256xf32> to vector<8x256xbf16>
    %c0_30 = arith.constant 0 : index
    %c0_31 = arith.constant 0 : index
    %84 = vector.load %arg7[%c0_30, %c0_31] : memref<256x512xbf16, #tpu.memory_space<vmem>>, vector<256x512xbf16>
    %cst_32 = arith.constant dense<0.000000e+00> : vector<8x512xf32>
    %85 = tpu.matmul %83, %84, %cst_32 {dimension_numbers = #tpu.dot_dimension_numbers<[1], [0], [0], [1], [0, 0, 1, 1], [], []>} : vector<8x256xbf16>, vector<256x512xbf16>, vector<8x512xf32> -> vector<8x512xf32>
    %86 = vector.extract_strided_slice %85 {offsets = [0, 0], sizes = [4, 256], strides = [1, 1]} : vector<8x512xf32> to vector<4x256xf32>
    %87 = vector.extract_strided_slice %85 {offsets = [4, 256], sizes = [4, 256], strides = [1, 1]} : vector<8x512xf32> to vector<4x256xf32>
    %88 = arith.subf %86, %87 : vector<4x256xf32>
    %89 = vector.extract_strided_slice %85 {offsets = [0, 256], sizes = [4, 256], strides = [1, 1]} : vector<8x512xf32> to vector<4x256xf32>
    %90 = vector.extract_strided_slice %85 {offsets = [4, 0], sizes = [4, 256], strides = [1, 1]} : vector<8x512xf32> to vector<4x256xf32>
    %91 = arith.addf %89, %90 : vector<4x256xf32>
    %92 = arith.mulf %88, %88 : vector<4x256xf32>
    %93 = arith.mulf %91, %91 : vector<4x256xf32>
    %94 = arith.addf %92, %93 : vector<4x256xf32>
    %95 = math.sqrt %94 : vector<4x256xf32>
    %c0_33 = arith.constant 0 : index
    %c0_34 = arith.constant 0 : index
    %96 = vector.load %arg8[%c0_33, %c0_34] : memref<4x4xbf16, #tpu.memory_space<vmem>>, vector<4x4xbf16>
    %97 = arith.truncf %95 : vector<4x256xf32> to vector<4x256xbf16>
    %cst_35 = arith.constant dense<0.000000e+00> : vector<4x256xf32>
    %98 = tpu.matmul %96, %97, %cst_35 {dimension_numbers = #tpu.dot_dimension_numbers<[1], [0], [0], [1], [0, 0, 1, 1], [], []>} : vector<4x4xbf16>, vector<4x256xbf16>, vector<4x256xf32> -> vector<4x256xf32>
    %c0_36 = arith.constant 0 : index
    %c0_37 = arith.constant 0 : index
    %99 = vector.load %arg9[%c0_36, %c0_37] : memref<4x1xf32, #tpu.memory_space<vmem>>, vector<4x1xf32>
    %100 = vector.broadcast %99 : vector<4x1xf32> to vector<4x256xf32>
    %101 = arith.addf %98, %100 : vector<4x256xf32>
    %102 = arith.truncf %101 : vector<4x256xf32> to vector<4x256xbf16>
    %c0_38 = arith.constant 0 : index
    %c0_39 = arith.constant 0 : index
    %103 = vector.load %arg10[%c0_38, %c0_39] : memref<256x1024xbf16, #tpu.memory_space<vmem>>, vector<256x1024xbf16>
    %cst_40 = arith.constant dense<0.000000e+00> : vector<4x1024xf32>
    %104 = tpu.matmul %102, %103, %cst_40 {dimension_numbers = #tpu.dot_dimension_numbers<[1], [0], [0], [1], [0, 0, 1, 1], [], []>} : vector<4x256xbf16>, vector<256x1024xbf16>, vector<4x1024xf32> -> vector<4x1024xf32>
    %c0_41 = arith.constant 0 : index
    %c0_42 = arith.constant 0 : index
    %c0_43 = arith.constant 0 : index
    %105 = vector.load %arg11[%c0_41, %c0_42, %c0_43] : memref<1x4x1024xf32, #tpu.memory_space<vmem>>, vector<1x4x1024xf32>
    %106 = vector.shape_cast %105 : vector<1x4x1024xf32> to vector<4x1024xf32>
    %107 = vector.shape_cast %104 : vector<4x1024xf32> to vector<1x4x1024xf32>
    tpu.vector_store %arg11[%c0_41, %c0_42, %c0_43], %107 {strides = array<i32>} : memref<1x4x1024xf32, #tpu.memory_space<vmem>>, vector<1x4x1024xf32>,
    return
  }
  func.func @transform_0(%arg0: i32) -> (i32, i32, i32) {
    %c0_i32 = arith.constant 0 : i32
    %c0_i32_0 = arith.constant 0 : i32
    %c0_i32_1 = arith.constant 0 : i32
    return %arg0, %c0_i32, %c0_i32_0 : i32, i32, i32
  }
  func.func @transform_1(%arg0: i32) -> (i32, i32) {
    %c0_i32 = arith.constant 0 : i32
    %c0_i32_0 = arith.constant 0 : i32
    %c0_i32_1 = arith.constant 0 : i32
    return %c0_i32, %c0_i32_0 : i32, i32
  }
  func.func @transform_2(%arg0: i32) -> (i32, i32) {
    %c0_i32 = arith.constant 0 : i32
    %c0_i32_0 = arith.constant 0 : i32
    %c0_i32_1 = arith.constant 0 : i32
    return %c0_i32, %c0_i32_0 : i32, i32
  }
  func.func @transform_3(%arg0: i32) -> (i32, i32) {
    %c0_i32 = arith.constant 0 : i32
    %c0_i32_0 = arith.constant 0 : i32
    %c0_i32_1 = arith.constant 0 : i32
    return %c0_i32, %c0_i32_0 : i32, i32
  }
  func.func @transform_4(%arg0: i32) -> (i32, i32) {
    %c0_i32 = arith.constant 0 : i32
    %c0_i32_0 = arith.constant 0 : i32
    %c0_i32_1 = arith.constant 0 : i32
    return %c0_i32, %c0_i32_0 : i32, i32
  }
  func.func @transform_5(%arg0: i32) -> (i32, i32) {
    %c0_i32 = arith.constant 0 : i32
    %c0_i32_0 = arith.constant 0 : i32
    %c0_i32_1 = arith.constant 0 : i32
    return %c0_i32, %c0_i32_0 : i32, i32
  }
  func.func @transform_6(%arg0: i32) -> (i32, i32) {
    %c0_i32 = arith.constant 0 : i32
    %c0_i32_0 = arith.constant 0 : i32
    %c0_i32_1 = arith.constant 0 : i32
    return %c0_i32, %c0_i32_0 : i32, i32
  }
  func.func @transform_7(%arg0: i32) -> (i32, i32) {
    %c0_i32 = arith.constant 0 : i32
    %c0_i32_0 = arith.constant 0 : i32
    %c0_i32_1 = arith.constant 0 : i32
    return %c0_i32, %c0_i32_0 : i32, i32
  }
  func.func @transform_8(%arg0: i32) -> (i32, i32) {
    %c0_i32 = arith.constant 0 : i32
    %c0_i32_0 = arith.constant 0 : i32
    %c0_i32_1 = arith.constant 0 : i32
    return %c0_i32, %c0_i32_0 : i32, i32
  }
  func.func @transform_9(%arg0: i32) -> (i32, i32) {
    %c0_i32 = arith.constant 0 : i32
    %c0_i32_0 = arith.constant 0 : i32
    %c0_i32_1 = arith.constant 0 : i32
    return %c0_i32, %c0_i32_0 : i32, i32
  }
  func.func @transform_10(%arg0: i32) -> (i32, i32, i32) {
    %c0_i32 = arith.constant 0 : i32
    %c0_i32_0 = arith.constant 0 : i32
    %c0_i32_1 = arith.constant 0 : i32
    return %arg0, %c0_i32, %c0_i32_0 : i32, i32, i32
  }
}

module attributes {stable_mosaic.version = 11 : i64} {
  func.func @_freup_kernel(%arg0: i32, %arg1: memref<1x4x256xf32, #tpu.memory_space<vmem>>, %arg2: memref<256x512xbf16, #tpu.memory_space<vmem>>, %arg3: memref<8x8xbf16, #tpu.memory_space<vmem>>, %arg4: memref<8x1xf32, #tpu.memory_space<vmem>>, %arg5: memref<8x8xbf16, #tpu.memory_space<vmem>>, %arg6: memref<8x1xf32, #tpu.memory_space<vmem>>, %arg7: memref<256x512xbf16, #tpu.memory_space<vmem>>, %arg8: memref<4x4xbf16, #tpu.memory_space<vmem>>, %arg9: memref<4x1xf32, #tpu.memory_space<vmem>>, %arg10: memref<256x1024xbf16, #tpu.memory_space<vmem>>, %arg11: memref<1x4x1024xf32, #tpu.memory_space<vmem>>) attributes {dimension_semantics = [#tpu.dimension_semantics<parallel>], iteration_bounds = array<i64: 2>, scalar_prefetch = 0 : i64, scratch_operands = 0 : i64, tpu.core_type = #tpu.core_type<tc>, window_params = [{transform_indices = @transform_0, window_bounds = array<i64: 1, 4, 256>}, {pipeline_mode = #tpu.pipeline_mode<synchronous>, transform_indices = @transform_1, window_bounds = array<i64: 256, 512>}, {pipeline_mode = #tpu.pipeline_mode<synchronous>, transform_indices = @transform_2, window_bounds = array<i64: 8, 8>}, {pipeline_mode = #tpu.pipeline_mode<synchronous>, transform_indices = @transform_3, window_bounds = array<i64: 8, 1>}, {pipeline_mode = #tpu.pipeline_mode<synchronous>, transform_indices = @transform_4, window_bounds = array<i64: 8, 8>}, {pipeline_mode = #tpu.pipeline_mode<synchronous>, transform_indices = @transform_5, window_bounds = array<i64: 8, 1>}, {pipeline_mode = #tpu.pipeline_mode<synchronous>, transform_indices = @transform_6, window_bounds = array<i64: 256, 512>}, {pipeline_mode = #tpu.pipeline_mode<synchronous>, transform_indices = @transform_7, window_bounds = array<i64: 4, 4>}, {pipeline_mode = #tpu.pipeline_mode<synchronous>, transform_indices = @transform_8, window_bounds = array<i64: 4, 1>}, {pipeline_mode = #tpu.pipeline_mode<synchronous>, transform_indices = @transform_9, window_bounds = array<i64: 256, 1024>}, {transform_indices = @transform_10, window_bounds = array<i64: 1, 4, 1024>}]} {
    %c0 = arith.constant 0 : index
    %c0_0 = arith.constant 0 : index
    %c0_1 = arith.constant 0 : index
    %0 = vector.load %arg1[%c0, %c0_0, %c0_1] : memref<1x4x256xf32, #tpu.memory_space<vmem>>, vector<1x4x256xf32>
    %1 = vector.shape_cast %0 : vector<1x4x256xf32> to vector<4x256xf32>
    %2 = arith.truncf %1 : vector<4x256xf32> to vector<4x256xbf16>
    %c0_2 = arith.constant 0 : index
    %c0_3 = arith.constant 0 : index
    %3 = vector.load %arg2[%c0_2, %c0_3] : memref<256x512xbf16, #tpu.memory_space<vmem>>, vector<256x512xbf16>
    %cst = arith.constant dense<0.000000e+00> : vector<4x512xf32>
    %4 = tpu.matmul %2, %3, %cst {dimension_numbers = #tpu.dot_dimension_numbers<[1], [0], [0], [1], [0, 0, 1, 1], [], []>} : vector<4x256xbf16>, vector<256x512xbf16>, vector<4x512xf32> -> vector<4x512xf32>
    %5 = vector.extract_strided_slice %4 {offsets = [0, 0], sizes = [4, 256], strides = [1, 1]} : vector<4x512xf32> to vector<4x256xf32>
    %6 = vector.extract_strided_slice %4 {offsets = [0, 256], sizes = [4, 256], strides = [1, 1]} : vector<4x512xf32> to vector<4x256xf32>
    %7 = arith.mulf %5, %5 : vector<4x256xf32>
    %8 = arith.mulf %6, %6 : vector<4x256xf32>
    %9 = arith.addf %7, %8 : vector<4x256xf32>
    %10 = math.sqrt %9 : vector<4x256xf32>
    %11 = math.absf %5 : vector<4x256xf32>
    %12 = math.absf %6 : vector<4x256xf32>
    %13 = arith.maximumf %11, %12 : vector<4x256xf32>
    %14 = arith.minimumf %11, %12 : vector<4x256xf32>
    %cst_4 = arith.constant 0.000000e+00 : f32
    %15 = vector.broadcast %cst_4 : f32 to vector<4x256xf32>
    %16 = arith.cmpf ogt, %13, %15 : vector<4x256xf32>
    %cst_5 = arith.constant 1.000000e+00 : f32
    %17 = vector.broadcast %cst_5 : f32 to vector<4x256xf32>
    %18 = arith.select %16, %13, %17 : vector<4x256xi1>, vector<4x256xf32>
    %19 = tpu.reciprocal %18 {approx = true} : vector<4x256xf32> -> vector<4x256xf32>
    %20 = arith.mulf %14, %19 : vector<4x256xf32>
    %21 = arith.mulf %20, %20 : vector<4x256xf32>
    %cst_6 = arith.constant 0.00840553176 : f32
    %22 = vector.broadcast %cst_6 : f32 to vector<4x256xf32>
    %23 = arith.mulf %22, %21 : vector<4x256xf32>
    %cst_7 = arith.constant -0.0385276601 : f32
    %24 = vector.broadcast %cst_7 : f32 to vector<4x256xf32>
    %25 = arith.addf %23, %24 : vector<4x256xf32>
    %26 = arith.mulf %25, %21 : vector<4x256xf32>
    %cst_8 = arith.constant 0.0854453667 : f32
    %27 = vector.broadcast %cst_8 : f32 to vector<4x256xf32>
    %28 = arith.addf %26, %27 : vector<4x256xf32>
    %29 = arith.mulf %28, %21 : vector<4x256xf32>
    %cst_9 = arith.constant -0.135618508 : f32
    %30 = vector.broadcast %cst_9 : f32 to vector<4x256xf32>
    %31 = arith.addf %29, %30 : vector<4x256xf32>
    %32 = arith.mulf %31, %21 : vector<4x256xf32>
    %cst_10 = arith.constant 0.198972866 : f32
    %33 = vector.broadcast %cst_10 : f32 to vector<4x256xf32>
    %34 = arith.addf %32, %33 : vector<4x256xf32>
    %35 = arith.mulf %34, %21 : vector<4x256xf32>
    %cst_11 = arith.constant -0.333277196 : f32
    %36 = vector.broadcast %cst_11 : f32 to vector<4x256xf32>
    %37 = arith.addf %35, %36 : vector<4x256xf32>
    %38 = arith.mulf %37, %21 : vector<4x256xf32>
    %cst_12 = arith.constant 0.999999463 : f32
    %39 = vector.broadcast %cst_12 : f32 to vector<4x256xf32>
    %40 = arith.addf %38, %39 : vector<4x256xf32>
    %41 = arith.mulf %40, %20 : vector<4x256xf32>
    %42 = arith.cmpf ogt, %12, %11 : vector<4x256xf32>
    %cst_13 = arith.constant 1.57079637 : f32
    %43 = vector.broadcast %cst_13 : f32 to vector<4x256xf32>
    %44 = arith.subf %43, %41 : vector<4x256xf32>
    %45 = arith.select %42, %44, %41 : vector<4x256xi1>, vector<4x256xf32>
    %cst_14 = arith.constant 0.000000e+00 : f32
    %46 = vector.broadcast %cst_14 : f32 to vector<4x256xf32>
    %47 = arith.cmpf olt, %5, %46 : vector<4x256xf32>
    %cst_15 = arith.constant 3.14159274 : f32
    %48 = vector.broadcast %cst_15 : f32 to vector<4x256xf32>
    %49 = arith.subf %48, %45 : vector<4x256xf32>
    %50 = arith.select %47, %49, %45 : vector<4x256xi1>, vector<4x256xf32>
    %cst_16 = arith.constant 0.000000e+00 : f32
    %51 = vector.broadcast %cst_16 : f32 to vector<4x256xf32>
    %52 = arith.cmpf olt, %6, %51 : vector<4x256xf32>
    %cst_17 = arith.constant 0.000000e+00 : f32
    %53 = vector.broadcast %cst_17 : f32 to vector<4x256xf32>
    %54 = arith.subf %53, %50 : vector<4x256xf32>
    %55 = arith.select %52, %54, %50 : vector<4x256xi1>, vector<4x256xf32>
    %56 = tpu.concatenate %10, %55 in 0 : vector<4x256xf32>, vector<4x256xf32> -> vector<8x256xf32>
    %c0_18 = arith.constant 0 : index
    %c0_19 = arith.constant 0 : index
    %57 = vector.load %arg3[%c0_18, %c0_19] : memref<8x8xbf16, #tpu.memory_space<vmem>>, vector<8x8xbf16>
    %58 = arith.truncf %56 : vector<8x256xf32> to vector<8x256xbf16>
    %cst_20 = arith.constant dense<0.000000e+00> : vector<8x256xf32>
    %59 = tpu.matmul %57, %58, %cst_20 {dimension_numbers = #tpu.dot_dimension_numbers<[1], [0], [0], [1], [0, 0, 1, 1], [], []>} : vector<8x8xbf16>, vector<8x256xbf16>, vector<8x256xf32> -> vector<8x256xf32>
    %c0_21 = arith.constant 0 : index
    %c0_22 = arith.constant 0 : index
    %60 = vector.load %arg4[%c0_21, %c0_22] : memref<8x1xf32, #tpu.memory_space<vmem>>, vector<8x1xf32>
    %61 = vector.broadcast %60 : vector<8x1xf32> to vector<8x256xf32>
    %62 = arith.addf %59, %61 : vector<8x256xf32>
    %cst_23 = arith.constant 0.000000e+00 : f32
    %63 = vector.broadcast %cst_23 : f32 to vector<8x256xf32>
    %64 = arith.cmpf ogt, %62, %63 : vector<8x256xf32>
    %cst_24 = arith.constant 1.000000e-01 : f32
    %65 = vector.broadcast %cst_24 : f32 to vector<8x256xf32>
    %66 = arith.mulf %65, %62 : vector<8x256xf32>
    %67 = arith.select %64, %62, %66 : vector<8x256xi1>, vector<8x256xf32>
    %c0_25 = arith.constant 0 : index
    %c0_26 = arith.constant 0 : index
    %68 = vector.load %arg5[%c0_25, %c0_26] : memref<8x8xbf16, #tpu.memory_space<vmem>>, vector<8x8xbf16>
    %69 = arith.truncf %67 : vector<8x256xf32> to vector<8x256xbf16>
    %cst_27 = arith.constant dense<0.000000e+00> : vector<8x256xf32>
    %70 = tpu.matmul %68, %69, %cst_27 {dimension_numbers = #tpu.dot_dimension_numbers<[1], [0], [0], [1], [0, 0, 1, 1], [], []>} : vector<8x8xbf16>, vector<8x256xbf16>, vector<8x256xf32> -> vector<8x256xf32>
    %c0_28 = arith.constant 0 : index
    %c0_29 = arith.constant 0 : index
    %71 = vector.load %arg6[%c0_28, %c0_29] : memref<8x1xf32, #tpu.memory_space<vmem>>, vector<8x1xf32>
    %72 = vector.broadcast %71 : vector<8x1xf32> to vector<8x256xf32>
    %73 = arith.addf %70, %72 : vector<8x256xf32>
    %74 = vector.extract_strided_slice %73 {offsets = [0, 0], sizes = [4, 256], strides = [1, 1]} : vector<8x256xf32> to vector<4x256xf32>
    %75 = vector.extract_strided_slice %73 {offsets = [4, 0], sizes = [4, 256], strides = [1, 1]} : vector<8x256xf32> to vector<4x256xf32>
    %76 = math.cos %75 : vector<4x256xf32>
    %77 = arith.mulf %74, %76 : vector<4x256xf32>
    %78 = vector.extract_strided_slice %73 {offsets = [0, 0], sizes = [4, 256], strides = [1, 1]} : vector<8x256xf32> to vector<4x256xf32>
    %79 = vector.extract_strided_slice %73 {offsets = [4, 0], sizes = [4, 256], strides = [1, 1]} : vector<8x256xf32> to vector<4x256xf32>
    %80 = math.sin %79 : vector<4x256xf32>
    %81 = arith.mulf %78, %80 : vector<4x256xf32>
    %82 = tpu.concatenate %77, %81 in 0 : vector<4x256xf32>, vector<4x256xf32> -> vector<8x256xf32>
    %83 = arith.truncf %82 : vector<8x256xf32> to vector<8x256xbf16>
    %c0_30 = arith.constant 0 : index
    %c0_31 = arith.constant 0 : index
    %84 = vector.load %arg7[%c0_30, %c0_31] : memref<256x512xbf16, #tpu.memory_space<vmem>>, vector<256x512xbf16>
    %cst_32 = arith.constant dense<0.000000e+00> : vector<8x512xf32>
    %85 = tpu.matmul %83, %84, %cst_32 {dimension_numbers = #tpu.dot_dimension_numbers<[1], [0], [0], [1], [0, 0, 1, 1], [], []>} : vector<8x256xbf16>, vector<256x512xbf16>, vector<8x512xf32> -> vector<8x512xf32>
    %86 = vector.extract_strided_slice %85 {offsets = [0, 0], sizes = [4, 256], strides = [1, 1]} : vector<8x512xf32> to vector<4x256xf32>
    %87 = vector.extract_strided_slice %85 {offsets = [4, 256], sizes = [4, 256], strides = [1, 1]} : vector<8x512xf32> to vector<4x256xf32>
    %88 = arith.subf %86, %87 : vector<4x256xf32>
    %89 = vector.extract_strided_slice %85 {offsets = [0, 256], sizes = [4, 256], strides = [1, 1]} : vector<8x512xf32> to vector<4x256xf32>
    %90 = vector.extract_strided_slice %85 {offsets = [4, 0], sizes = [4, 256], strides = [1, 1]} : vector<8x512xf32> to vector<4x256xf32>
    %91 = arith.addf %89, %90 : vector<4x256xf32>
    %92 = arith.mulf %88, %88 : vector<4x256xf32>
    %93 = arith.mulf %91, %91 : vector<4x256xf32>
    %94 = arith.addf %92, %93 : vector<4x256xf32>
    %95 = math.sqrt %94 : vector<4x256xf32>
    %c0_33 = arith.constant 0 : index
    %c0_34 = arith.constant 0 : index
    %96 = vector.load %arg8[%c0_33, %c0_34] : memref<4x4xbf16, #tpu.memory_space<vmem>>, vector<4x4xbf16>
    %97 = arith.truncf %95 : vector<4x256xf32> to vector<4x256xbf16>
    %cst_35 = arith.constant dense<0.000000e+00> : vector<4x256xf32>
    %98 = tpu.matmul %96, %97, %cst_35 {dimension_numbers = #tpu.dot_dimension_numbers<[1], [0], [0], [1], [0, 0, 1, 1], [], []>} : vector<4x4xbf16>, vector<4x256xbf16>, vector<4x256xf32> -> vector<4x256xf32>
    %c0_36 = arith.constant 0 : index
    %c0_37 = arith.constant 0 : index
    %99 = vector.load %arg9[%c0_36, %c0_37] : memref<4x1xf32, #tpu.memory_space<vmem>>, vector<4x1xf32>
    %100 = vector.broadcast %99 : vector<4x1xf32> to vector<4x256xf32>
    %101 = arith.addf %98, %100 : vector<4x256xf32>
    %102 = arith.truncf %101 : vector<4x256xf32> to vector<4x256xbf16>
    %c0_38 = arith.constant 0 : index
    %c0_39 = arith.constant 0 : index
    %103 = vector.load %arg10[%c0_38, %c0_39] : memref<256x1024xbf16, #tpu.memory_space<vmem>>, vector<256x1024xbf16>
    %cst_40 = arith.constant dense<0.000000e+00> : vector<4x1024xf32>
    %104 = tpu.matmul %102, %103, %cst_40 {dimension_numbers = #tpu.dot_dimension_numbers<[1], [0], [0], [1], [0, 0, 1, 1], [], []>} : vector<4x256xbf16>, vector<256x1024xbf16>, vector<4x1024xf32> -> vector<4x1024xf32>
    %c0_41 = arith.constant 0 : index
    %c0_42 = arith.constant 0 : index
    %c0_43 = arith.constant 0 : index
    %105 = vector.load %arg11[%c0_41, %c0_42, %c0_43] : memref<1x4x1024xf32, #tpu.memory_space<vmem>>, vector<1x4x1024xf32>
    %106 = vector.shape_cast %105 : vector<1x4x1024xf32> to vector<4x1024xf32>
    %107 = vector.shape_cast %104 : vector<4x1024xf32> to vector<1x4x1024xf32>
    tpu.vector_store %arg11[%c0_41, %c0_42, %c0_43], %107 {strides = array<i32>} : memref<1x4x1024xf32, #tpu.memory_space<vmem>>, vector<1x4x1024xf32>,
    return
  }
  func.func @transform_0(%arg0: i32) -> (i32, i32, i32) {
    %c0_i32 = arith.constant 0 : i32
    %c0_i32_0 = arith.constant 0 : i32
    %c0_i32_1 = arith.constant 0 : i32
    return %arg0, %c0_i32, %c0_i32_0 : i32, i32, i32
  }
  func.func @transform_1(%arg0: i32) -> (i32, i32) {
    %c0_i32 = arith.constant 0 : i32
    %c0_i32_0 = arith.constant 0 : i32
    %c0_i32_1 = arith.constant 0 : i32
    return %c0_i32, %c0_i32_0 : i32, i32
  }
  func.func @transform_2(%arg0: i32) -> (i32, i32) {
    %c0_i32 = arith.constant 0 : i32
    %c0_i32_0 = arith.constant 0 : i32
    %c0_i32_1 = arith.constant 0 : i32
    return %c0_i32, %c0_i32_0 : i32, i32
  }
  func.func @transform_3(%arg0: i32) -> (i32, i32) {
    %c0_i32 = arith.constant 0 : i32
    %c0_i32_0 = arith.constant 0 : i32
    %c0_i32_1 = arith.constant 0 : i32
    return %c0_i32, %c0_i32_0 : i32, i32
  }
  func.func @transform_4(%arg0: i32) -> (i32, i32) {
    %c0_i32 = arith.constant 0 : i32
    %c0_i32_0 = arith.constant 0 : i32
    %c0_i32_1 = arith.constant 0 : i32
    return %c0_i32, %c0_i32_0 : i32, i32
  }
  func.func @transform_5(%arg0: i32) -> (i32, i32) {
    %c0_i32 = arith.constant 0 : i32
    %c0_i32_0 = arith.constant 0 : i32
    %c0_i32_1 = arith.constant 0 : i32
    return %c0_i32, %c0_i32_0 : i32, i32
  }
  func.func @transform_6(%arg0: i32) -> (i32, i32) {
    %c0_i32 = arith.constant 0 : i32
    %c0_i32_0 = arith.constant 0 : i32
    %c0_i32_1 = arith.constant 0 : i32
    return %c0_i32, %c0_i32_0 : i32, i32
  }
  func.func @transform_7(%arg0: i32) -> (i32, i32) {
    %c0_i32 = arith.constant 0 : i32
    %c0_i32_0 = arith.constant 0 : i32
    %c0_i32_1 = arith.constant 0 : i32
    return %c0_i32, %c0_i32_0 : i32, i32
  }
  func.func @transform_8(%arg0: i32) -> (i32, i32) {
    %c0_i32 = arith.constant 0 : i32
    %c0_i32_0 = arith.constant 0 : i32
    %c0_i32_1 = arith.constant 0 : i32
    return %c0_i32, %c0_i32_0 : i32, i32
  }
  func.func @transform_9(%arg0: i32) -> (i32, i32) {
    %c0_i32 = arith.constant 0 : i32
    %c0_i32_0 = arith.constant 0 : i32
    %c0_i32_1 = arith.constant 0 : i32
    return %c0_i32, %c0_i32_0 : i32, i32
  }
  func.func @transform_10(%arg0: i32) -> (i32, i32, i32) {
    %c0_i32 = arith.constant 0 : i32
    %c0_i32_0 = arith.constant 0 : i32
    %c0_i32_1 = arith.constant 0 : i32
    return %arg0, %c0_i32, %c0_i32_0 : i32, i32, i32
  }
}

</mosaic_0001>

<bundles_post_ra>
// kernel: freup_areainterp_v2.1
= control target key start
LH: loop header
LB: loop body
LE: loop exit
PB: predicated region body
PF: predicated region fallthrough
CT: control target
= control target key end

     0   :  { %15 = vsyncpa [#allocation3], 0  ;;  %s4098_s0 = inlined_call_operand.vmem [shape: f32[2,4,256], index: 0, kind: input, shape index: {}]   ;;  %s4099_s1 = inlined_call_operand.hbm [shape: bf16[256,512], index: 1, kind: input, shape index: {}]   ;;  %s4100_s2 = inlined_call_operand.vmem [shape: bf16[8,8], index: 2, kind: input, shape index: {}]   ;;  %s4101_s3 = inlined_call_operand.vmem [shape: f32[8,1], index: 3, kind: input, shape index: {}]   ;;  %s4102_s4 = inlined_call_operand.vmem [shape: bf16[8,8], index: 4, kind: input, shape index: {}]   ;;  %s4103_s5 = inlined_call_operand.vmem [shape: f32[8,1], index: 5, kind: input, shape index: {}]   ;;  %s4104_s6 = inlined_call_operand.hbm [shape: bf16[256,512], index: 6, kind: input, shape index: {}]   ;;  %s4105_s7 = inlined_call_operand.vmem [shape: bf16[4,4], index: 7, kind: input, shape index: {}]   ;;  %s4106_s8 = inlined_call_operand.vmem [shape: f32[4,1], index: 8, kind: input, shape index: {}]   ;;  %s4107_s9 = inlined_call_operand.hbm [shape: bf16[256,1024], index: 9, kind: input, shape index: {}]   ;;  %s4108_s10 = inlined_call_operand.vmem [shape: f32[2,4,1024], index: 10, kind: output, shape index: {}]  }
   0x1   :  { %16 = vsyncpa [#allocation5], 0  ;;  %s3869_s13 = smov 0  }
   0x2 LB: > { %s3875_s14 = sadd.s32 4294967295, %s3798_s13   ;;  %p3138_p0 = scmp.ge.s32.totalorder %s3798_s13, 1  ;;  %s3798_s13 = sphi %s3869_s13, %s22_s13  }
   0x3   : > { %p268_p1 = scmp.lt.s32.totalorder %s3798_s13, 3  ;;  %p3463_p2 = scmp.eq.s32.totalorder %s3875_s14, 0 }
   0x4   : > { %s3800_s16 = smov [#allocation4]   ;;  %s3801_s18 = smov [#allocation2]  }
   0x5   : > { %p3880_p3 = pnand %p3138_p0, %p268_p1  ;;  %s305_s17 = sshll.u32 %s3800_s16, 4  ;;  %s306_s17 = int_to_ptr.vmem [resolvable:$true] %s305_s17 }
   0x6   : > { %s280_s19 = sshll.u32 %s3801_s18, 4  ;;  %s3802_s21 = smov [#allocation6]   ;;  %s3886_s19 = int_to_ptr.vmem [resolvable:$true] %s280_s19 }
   0x7   : > { %p3453_p4 = pneg %p3880_p3  ;;  %s324_s22 = sshll.u32 %s3802_s21, 4  ;;  %s3894_s22 = int_to_ptr.vmem [resolvable:$true] %s324_s22 }
   0x8   : > { %s3717_s23 = scalar_lea.vmem %s306_s17, 8192  ;;  %p3725_p10 = scmp.lt.s32.totalorder %s306_s17, %s306_s17 }
   0x9   : > { %p3890_p5 = pnand %p3463_p2, %p3453_p4  ;;  %p3718_p7 = scmp.ne.s32.totalorder %s306_s17, %s3717_s23 }
   0xa   : > { %p3726_p11 = scmp.lt.s32.totalorder %s3717_s23, %s3717_s23 }
   0xb   : > { %p3708_p6 = pneg %p3890_p5 }
   0xc   : > { %p3727_p12 = por %p3726_p11, %p3725_p10 }
   0xd   : > { %p3720_p8 = pnand %p3718_p7, %p3708_p6 }
   0xf   : > { %p3721_p9 = pneg %p3720_p8 }
  0x11   : > { %p3728_p13 = pnand %p3727_p12, %p3721_p9 }
  0x13   : > { %3731 = shalt.err (!%p3728_p13)
}
  0x14   : > { %s3803_s24 = smov 256   ;;  %s3804_s25 = smov 16  }
  0x15   : > { %3459 = dma.hbm_to_vmem [thread:$0]  (!%p3890_p5), %s4104_s6, 8192, %s306_s17, [#allocation5], %s3803_s24, %s3803_s24, %s3804_s25  }
  0x16   : > { %s3743_s28 = scalar_lea.vmem %s3886_s19, 8192  ;;  %p3751_p7 = scmp.lt.s32.totalorder %s3886_s19, %s3886_s19 }
  0x17   : > { %p3744_p0 = scmp.ne.s32.totalorder %s3886_s19, %s3743_s28  ;;  %p3752_p8 = scmp.lt.s32.totalorder %s3743_s28, %s3743_s28 }
  0x19   : > { %p3746_p1 = pnand %p3744_p0, %p3708_p6  ;;  %p3753_p9 = por %p3752_p8, %p3751_p7 }
  0x1b   : > { %p3747_p4 = pneg %p3746_p1 }
  0x1d   : > { %p3754_p10 = pnand %p3753_p9, %p3747_p4 }
  0x1f   : > { %3757 = shalt.err (!%p3754_p10)
}
  0x20   : > { %3456 = dma.hbm_to_vmem [thread:$0]  (!%p3890_p5), %s4099_s1, 8192, %s3886_s19, [#allocation3], %s3803_s24, %s3803_s24, %s3804_s25  }
  0x21   : > { %s3769_s11 = scalar_lea.vmem %s3894_s22, 16384  ;;  %p3777_p0 = scmp.lt.s32.totalorder %s3894_s22, %s3894_s22 }
  0x22   : > { %p3770_p11 = scmp.ne.s32.totalorder %s3894_s22, %s3769_s11  ;;  %p3778_p1 = scmp.lt.s32.totalorder %s3769_s11, %s3769_s11 }
  0x24   : > { %p3772_p12 = pnand %p3770_p11, %p3708_p6  ;;  %p3779_p4 = por %p3778_p1, %p3777_p0 }
  0x26   : > { %p3773_p13 = pneg %p3772_p12 }
  0x28   : > { %p3780_p7 = pnand %p3779_p4, %p3773_p13 }
  0x2a   : > { %3783 = shalt.err (!%p3780_p7)
}
  0x2b   : > { %s3805_s12 = smov 512   ;;  %s3806_s16 = smov 32  }
  0x2c   : > { %3462 = dma.hbm_to_vmem [thread:$0]  (!%p3890_p5), %s4107_s9, 16384, %s3894_s22, [#allocation5], %s3805_s12, %s3805_s12, %s3806_s16  }
  0x2d   : > { %348 = sbr.rel (%p3880_p3) target bundleno = 1574 (0x626), region = 60 }
  0x32   : > { %3789 = dma.done.wait (%p3463_p2), [#allocation3], 8192  }
  0x33   : > { %3791 = vsyncadd (%p3463_p2), [#allocation3], 4294959104 }
  0x34   : > { %3793 = dma.done.wait (%p3463_p2), [#allocation5], 24576  }
  0x35   : > { %3795 = vsyncadd (%p3463_p2), [#allocation5], 4294942720  ;;  %v3493_v0 = vld [vmem:[#allocation2 + $0xe4] ss:$16 sps:$4 sm:$0xff]   ;;  %v3495_v1 = vld [vmem:[#allocation2 + $0xec] ss:$16 sps:$4 sm:$0xff]  }
  0x36   : > { %795 = vmatprep.subr.bf16.mxu0 %v3493_v0  ;;  %v3497_v2 = vld [vmem:[#allocation2 + $0xe0] ss:$16 sps:$4 sm:$0xff]   ;;  %v3498_v3 = vld [vmem:[#allocation2 + $0xe8] ss:$16 sps:$4 sm:$0xff]   ;;  %836 = vmatprep.subr.bf16.mxu1 %v3495_v1  ;;  %v3499_v4 = vld [vmem:[#allocation2 + $0xc4] ss:$16 sps:$4 sm:$0xff]  }
  0x37   : > { %796 = vmatpush1.bf16.msra.mxu0 %v3497_v2  ;;  %837 = vmatpush1.bf16.msra.mxu1 %v3498_v3  ;;  %v3501_v5 = vld [vmem:[#allocation2 + $0xcc] ss:$16 sps:$4 sm:$0xff]   ;;  %v3503_v6 = vld [vmem:[#allocation2 + $0xc0] ss:$16 sps:$4 sm:$0xff]   ;;  %v3504_v7 = vld [vmem:[#allocation2 + $0xc8] ss:$16 sps:$4 sm:$0xff]  }
  0x38   : > { %797 = vmatprep.subr.bf16.mxu0 %v3499_v4  ;;  %838 = vmatprep.subr.bf16.mxu1 %v3501_v5  ;;  %v3505_v8 = vld [vmem:[#allocation2 + $0xa4] ss:$16 sps:$4 sm:$0xff]   ;;  %v3507_v9 = vld [vmem:[#allocation2 + $0xac] ss:$16 sps:$4 sm:$0xff]   ;;  %v3509_v10 = vld [vmem:[#allocation2 + $0xa0] ss:$16 sps:$4 sm:$0xff]  }
  0x39   : > { %v3510_v11 = vld [vmem:[#allocation2 + $0xa8] ss:$16 sps:$4 sm:$0xff]   ;;  %v3511_v12 = vld [vmem:[#allocation2 + $0x84] ss:$16 sps:$4 sm:$0xff]   ;;  %v3513_v13 = vld [vmem:[#allocation2 + $0x8c] ss:$16 sps:$4 sm:$0xff]  }
  0x3a   : > { %v3515_v14 = vld [vmem:[#allocation2 + $0x80] ss:$16 sps:$4 sm:$0xff]   ;;  %v3516_v15 = vld [vmem:[#allocation2 + $0x88] ss:$16 sps:$4 sm:$0xff]   ;;  %v3517_v16 = vld [vmem:[#allocation2 + $0x64] ss:$16 sps:$4 sm:$0xff]  }
  0x3b   : > { %798 = vmatpush1.bf16.msra.mxu0 %v3503_v6  ;;  %839 = vmatpush1.bf16.msra.mxu1 %v3504_v7  ;;  %v3519_v17 = vld [vmem:[#allocation2 + $0x6c] ss:$16 sps:$4 sm:$0xff]   ;;  %v3521_v18 = vld [vmem:[#allocation2 + $0x60] ss:$16 sps:$4 sm:$0xff]   ;;  %v3522_v19 = vld [vmem:[#allocation2 + $0x68] ss:$16 sps:$4 sm:$0xff]  }
  0x3c   : > { %799 = vmatprep.subr.bf16.mxu0 %v3505_v8  ;;  %840 = vmatprep.subr.bf16.mxu1 %v3507_v9  ;;  %v3523_v20 = vld [vmem:[#allocation2 + $0x44] ss:$16 sps:$4 sm:$0xff]   ;;  %v3525_v21 = vld [vmem:[#allocation2 + $0x4c] ss:$16 sps:$4 sm:$0xff]   ;;  %v3527_v22 = vld [vmem:[#allocation2 + $0x40] ss:$16 sps:$4 sm:$0xff]  }
  0x3d   : > { %v3528_v23 = vld [vmem:[#allocation2 + $0x48] ss:$16 sps:$4 sm:$0xff]   ;;  %v3529_v24 = vld [vmem:[#allocation2 + $0x24] ss:$16 sps:$4 sm:$0xff]   ;;  %v3531_v25 = vld [vmem:[#allocation2 + $0x2c] ss:$16 sps:$4 sm:$0xff]  }
  0x3e   : > { %v3533_v26 = vld [vmem:[#allocation2 + $0x20] ss:$16 sps:$4 sm:$0xff]   ;;  %v3534_v27 = vld [vmem:[#allocation2 + $0x28] ss:$16 sps:$4 sm:$0xff]   ;;  %v3535_v28 = vld [vmem:[#allocation2 + $0x4] ss:$16 sps:$4 sm:$0xff]  }
  0x3f   : > { %800 = vmatpush1.bf16.msra.mxu0 %v3509_v10  ;;  %841 = vmatpush1.bf16.msra.mxu1 %v3510_v11  ;;  %v3537_v29 = vld [vmem:[#allocation2 + $0xc] ss:$16 sps:$4 sm:$0xff]   ;;  %v3539_v30 = vld [vmem:[#allocation2] ss:$16 sps:$4 sm:$0xff]   ;;  %v3540_v31 = vld [vmem:[#allocation2 + $0x8] ss:$16 sps:$4 sm:$0xff]  }
  0x40   : > { %801 = vmatprep.subr.bf16.mxu0 %v3511_v12  ;;  %842 = vmatprep.subr.bf16.mxu1 %v3513_v13  ;;  %v3541_v32 = vld [vmem:[#allocation2 + $0x1e4] ss:$16 sps:$4 sm:$0xff]   ;;  %p394_p2 = scmp.lt.s32.totalorder %s3875_s14, 1  ;;  %v3543_v33 = vld [vmem:[#allocation2 + $0x1ec] ss:$16 sps:$4 sm:$0xff]   ;;  %v3807_v4 = vmov 0  }
  0x41   : > { %v3545_v34 = vld [vmem:[#allocation2 + $0x1e0] ss:$16 sps:$4 sm:$0xff]   ;;  %v3546_v35 = vld [vmem:[#allocation2 + $0x1e8] ss:$16 sps:$4 sm:$0xff]   ;;  %v3547_v36 = vld [vmem:[#allocation2 + $0x1c4] ss:$16 sps:$4 sm:$0xff]   ;;  %3491 = vset.pattern.permute.xlu0 %v3807_v4  ;;  %3492 = vset.pattern.permute.xlu1 %v3807_v4 }
  0x42   : > { %s4112_s14 = smov (!%p394_p2, %s3875_s14), 1  ;;  %v3549_v37 = vld [vmem:[#allocation2 + $0x1cc] ss:$16 sps:$4 sm:$0xff]   ;;  %v3551_v38 = vld [vmem:[#allocation2 + $0x1c0] ss:$16 sps:$4 sm:$0xff]   ;;  %vm965_vm8 = vcmask 1043456  }
  0x43   : > { %802 = vmatpush1.bf16.msra.mxu0 %v3515_v14  ;;  %843 = vmatpush1.bf16.msra.mxu1 %v3516_v15  ;;  %v3552_v39 = vld [vmem:[#allocation2 + $0x1c8] ss:$16 sps:$4 sm:$0xff]   ;;  %v3553_v40 = vld [vmem:[#allocation2 + $0x1a4] ss:$16 sps:$4 sm:$0xff]   ;;  %s3431_s15 = sshll.u32 %s4112_s14, 3  ;;  %vm977_vm13 = vcmask 64512  }
  0x44   : > { %803 = vmatprep.subr.bf16.mxu0 %v3517_v16  ;;  %844 = vmatprep.subr.bf16.mxu1 %v3519_v17  ;;  %v3555_v41 = vld [vmem:[#allocation2 + $0x1ac] ss:$16 sps:$4 sm:$0xff]   ;;  %v3557_v42 = vld [vmem:[#allocation2 + $0x1a0] ss:$16 sps:$4 sm:$0xff]   ;;  %v3558_v43 = vld [vmem:[#allocation2 + $0x1a8] ss:$16 sps:$4 sm:$0xff]   ;;  %s398_s21 = scalar_lea.vmem %s4098_s0, %s3431_s15 }
  0x45   : > { %v3559_v44 = vld [vmem:[#allocation2 + $0x184] ss:$16 sps:$4 sm:$0xff]   ;;  %v3561_v45 = vld [vmem:[#allocation2 + $0x18c] ss:$16 sps:$4 sm:$0xff]   ;;  %v3563_v46 = vld [vmem:[#allocation2 + $0x180] ss:$16 sps:$4 sm:$0xff]  }
  0x46   : > { %v3564_v47 = vld [vmem:[#allocation2 + $0x188] ss:$16 sps:$4 sm:$0xff]   ;;  %v405_v48 = vld [vmem:[%s398_s21] sm:$0xff]  ;;  %v3567_v50 = vld [vmem:[#allocation2 + $0x16c] ss:$16 sps:$4 sm:$0xff]   ;;  %s3432_s17 = sshll.u32 %s4112_s14, 5 }
  0x47   : > { %804 = vmatpush1.bf16.msra.mxu0 %v3521_v18  ;;  %845 = vmatpush1.bf16.msra.mxu1 %v3522_v19  ;;  %v3565_v49 = vld [vmem:[#allocation2 + $0x164] ss:$16 sps:$4 sm:$0xff]   ;;  %v407_v51 = vcombine.high %v405_v48, %v405_v48  ;;  %v3569_v53 = vld [vmem:[#allocation2 + $0x160] ss:$16 sps:$4 sm:$0xff]   ;;  %v3570_v54 = vld [vmem:[#allocation2 + $0x168] ss:$16 sps:$4 sm:$0xff]   ;;  %v409_v3 = vpack.c.bf16 %v405_v48, %v405_v48  ;;  %s403_s19 = scalar_lea.vmem %s4108_s10, %s3432_s17 }
  0x48   : > { %805 = vmatprep.subr.bf16.mxu0 %v3523_v20  ;;  %846 = vmatprep.subr.bf16.mxu1 %v3525_v21  ;;  %v3571_v55 = vld [vmem:[#allocation2 + $0x144] ss:$16 sps:$4 sm:$0xff]   ;;  %v3573_v56 = vld [vmem:[#allocation2 + $0x14c] ss:$16 sps:$4 sm:$0xff]   ;;  %v3575_v57 = vld [vmem:[#allocation2 + $0x140] ss:$16 sps:$4 sm:$0xff]  }
  0x49   : > { %v410_v52 = vpack.c.bf16 %v407_v51, %v407_v51  ;;  %v3576_v58 = vld [vmem:[#allocation2 + $0x148] ss:$16 sps:$4 sm:$0xff]   ;;  %v3577_v59 = vld [vmem:[#allocation2 + $0x124] ss:$16 sps:$4 sm:$0xff]   ;;  %v3579_v60 = vld [vmem:[#allocation2 + $0x12c] ss:$16 sps:$4 sm:$0xff]  }
  0x4a   : > { %v3581_v61 = vld [vmem:[#allocation2 + $0x120] ss:$16 sps:$4 sm:$0xff]   ;;  %v3582_v62 = vld [vmem:[#allocation2 + $0x128] ss:$16 sps:$4 sm:$0xff]   ;;  %v3583_v63 = vld [vmem:[#allocation2 + $0x104] ss:$16 sps:$4 sm:$0xff]  }
  0x4b   : > { %806 = vmatpush1.bf16.msra.mxu0 %v3527_v22  ;;  %847 = vmatpush1.bf16.msra.mxu1 %v3528_v23  ;;  %v3585_v0 = vld [vmem:[#allocation2 + $0x10c] ss:$16 sps:$4 sm:$0xff]   ;;  %v3587_v1 = vld [vmem:[#allocation2 + $0x100] ss:$16 sps:$4 sm:$0xff]   ;;  %v3588_v2 = vld [vmem:[#allocation2 + $0x108] ss:$16 sps:$4 sm:$0xff]  }
  0x4c   : > { %807 = vmatprep.subr.bf16.mxu0 %v3529_v24  ;;  %848 = vmatprep.subr.bf16.mxu1 %v3531_v25  ;;  %v971_v5 = vld [vmem:[%s4101_s3] sm:$0xff] }
  0x4d   : > { %827 = vmatprep.mubr.bf16.mxu0 %v410_v52  ;;  %868 = vmatprep.mubr.bf16.mxu1 %v410_v52  ;;  %v1037_v6 = vld [vmem:[%s4103_s5] sm:$0xff] }
  0x4e   : > { %974 = vperm.xlu0 %3491, %v971_v5  }
  0x4f   : > { %808 = vmatpush1.bf16.msra.mxu0 %v3533_v26  ;;  %849 = vmatpush1.bf16.msra.mxu1 %v3534_v27 }
  0x50   : > { %809 = vmatprep.subr.bf16.mxu0 %v3535_v28  ;;  %850 = vmatprep.subr.bf16.mxu1 %v3537_v29 }
  0x52   : > { %1040 = vperm.xlu0 %3491, %v1037_v6  }
  0x53   : > { %810 = vmatpush1.bf16.msra.mxu0 %v3539_v30  ;;  %851 = vmatpush1.bf16.msra.mxu1 %v3540_v31 }
  0x54   : > { %811 = vmatprep.subr.bf16.mxu0 %v3541_v32  ;;  %852 = vmatprep.subr.bf16.mxu1 %v3543_v33 }
  0x57   : > { %812 = vmatpush2.bf16.msra.mxu0 %v3545_v34  ;;  %853 = vmatpush2.bf16.msra.mxu1 %v3546_v35 }
  0x58   : > { %813 = vmatprep.subr.bf16.mxu0 %v3547_v36  ;;  %854 = vmatprep.subr.bf16.mxu1 %v3549_v37 }
  0x5b   : > { %814 = vmatpush2.bf16.msra.mxu0 %v3551_v38  ;;  %855 = vmatpush2.bf16.msra.mxu1 %v3552_v39 }
  0x5c   : > { %815 = vmatprep.subr.bf16.mxu0 %v3553_v40  ;;  %856 = vmatprep.subr.bf16.mxu1 %v3555_v41 }
  0x5f   : > { %816 = vmatpush2.bf16.msra.mxu0 %v3557_v42  ;;  %857 = vmatpush2.bf16.msra.mxu1 %v3558_v43 }
  0x60   : > { %817 = vmatprep.subr.bf16.mxu0 %v3559_v44  ;;  %858 = vmatprep.subr.bf16.mxu1 %v3561_v45 }
  0x63   : > { %818 = vmatpush2.bf16.msra.mxu0 %v3563_v46  ;;  %859 = vmatpush2.bf16.msra.mxu1 %v3564_v47 }
  0x64   : > { %819 = vmatprep.subr.bf16.mxu0 %v3565_v49  ;;  %860 = vmatprep.subr.bf16.mxu1 %v3567_v50 }
  0x67   : > { %820 = vmatpush2.bf16.msra.mxu0 %v3569_v53  ;;  %861 = vmatpush2.bf16.msra.mxu1 %v3570_v54 }
  0x68   : > { %821 = vmatprep.subr.bf16.mxu0 %v3571_v55  ;;  %862 = vmatprep.subr.bf16.mxu1 %v3573_v56 }
  0x6b   : > { %822 = vmatpush2.bf16.msra.mxu0 %v3575_v57  ;;  %863 = vmatpush2.bf16.msra.mxu1 %v3576_v58 }
  0x6c   : > { %823 = vmatprep.subr.bf16.mxu0 %v3577_v59  ;;  %864 = vmatprep.subr.bf16.mxu1 %v3579_v60 }
  0x6f   : > { %824 = vmatpush2.bf16.msra.mxu0 %v3581_v61  ;;  %865 = vmatpush2.bf16.msra.mxu1 %v3582_v62 }
  0x70   : > { %825 = vmatprep.subr.bf16.mxu0 %v3583_v63  ;;  %866 = vmatprep.subr.bf16.mxu1 %v3585_v0 }
  0x73   : > { %826 = vmatpush2.bf16.msra.mxu0 %v3587_v1  ;;  %867 = vmatpush2.bf16.msra.mxu1 %v3588_v2 }
  0x76   : > { %828 = vmatmul.mubr.bf16.vlgmr.msra.gmra.mxu0 %v409_v3  ;;  %869 = vmatmul.mubr.bf16.vlgmr.msra.gmra.mxu1 %v409_v3 }
  0x77   : > { %1019 = vmatprep.mubr.bf16.mxu0 %v3807_v4  ;;  %1084 = vmatprep.mubr.bf16.mxu1 %v3807_v4 }
 0x136   : > { %v3960_v7 = vpop.f32.mrf.mxu0  ;;  %v3962_v8 = vpop.f32.mrf.mxu1 }
 0x137   : > { %v3965_v9 = vand.u32 2147483647, %v3960_v7  ;;  %v3968_v10 = vand.u32 2147483647, %v3962_v8  ;;  %v877_v35 = vmul.f32 %v3960_v7, %v3960_v7  ;;  %v879_v36 = vmul.f32 %v3962_v8, %v3962_v8 }
 0x138   : > { %v3970_v11 = vpop.f32.mrf.mxu0  ;;  %v3972_v12 = vpop.f32.mrf.mxu1  ;;  %vm947_vm3 = vcmp.lt.f32.partialorder %v3960_v7, 0.0  ;;  %vm953_vm6 = vcmp.lt.f32.partialorder %v3962_v8, 0.0 }
 0x139   : > { %v3975_v13 = vand.u32 2147483647, %v3970_v11  ;;  %v901_v14 = vmax.f32 %v3965_v9, %v3968_v10  ;;  %v3980_v17 = vand.u32 2147483647, %v3972_v12  ;;  %v903_v23 = vmin.f32 %v3965_v9, %v3968_v10 }
 0x13a   : > { %v833_v15 = vpop.f32.mrf.mxu0  ;;  %v874_v16 = vpop.f32.mrf.mxu1  ;;  %v878_v41 = vmul.f32 %v3970_v11, %v3970_v11  ;;  %v880_v42 = vmul.f32 %v3972_v12, %v3972_v12  ;;  %v881_v43 = vadd.f32 %v879_v36, %v877_v35  ;;  %vm941_vm2 = vcmp.gt.f32.partialorder %v3968_v10, %v3965_v9 }
 0x13b   : > { %vm905_vm0 = vcmp.gt.f32.partialorder %v901_v14, 0.0  ;;  %v902_v21 = vmax.f32 %v3975_v13, %v3980_v17  ;;  %v904_v26 = vmin.f32 %v3975_v13, %v3980_v17  ;;  %vm942_vm4 = vcmp.gt.f32.partialorder %v3980_v17, %v3975_v13 }
 0x13c   : > { %v834_v18 = vpop.f32.mrf.mxu0  ;;  %v875_v19 = vpop.f32.mrf.mxu1  ;;  %v907_v20 = vsel %vm905_vm0, %v901_v14, 1.0  ;;  %v882_v48 = vadd.f32 %v880_v42, %v878_v41  ;;  %vm885_vm5 = vcmp.eq.f32.partialorder %v881_v43, inf  ;;  %vm948_vm7 = vcmp.lt.f32.partialorder %v3970_v11, 0.0 }
 0x13d   : > { %3686 = vrcp.f32 %v907_v20  ;;  %vm906_vm1 = vcmp.gt.f32.partialorder %v902_v21, 0.0  ;;  %vm887_vm10 = vcmp.eq.f32.partialorder %v881_v43, 0.0  ;;  %vm954_vm11 = vcmp.lt.f32.partialorder %v3972_v12, 0.0  ;;  %v968_v12 = vld [vmem:[%s4100_s2] sm:$0xf] }
 0x13e   : > { %v908_v22 = vsel %vm906_vm1, %v902_v21, 1.0  ;;  %v888_v21 = vand.u32 2147483648, %v881_v43  ;;  %vm892_vm9 = vcmp.eq.f32.partialorder %v882_v48, inf  ;;  %vm894_vm12 = vcmp.eq.f32.partialorder %v882_v48, 0.0 }
 0x13f   : > { %3688 = vrcp.f32 %v908_v22 }
 0x140   : > { %3690 = vrsqrt.f32 %v881_v43 }
 0x141   : > { %3692 = vrsqrt.f32 %v882_v48 }
 0x14a   : > { %v3687_v24 = vpop.eup %3686 }
 0x14b   : > { %v911_v25 = vmul.f32 %v3687_v24, %v903_v23  ;;  %v895_v24 = vand.u32 2147483648, %v882_v48 }
 0x14c   : > { %v3689_v27 = vpop.eup %3688 }
 0x14d   : > { %v913_v28 = vmul.f32 %v911_v25, %v911_v25  ;;  %v912_v29 = vmul.f32 %v3689_v27, %v904_v26  ;;  %v3691_v62 = vpop.eup %3690 }
 0x14e   : > { %v3693_v2 = vpop.eup %3692  ;;  %v884_v6 = vmul.f32 %v3691_v62, %v881_v43  ;;  %v3619_v62 = vld [vmem:[#allocation4 + $0x6c] ss:$16 sps:$4 sm:$0xff]  }
 0x14f   : > { %v915_v30 = vmul.f32 0.008405532, %v913_v28  ;;  %v914_v31 = vmul.f32 %v912_v29, %v912_v29  ;;  %v891_v19 = vmul.f32 %v3693_v2, %v882_v48  ;;  %v3625_v2 = vld [vmem:[#allocation4 + $0x4c] ss:$16 sps:$4 sm:$0xff]  }
 0x150   : > { %v886_v9 = vsel %vm885_vm5, %v881_v43, %v884_v6  ;;  %v3628_v6 = vld [vmem:[#allocation4 + $0x24] ss:$16 sps:$4 sm:$0xff]  }
 0x151   : > { %v917_v32 = vadd.f32 -0.03852766, %v915_v30  ;;  %v916_v33 = vmul.f32 0.008405532, %v914_v31  ;;  %v893_v13 = vsel %vm892_vm9, %v882_v48, %v891_v19  ;;  %v889_v17 = vsel %vm887_vm10, %v888_v21, %v886_v9  ;;  %v975_v30 = vpop.permute.xlu0 %974  ;;  %v3593_v48 = vld [vmem:[#allocation4 + $0xe8] ss:$16 sps:$4 sm:$0xff]  }
 0x152   : > { %v896_v11 = vsel %vm894_vm12, %v895_v24, %v893_v13  ;;  %v3637_v19 = vld [vmem:[#allocation4 + $0xc] ss:$16 sps:$4 sm:$0xff]   ;;  %v3632_v9 = vld [vmem:[#allocation4] ss:$16 sps:$4 sm:$0xff]   ;;  %v3646_v13 = vld [vmem:[#allocation4 + $0x1c4] ss:$16 sps:$4 sm:$0xff]  }
 0x153   : > { %v919_v34 = vmul.f32 %v917_v32, %v913_v28  ;;  %v918_v37 = vadd.f32 -0.03852766, %v916_v33  ;;  %v3643_v21 = vld [vmem:[#allocation4 + $0x1ec] ss:$16 sps:$4 sm:$0xff]   ;;  %v3647_v24 = vld [vmem:[#allocation4 + $0x1c8] ss:$16 sps:$4 sm:$0xff]  }
 0x155   : > { %v921_v38 = vadd.f32 0.08544537, %v919_v34  ;;  %v920_v39 = vmul.f32 %v918_v37, %v914_v31 }
 0x157   : > { %v923_v40 = vmul.f32 %v921_v38, %v913_v28  ;;  %v922_v44 = vadd.f32 0.08544537, %v920_v39 }
 0x159   : > { %v925_v45 = vadd.f32 -0.13561851, %v923_v40  ;;  %v924_v46 = vmul.f32 %v922_v44, %v914_v31  ;;  %v1034_v44 = vld [vmem:[%s4102_s4] sm:$0xf] }
 0x15b   : > { %v927_v47 = vmul.f32 %v925_v45, %v913_v28  ;;  %v926_v49 = vadd.f32 -0.13561851, %v924_v46  ;;  %v3592_v45 = vld [vmem:[#allocation4 + $0xe4] ss:$16 sps:$4 sm:$0xff]   ;;  %v3595_v46 = vld [vmem:[#allocation4 + $0xec] ss:$16 sps:$4 sm:$0xff]  }
 0x15d   : > { %v929_v50 = vadd.f32 0.19897287, %v927_v47  ;;  %v928_v51 = vmul.f32 %v926_v49, %v914_v31  ;;  %v3590_v47 = vld [vmem:[#allocation4 + $0xe0] ss:$16 sps:$4 sm:$0xff]   ;;  %v3598_v49 = vld [vmem:[#allocation4 + $0xc4] ss:$16 sps:$4 sm:$0xff]  }
 0x15f   : > { %v931_v52 = vmul.f32 %v929_v50, %v913_v28  ;;  %v930_v53 = vadd.f32 0.19897287, %v928_v51  ;;  %v3601_v50 = vld [vmem:[#allocation4 + $0xcc] ss:$16 sps:$4 sm:$0xff]   ;;  %v3596_v51 = vld [vmem:[#allocation4 + $0xc0] ss:$16 sps:$4 sm:$0xff]  }
 0x161   : > { %v933_v54 = vadd.f32 -0.3332772, %v931_v52  ;;  %v932_v55 = vmul.f32 %v930_v53, %v914_v31  ;;  %v3599_v52 = vld [vmem:[#allocation4 + $0xc8] ss:$16 sps:$4 sm:$0xff]   ;;  %v3604_v53 = vld [vmem:[#allocation4 + $0xa4] ss:$16 sps:$4 sm:$0xff]  }
 0x163   : > { %v935_v56 = vmul.f32 %v933_v54, %v913_v28  ;;  %v934_v57 = vadd.f32 -0.3332772, %v932_v55  ;;  %v3607_v54 = vld [vmem:[#allocation4 + $0xac] ss:$16 sps:$4 sm:$0xff]   ;;  %v3602_v55 = vld [vmem:[#allocation4 + $0xa0] ss:$16 sps:$4 sm:$0xff]  }
 0x165   : > { %v937_v58 = vadd.f32 0.99999946, %v935_v56  ;;  %v936_v59 = vmul.f32 %v934_v57, %v914_v31  ;;  %v3605_v56 = vld [vmem:[#allocation4 + $0xa8] ss:$16 sps:$4 sm:$0xff]   ;;  %v3610_v57 = vld [vmem:[#allocation4 + $0x84] ss:$16 sps:$4 sm:$0xff]  }
 0x167   : > { %v939_v60 = vmul.f32 %v937_v58, %v911_v25  ;;  %v938_v61 = vadd.f32 0.99999946, %v936_v59  ;;  %v3613_v58 = vld [vmem:[#allocation4 + $0x8c] ss:$16 sps:$4 sm:$0xff]   ;;  %v3608_v59 = vld [vmem:[#allocation4 + $0x80] ss:$16 sps:$4 sm:$0xff]  }
 0x169   : > { %v943_v63 = vsub.f32 1.5707964, %v939_v60  ;;  %v940_v0 = vmul.f32 %v938_v61, %v912_v29  ;;  %v3616_v61 = vld [vmem:[#allocation4 + $0x64] ss:$16 sps:$4 sm:$0xff]  }
 0x16b   : > { %v945_v1 = vsel %vm941_vm2, %v943_v63, %v939_v60  ;;  %v944_v5 = vsub.f32 1.5707964, %v940_v0  ;;  %v3611_v60 = vld [vmem:[#allocation4 + $0x88] ss:$16 sps:$4 sm:$0xff]   ;;  %v3614_v63 = vld [vmem:[#allocation4 + $0x60] ss:$16 sps:$4 sm:$0xff]  }
 0x16c   : > { %v949_v3 = vsub.f32 3.1415927, %v945_v1 }
 0x16d   : > { %v946_v15 = vsel %vm942_vm4, %v944_v5, %v940_v0  ;;  %v3617_v0 = vld [vmem:[#allocation4 + $0x68] ss:$16 sps:$4 sm:$0xff]  }
 0x16e   : > { %v951_v14 = vsel %vm947_vm3, %v949_v3, %v945_v1  ;;  %v950_v18 = vsub.f32 3.1415927, %v946_v15  ;;  %v3622_v1 = vld [vmem:[#allocation4 + $0x44] ss:$16 sps:$4 sm:$0xff]   ;;  %v3620_v3 = vld [vmem:[#allocation4 + $0x40] ss:$16 sps:$4 sm:$0xff]  }
 0x16f   : > { %v955_v16 = vsub.f32 0.0, %v951_v14  ;;  %v3623_v5 = vld [vmem:[#allocation4 + $0x48] ss:$16 sps:$4 sm:$0xff]  }
 0x170   : > { %v952_v20 = vsel %vm948_vm7, %v950_v18, %v946_v15  ;;  %v3626_v15 = vld [vmem:[#allocation4 + $0x20] ss:$16 sps:$4 sm:$0xff]   ;;  %v3634_v18 = vld [vmem:[#allocation4 + $0x4] ss:$16 sps:$4 sm:$0xff]  }
 0x171   : > { %v957_v10 = vsel %vm953_vm6, %v955_v16, %v951_v14  ;;  %v956_v7 = vsub.f32 0.0, %v952_v20  ;;  %v3631_v14 = vld [vmem:[#allocation4 + $0x2c] ss:$16 sps:$4 sm:$0xff]   ;;  %v3629_v16 = vld [vmem:[#allocation4 + $0x28] ss:$16 sps:$4 sm:$0xff]  }
 0x172   : > { %v961_v22 = vrot.slane %v957_v10, 4  ;;  %v3635_v10 = vld [vmem:[#allocation4 + $0x8] ss:$16 sps:$4 sm:$0xff]  }
 0x173   : > { %v958_v23 = vsel %vm954_vm11, %v956_v7, %v952_v20  ;;  %v3640_v20 = vld [vmem:[#allocation4 + $0x1e4] ss:$16 sps:$4 sm:$0xff]   ;;  %v3641_v7 = vld [vmem:[#allocation4 + $0x1e8] ss:$16 sps:$4 sm:$0xff]  }
 0x174   : > { %v966_v25 = vsel %vm965_vm8, %v889_v17, %v961_v22  ;;  %v962_v8 = vrot.slane %v958_v23, 4  ;;  %v3638_v22 = vld [vmem:[#allocation4 + $0x1e0] ss:$16 sps:$4 sm:$0xff]   ;;  %v3649_v17 = vld [vmem:[#allocation4 + $0x1cc] ss:$16 sps:$4 sm:$0xff]  }
 0x175   : > { %v969_v26 = vpack.c.bf16 %v966_v25, %v966_v25  ;;  %v3644_v23 = vld [vmem:[#allocation4 + $0x1c0] ss:$16 sps:$4 sm:$0xff]   ;;  %v3652_v25 = vld [vmem:[#allocation4 + $0x1a4] ss:$16 sps:$4 sm:$0xff]  }
 0x176   : > { %v967_v27 = vsel %vm965_vm8, %v896_v11, %v962_v8  ;;  %v3655_v8 = vld [vmem:[#allocation4 + $0x1ac] ss:$16 sps:$4 sm:$0xff]   ;;  %v3650_v11 = vld [vmem:[#allocation4 + $0x1a0] ss:$16 sps:$4 sm:$0xff]  }
 0x177   : > { %v970_v28 = vpack.c.bf16 %v967_v27, %v967_v27  ;;  %v982_v29 = vsel %vm965_vm8, %v969_v26, 0  ;;  %v3653_v26 = vld [vmem:[#allocation4 + $0x1a8] ss:$16 sps:$4 sm:$0xff]   ;;  %v3658_v27 = vld [vmem:[#allocation4 + $0x184] ss:$16 sps:$4 sm:$0xff]  }
 0x179   : > { %3215 = vmatprep.subr.msk.bf16.mxu0 %vm965_vm8, %v970_v28  ;;  %v3661_v28 = vld [vmem:[#allocation4 + $0x18c] ss:$16 sps:$4 sm:$0xff]  }
 0x17a   : > { %1002 = vmatpush1.bf16.msra.mxu0 %v982_v29  ;;  %v3656_v29 = vld [vmem:[#allocation4 + $0x180] ss:$16 sps:$4 sm:$0xff]  }
 0x17b   : > { %1917 = vmatprep.subr.bf16.mxu0 %v3592_v45  ;;  %v3683_v45 = vld [vmem:[#allocation4 + $0x108] ss:$16 sps:$4 sm:$0xff]  }
 0x17d   : > { %3216 = vmatmul.mubr.msk.bf16.vlgmr.msra.gmra.mxu0 %vm977_vm13, %v968_v12  ;;  %v3659_v12 = vld [vmem:[#allocation4 + $0x188] ss:$16 sps:$4 sm:$0xff]  }
 0x17e   : > { %1918 = vmatpush1.bf16.msra.mxu0 %v3590_v47 }
 0x17f   : > { %1919 = vmatprep.subr.bf16.mxu0 %v3598_v49 }
 0x182   : > { %1920 = vmatpush1.bf16.msra.mxu0 %v3596_v51 }
 0x183   : > { %1921 = vmatprep.subr.bf16.mxu0 %v3604_v53 }
 0x186   : > { %1922 = vmatpush1.bf16.msra.mxu0 %v3602_v55 }
 0x187   : > { %1923 = vmatprep.subr.bf16.mxu0 %v3610_v57 }
 0x18a   : > { %1924 = vmatpush1.bf16.msra.mxu0 %v3608_v59 }
 0x18b   : > { %1925 = vmatprep.subr.bf16.mxu0 %v3616_v61 }
 0x18e   : > { %1926 = vmatpush1.bf16.msra.mxu0 %v3614_v63 }
 0x18f   : > { %1927 = vmatprep.subr.bf16.mxu0 %v3622_v1 }
 0x192   : > { %1928 = vmatpush1.bf16.msra.mxu0 %v3620_v3 }
 0x193   : > { %1929 = vmatprep.subr.bf16.mxu0 %v3628_v6 }
 0x196   : > { %1930 = vmatpush1.bf16.msra.mxu0 %v3626_v15 }
 0x197   : > { %1931 = vmatprep.subr.bf16.mxu0 %v3634_v18  ;;  %v3808_v18 = vmov 683565275  }
 0x19a   : > { %1932 = vmatpush1.bf16.msra.mxu0 %v3632_v9  ;;  %v3809_v9 = vmov 2475754826  }
 0x19b   : > { %1933 = vmatprep.subr.bf16.mxu0 %v3640_v20  ;;  %v3810_v20 = vmov 2131351028  }
 0x19e   : > { %1934 = vmatpush2.bf16.msra.mxu0 %v3638_v22  ;;  %v3811_v22 = vmov 2102212464  }
 0x19f   : > { %1935 = vmatprep.subr.bf16.mxu0 %v3646_v13 }
 0x1a2   : > { %1936 = vmatpush2.bf16.msra.mxu0 %v3644_v23 }
 0x1a3   : > { %1937 = vmatprep.subr.bf16.mxu0 %v3652_v25 }
 0x1a6   : > { %1938 = vmatpush2.bf16.msra.mxu0 %v3650_v11 }
 0x1a7   : > { %1939 = vmatprep.subr.bf16.mxu0 %v3658_v27 }
 0x1aa   : > { %1940 = vmatpush2.bf16.msra.mxu0 %v3656_v29 }
 0x23d   : > { %v1021_v31 = vpop.f32.mrf.mxu0 }
 0x23e   : > { %v1022_v32 = vadd.f32 %v1021_v31, %v975_v30  ;;  %v3667_v31 = vld [vmem:[#allocation4 + $0x16c] ss:$16 sps:$4 sm:$0xff]  }
 0x23f   : > { %v1023_v33 = vpop.f32.mrf.mxu0 }
 0x240   : > { %vm1028_vm14 = vcmp.gt.f32.partialorder %v1022_v32, 0.0  ;;  %v1030_v34 = vmul.f32 0.1, %v1022_v32  ;;  %v1024_v35 = vadd.f32 %v1023_v33, %v975_v30  ;;  %v3664_v30 = vld [vmem:[#allocation4 + $0x164] ss:$16 sps:$4 sm:$0xff]  }
 0x241   : > { %v1025_v36 = vpop.f32.mrf.mxu0  ;;  %v3665_v33 = vld [vmem:[#allocation4 + $0x168] ss:$16 sps:$4 sm:$0xff]   ;;  %1941 = vmatprep.subr.bf16.mxu0 %v3664_v30 }
 0x242   : > { %v1032_v37 = vsel %vm1028_vm14, %v1022_v32, %v1030_v34  ;;  %vm1029_vm15 = vcmp.gt.f32.partialorder %v1024_v35, 0.0  ;;  %v1031_v38 = vmul.f32 0.1, %v1024_v35  ;;  %v3662_v32 = vld [vmem:[#allocation4 + $0x160] ss:$16 sps:$4 sm:$0xff]  }
 0x243   : > { %v1035_v39 = vpack.c.bf16 %v1032_v37, %v1032_v37  ;;  %v1026_v40 = vpop.f32.mrf.mxu0  ;;  %v3670_v34 = vld [vmem:[#allocation4 + $0x144] ss:$16 sps:$4 sm:$0xff]   ;;  %1942 = vmatpush2.bf16.msra.mxu0 %v3662_v32  ;;  %v3668_v36 = vld [vmem:[#allocation4 + $0x140] ss:$16 sps:$4 sm:$0xff]   ;;  %v3671_v37 = vld [vmem:[#allocation4 + $0x148] ss:$16 sps:$4 sm:$0xff]  }
 0x244   : > { %v1033_v41 = vsel %vm1029_vm15, %v1024_v35, %v1031_v38  ;;  %v3673_v35 = vld [vmem:[#allocation4 + $0x14c] ss:$16 sps:$4 sm:$0xff]   ;;  %1943 = vmatprep.subr.bf16.mxu0 %v3670_v34  ;;  %v3676_v38 = vld [vmem:[#allocation4 + $0x124] ss:$16 sps:$4 sm:$0xff]   ;;  %v3674_v40 = vld [vmem:[#allocation4 + $0x120] ss:$16 sps:$4 sm:$0xff]  }
 0x245   : > { %v1036_v42 = vpack.c.bf16 %v1033_v41, %v1033_v41  ;;  %v1047_v43 = vsel %vm965_vm8, %v1035_v39, 0  ;;  %v3679_v39 = vld [vmem:[#allocation4 + $0x12c] ss:$16 sps:$4 sm:$0xff]   ;;  %v3677_v41 = vld [vmem:[#allocation4 + $0x128] ss:$16 sps:$4 sm:$0xff]  }
 0x247   : > { %3217 = vmatprep.subr.msk.bf16.mxu1 %vm965_vm8, %v1036_v42  ;;  %1944 = vmatpush2.bf16.msra.mxu0 %v3668_v36  ;;  %v3682_v42 = vld [vmem:[#allocation4 + $0x104] ss:$16 sps:$4 sm:$0xff]  }
 0x248   : > { %1067 = vmatpush1.bf16.msra.mxu1 %v1047_v43  ;;  %1945 = vmatprep.subr.bf16.mxu0 %v3676_v38  ;;  %v3685_v43 = vld [vmem:[#allocation4 + $0x10c] ss:$16 sps:$4 sm:$0xff]  }
 0x249   : > { %1958 = vmatprep.subr.bf16.mxu1 %v3595_v46  ;;  %v1041_v46 = vpop.permute.xlu0 %1040 }
 0x24b   : > { %3218 = vmatmul.mubr.msk.bf16.vlgmr.msra.gmra.mxu1 %vm977_vm13, %v1034_v44  ;;  %1946 = vmatpush2.bf16.msra.mxu0 %v3674_v40  ;;  %v3680_v44 = vld [vmem:[#allocation4 + $0x100] ss:$16 sps:$4 sm:$0xff]  }
 0x24c   : > { %1959 = vmatpush1.bf16.msra.mxu1 %v3593_v48  ;;  %1947 = vmatprep.subr.bf16.mxu0 %v3682_v42 }
 0x24d   : > { %1960 = vmatprep.subr.bf16.mxu1 %v3601_v50 }
 0x24f   : > { %1948 = vmatpush2.bf16.msra.mxu0 %v3680_v44 }
 0x250   : > { %1961 = vmatpush1.bf16.msra.mxu1 %v3599_v52 }
 0x251   : > { %1962 = vmatprep.subr.bf16.mxu1 %v3607_v54 }
 0x254   : > { %1963 = vmatpush1.bf16.msra.mxu1 %v3605_v56 }
 0x255   : > { %1964 = vmatprep.subr.bf16.mxu1 %v3613_v58 }
 0x258   : > { %1965 = vmatpush1.bf16.msra.mxu1 %v3611_v60 }
 0x259   : > { %1966 = vmatprep.subr.bf16.mxu1 %v3619_v62 }
 0x25c   : > { %1967 = vmatpush1.bf16.msra.mxu1 %v3617_v0 }
 0x25d   : > { %1968 = vmatprep.subr.bf16.mxu1 %v3625_v2 }
 0x260   : > { %1969 = vmatpush1.bf16.msra.mxu1 %v3623_v5 }
 0x261   : > { %1970 = vmatprep.subr.bf16.mxu1 %v3631_v14 }
 0x264   : > { %1971 = vmatpush1.bf16.msra.mxu1 %v3629_v16 }
 0x265   : > { %1972 = vmatprep.subr.bf16.mxu1 %v3637_v19 }
 0x268   : > { %1973 = vmatpush1.bf16.msra.mxu1 %v3635_v10 }
 0x269   : > { %1974 = vmatprep.subr.bf16.mxu1 %v3643_v21 }
 0x26c   : > { %1975 = vmatpush2.bf16.msra.mxu1 %v3641_v7 }
 0x26d   : > { %1976 = vmatprep.subr.bf16.mxu1 %v3649_v17 }
 0x270   : > { %1977 = vmatpush2.bf16.msra.mxu1 %v3647_v24  ;;  %v3812_v24 = vmov 920167782  }
 0x271   : > { %1978 = vmatprep.subr.bf16.mxu1 %v3655_v8 }
 0x274   : > { %1979 = vmatpush2.bf16.msra.mxu1 %v3653_v26  ;;  %v3813_v26 = vmov 1326507024  }
 0x275   : > { %1980 = vmatprep.subr.bf16.mxu1 %v3661_v28 }
 0x278   : > { %1981 = vmatpush2.bf16.msra.mxu1 %v3659_v12 }
 0x279   : > { %1982 = vmatprep.subr.bf16.mxu1 %v3667_v31 }
 0x27c   : > { %1983 = vmatpush2.bf16.msra.mxu1 %v3665_v33 }
 0x27d   : > { %1984 = vmatprep.subr.bf16.mxu1 %v3673_v35 }
 0x280   : > { %1985 = vmatpush2.bf16.msra.mxu1 %v3671_v37 }
 0x281   : > { %1986 = vmatprep.subr.bf16.mxu1 %v3679_v39 }
 0x284   : > { %1987 = vmatpush2.bf16.msra.mxu1 %v3677_v41 }
 0x285   : > { %1988 = vmatprep.subr.bf16.mxu1 %v3685_v43 }
 0x288   : > { %1989 = vmatpush2.bf16.msra.mxu1 %v3683_v45 }
 0x30b   : > { %v1086_v47 = vpop.f32.mrf.mxu1 }
 0x30c   : > { %v4018_v48 = vadd.f32 %v1086_v47, %v1041_v46 }
 0x30d   : > { %v1088_v49 = vpop.f32.mrf.mxu1 }
 0x30e   : > { %v1093_v50 = vand.u32 2147483647, %v4018_v48  ;;  %v1096_v51 = vand.u32 2139095040, %v4018_v48  ;;  %v4022_v52 = vadd.f32 %v1088_v49, %v1041_v46  ;;  %vm1095_vm15 = vcmp.lt.s32.totalorder %v4018_v48, 0 }
 0x30f   : > { %v1090_v53 = vpop.f32.mrf.mxu1 }
 0x310   : > { %v1097_v54 = vshrl.u32 %v1096_v51, 23  ;;  %v1199_v55 = vand.u32 2139095040, %v4022_v52  ;;  %v1100_v58 = vand.u32 8388607, %v1093_v50  ;;  %v1196_v60 = vand.u32 2147483647, %v4022_v52 }
 0x311   : > { %v1091_v56 = vpop.f32.mrf.mxu1 }
 0x312   : > { %v3219_v57 = vadd.s32 4294967169, %v1097_v54  ;;  %v1200_v59 = vshrl.u32 %v1199_v55, 23  ;;  %v1101_v63 = vor.u32 8388608, %v1100_v58  ;;  %v1203_v1 = vand.u32 8388607, %v1196_v60 }
 0x314   : > { %v1103_v61 = vadd.s32 1, %v3219_v57  ;;  %v3223_v62 = vadd.s32 4294967169, %v1200_v59  ;;  %v4030_v14 = vshll.u32 %v1101_v63, 8  ;;  %v1204_v16 = vor.u32 8388608, %v1203_v1 }
 0x316   : > { %vm1104_vm0 = vcmp.gt.s32.totalorder %v1103_v61, 0  ;;  %v1206_v0 = vadd.s32 1, %v3223_v62  ;;  %v1244_v43 = vshll.u32 %v1204_v16, 8 }
 0x317   : > { %v1105_v2 = vsel %vm1104_vm0, %v1103_v61, 0  ;;  %vm1094_vm0 = vcmp.le.f32.partialorder %v1093_v50, 0.7853982 }
 0x318   : > { %v1107_v3 = vand.u32 31, %v1105_v2  ;;  %vm1207_vm1 = vcmp.gt.s32.totalorder %v1206_v0, 0  ;;  %v1106_v5 = vshrl.u32 %v1105_v2, 5 }
 0x319   : > { %v1208_v15 = vsel %vm1207_vm1, %v1206_v0, 0  ;;  %vm1198_vm1 = vcmp.lt.s32.totalorder %v4022_v52, 0 }
 0x31a   : > { %v1108_v6 = vsub.s32 32, %v1107_v3  ;;  %v1110_v19 = vshll.u32 %v3808_v18, %v1107_v3  ;;  %v1113_v10 = vshll.u32 %v3809_v9, %v1107_v3  ;;  %v1116_v21 = vshll.u32 %v3810_v20, %v1107_v3 }
 0x31b   : > { %v1119_v7 = vshll.u32 %v3811_v22, %v1107_v3  ;;  %v1122_v25 = vshll.u32 %v3812_v24, %v1107_v3  ;;  %vm1125_vm2 = vcmp.lt.s32.totalorder %v1106_v5, 1  ;;  %vm1127_vm3 = vcmp.lt.s32.totalorder %v1106_v5, 3 }
 0x31c   : > { %v1111_v13 = vshrl.u32 %v3809_v9, %v1108_v6  ;;  %v1114_v17 = vshrl.u32 %v3810_v20, %v1108_v6  ;;  %v1117_v23 = vshrl.u32 %v3811_v22, %v1108_v6  ;;  %v1109_v8 = vshrl.u32 %v3808_v18, %v1108_v6 }
 0x31d   : > { %v1120_v11 = vshrl.u32 %v3812_v24, %v1108_v6  ;;  %v1123_v27 = vshrl.u32 %v3813_v26, %v1108_v6  ;;  %vm1128_vm4 = vcmp.lt.s32.totalorder %v1106_v5, 4  ;;  %v1210_v32 = vand.u32 31, %v1208_v15 }
 0x31e   : > { %v1112_v28 = vor.u32 %v1111_v13, %v1110_v19  ;;  %v1115_v29 = vor.u32 %v1114_v17, %v1113_v10  ;;  %v1118_v12 = vor.u32 %v1117_v23, %v1116_v21  ;;  %vm1126_vm5 = vcmp.lt.s32.totalorder %v1106_v5, 2 }
 0x31f   : > { %v1121_v30 = vor.u32 %v1120_v11, %v1119_v7  ;;  %v1124_v31 = vor.u32 %v1123_v27, %v1122_v25  ;;  %v1211_v40 = vsub.s32 32, %v1210_v32  ;;  %v1209_v47 = vshrl.u32 %v1208_v15, 5 }
 0x320   : > { %v1129_v33 = vsel %vm1125_vm2, %v1109_v8, %v1112_v28  ;;  %v1130_v34 = vsel %vm1128_vm4, %v1118_v12, 2102212464  ;;  %v1133_v35 = vsel %vm1125_vm2, %v1112_v28, %v1115_v29  ;;  %v1137_v36 = vsel %vm1125_vm2, %v1115_v29, %v1118_v12 }
 0x321   : > { %v1131_v37 = vsel %vm1127_vm3, %v1115_v29, %v1130_v34  ;;  %v1134_v38 = vsel %vm1128_vm4, %v1121_v30, 920167782  ;;  %v1138_v39 = vsel %vm1128_vm4, %v1124_v31, 1326507024  ;;  %v1213_v55 = vshll.u32 %v3808_v18, %v1210_v32 }
 0x322   : > { %v1135_v41 = vsel %vm1127_vm3, %v1118_v12, %v1134_v38  ;;  %v1139_v42 = vsel %vm1127_vm3, %v1121_v30, %v1138_v39  ;;  %v1132_v44 = vsel %vm1126_vm5, %v1129_v33, %v1131_v37  ;;  %v1214_v56 = vshrl.u32 %v3809_v9, %v1211_v40 }
 0x323   : > { %v1136_v45 = vsel %vm1126_vm5, %v1133_v35, %v1135_v41  ;;  %v1140_v46 = vsel %vm1126_vm5, %v1137_v36, %v1139_v42  ;;  %v1216_v57 = vshll.u32 %v3809_v9, %v1210_v32  ;;  %v1217_v58 = vshrl.u32 %v3810_v20, %v1211_v40 }
 0x324   : > { %v4033_v49 = vmul.u32.u64.low %v4030_v14, %v1140_v46  ;;  %v4034_v51 = vmul.u32.u64.high %v4030_v14, %v1140_v46, %v4033_v49  ;;  %v4037_v53 = vmul.u32.u64.low %v4030_v14, %v1136_v45  ;;  %v4038_v54 = vmul.u32.u64.high %v4030_v14, %v1136_v45, %v4037_v53 }
 0x325   : > { %v1219_v59 = vshll.u32 %v3810_v20, %v1210_v32  ;;  %v1220_v61 = vshrl.u32 %v3811_v22, %v1211_v40  ;;  %v1222_v62 = vshll.u32 %v3811_v22, %v1210_v32  ;;  %v1223_v63 = vshrl.u32 %v3812_v24, %v1211_v40 }
 0x326   : > { %v1215_v0 = vor.u32 %v1214_v56, %v1213_v55  ;;  %v1218_v1 = vor.u32 %v1217_v58, %v1216_v57  ;;  %v1225_v2 = vshll.u32 %v3812_v24, %v1210_v32  ;;  %v1226_v3 = vshrl.u32 %v3813_v26, %v1211_v40 }
 0x327   : > { %v1148_v5 = vmul.u32 %v4030_v14, %v1132_v44  ;;  %vm1150_vm6 = vc.u32 %v4034_v51, %v4037_v53  ;;  %v1151_v6 = vadd.s32 1, %v4038_v54  ;;  %v1221_v15 = vor.u32 %v1220_v61, %v1219_v59 }
 0x328   : > { %v1212_v16 = vshrl.u32 %v3808_v18, %v1211_v40  ;;  %v1224_v19 = vor.u32 %v1223_v63, %v1222_v62  ;;  %v1227_v9 = vor.u32 %v1226_v3, %v1225_v2  ;;  %vm1228_vm7 = vcmp.lt.s32.totalorder %v1209_v47, 1 }
 0x329   : > { %v1152_v10 = vsel %vm1150_vm6, %v1151_v6, %v4038_v54  ;;  %vm1230_vm9 = vcmp.lt.s32.totalorder %v1209_v47, 3  ;;  %vm1231_vm10 = vcmp.lt.s32.totalorder %v1209_v47, 4  ;;  %v1236_v20 = vsel %vm1228_vm7, %v1215_v0, %v1218_v1 }
 0x32a   : > { %v1153_v21 = vadd.s32 %v1152_v10, %v1148_v5  ;;  %v1233_v22 = vsel %vm1231_vm10, %v1221_v15, 2102212464  ;;  %v1237_v7 = vsel %vm1231_vm10, %v1224_v19, 920167782  ;;  %v1240_v13 = vsel %vm1228_vm7, %v1218_v1, %v1221_v15 }
 0x32b   : > { %vm1229_vm11 = vcmp.lt.s32.totalorder %v1209_v47, 2  ;;  %v1232_v14 = vsel %vm1228_vm7, %v1212_v16, %v1215_v0  ;;  %v1238_v17 = vsel %vm1230_vm9, %v1221_v15, %v1237_v7  ;;  %v1241_v23 = vsel %vm1231_vm10, %v1227_v9, 1326507024 }
 0x32c   : > { %v1154_v24 = vadd.s32 536870912, %v1153_v21  ;;  %v1234_v25 = vsel %vm1230_vm9, %v1218_v1, %v1233_v22  ;;  %v1239_v8 = vsel %vm1229_vm11, %v1236_v20, %v1238_v17  ;;  %v1242_v18 = vsel %vm1230_vm9, %v1224_v19, %v1241_v23 }
 0x32d   : > { %v1243_v11 = vsel %vm1229_vm11, %v1240_v13, %v1242_v18  ;;  %v4046_v26 = vmul.u32.u64.low %v1244_v43, %v1239_v8  ;;  %v4047_v27 = vmul.u32.u64.high %v1244_v43, %v1239_v8, %v4046_v26  ;;  %v1235_v30 = vsel %vm1229_vm11, %v1232_v14, %v1234_v25 }
 0x32e   : > { %v1155_v28 = vshrl.u32 %v1154_v24, 30  ;;  %v4049_v29 = vmul.u32.u64.low %v1244_v43, %v1243_v11  ;;  %v4050_v12 = vmul.u32.u64.high %v1244_v43, %v1243_v11, %v4049_v29  ;;  %v1251_v34 = vmul.u32 %v1244_v43, %v1235_v30 }
 0x32f   : > { %v1254_v32 = vadd.s32 1, %v4047_v27  ;;  %v1149_v47 = vadd.s32 %v4037_v53, %v4034_v51  ;;  %vm1197_vm2 = vcmp.le.f32.partialorder %v1196_v60, 0.7853982  ;;  %vm1185_vm6 = vweird.f32 %v4018_v48 }
 0x330   : > { %v1156_v31 = vshll.u32 %v1155_v28, 30  ;;  %vm1253_vm12 = vc.u32 %v4050_v12, %v4046_v26  ;;  %v1252_v6 = vadd.s32 %v4046_v26, %v4050_v12  ;;  %v1179_v10 = vsub.s32 4, %v1155_v28 }
 0x331   : > { %v1255_v35 = vsel %vm1253_vm12, %v1254_v32, %v4047_v27 }
 0x332   : > { %v1157_v33 = vsub.s32 %v1153_v21, %v1156_v31  ;;  %v1256_v37 = vadd.s32 %v1255_v35, %v1251_v34  ;;  %v1180_v14 = vsel %vm1095_vm15, %v1179_v10, %v1155_v28  ;;  %v2038_v10 = vld [vmem:[%s4106_s8] sm:$0xf] }
 0x333   : > { %v1182_v25 = vsel %vm1094_vm0, 0, %v1180_v14  ;;  %2041 = vperm.xlu1 %3492, %v2038_v10  }
 0x334   : > { %v1159_v36 = vsub.s32 0, %v1157_v33  ;;  %v1257_v39 = vadd.s32 536870912, %v1256_v37  ;;  %v1400_v11 = vadd.s32 3, %v1182_v25  ;;  %v1186_v32 = vand.u32 3, %v1182_v25  ;;  %v2130_v25 = vld [vmem:[#allocation6 + $0x100] sm:$0xff] }
 0x336   : > { %v3220_v38 = vmin.u32 %v1159_v36, %v1157_v33  ;;  %v1258_v41 = vshrl.u32 %v1257_v39, 30  ;;  %v1401_v28 = vand.u32 3, %v1400_v11  ;;  %vm1188_vm7 = vcmp.eq.s32.totalorder %v1186_v32, 0 }
 0x337   : > { %vm1191_vm9 = vcmp.eq.s32.totalorder %v1186_v32, 2  ;;  %vm1187_vm10 = vcmp.lt.s32.totalorder %v1186_v32, 2  ;;  %v2106_v32 = vld [vmem:[#allocation6 + $0x40] sm:$0xff] }
 0x338   : > { %v1161_v40 = vclz %v3220_v38  ;;  %v1259_v44 = vshll.u32 %v1258_v41, 30  ;;  %v1282_v18 = vsub.s32 4, %v1258_v41  ;;  %vm1406_vm3 = vcmp.eq.s32.totalorder %v1401_v28, 2 }
 0x339   : > { %vm1403_vm4 = vcmp.eq.s32.totalorder %v1401_v28, 0  ;;  %vm1402_vm5 = vcmp.lt.s32.totalorder %v1401_v28, 2 }
 0x33a   : > { %v3221_v42 = vadd.s32 4294967294, %v1161_v40  ;;  %v1260_v45 = vsub.s32 %v1256_v37, %v1259_v44  ;;  %v1283_v27 = vsel %vm1198_vm1, %v1282_v18, %v1258_v41 }
 0x33b   : > { %v1285_v30 = vsel %vm1197_vm2, 0, %v1283_v27 }
 0x33c   : > { %vm3222_vm13 = vcmp.lt.s32.totalorder %v3221_v42, 0  ;;  %v1262_v54 = vsub.s32 0, %v1260_v45  ;;  %v1504_v35 = vadd.s32 3, %v1285_v30  ;;  %v1289_v37 = vand.u32 3, %v1285_v30 }
 0x33d   : > { %v1164_v46 = vsel %vm3222_vm13, 0, %v3221_v42 }
 0x33e   : > { %v1165_v49 = vsub.s32 32, %v1164_v46  ;;  %v1169_v43 = vsub.s32 4294967266, %v1164_v46  ;;  %v1166_v55 = vshll.u32 %v1157_v33, %v1164_v46  ;;  %v3224_v58 = vmin.u32 %v1262_v54, %v1260_v45 }
 0x33f   : > { %v1505_v41 = vand.u32 3, %v1504_v35  ;;  %vm1290_vm11 = vcmp.lt.s32.totalorder %v1289_v37, 2  ;;  %vm1291_vm12 = vcmp.eq.s32.totalorder %v1289_v37, 0  ;;  %vm1294_vm13 = vcmp.eq.s32.totalorder %v1289_v37, 2 }
 0x340   : > { %v1167_v56 = vshrl.u32 %v1149_v47, %v1165_v49  ;;  %v1170_v57 = vadd.s32 127, %v1169_v43  ;;  %v1264_v62 = vclz %v3224_v58 }
 0x342   : > { %v1168_v59 = vor.u32 %v1167_v56, %v1166_v55  ;;  %v1171_v61 = vshll.u32 %v1170_v57, 23  ;;  %v3225_v0 = vadd.s32 4294967294, %v1264_v62 }
 0x344   : > { %v1172_v63 = vor.u32 4788187, %v1171_v61  ;;  %v1175_v2 = vcvt.s32.f32 %v1168_v59  ;;  %vm3226_vm14 = vcmp.lt.s32.totalorder %v3225_v0, 0 }
 0x345   : > { %v1267_v3 = vsel %vm3226_vm14, 0, %v3225_v0  ;;  %vm1510_vm14 = vcmp.eq.s32.totalorder %v1505_v41, 2 }
 0x346   : > { %v1173_v1 = vand.u32 2147483647, %v1172_v63  ;;  %v1268_v51 = vsub.s32 32, %v1267_v3  ;;  %v1272_v53 = vsub.s32 4294967266, %v1267_v3  ;;  %v1269_v16 = vshll.u32 %v1260_v45, %v1267_v3 }
 0x348   : > { %v1176_v5 = vmul.f32 %v1175_v2, %v1173_v1  ;;  %v1270_v19 = vshrl.u32 %v1252_v6, %v1268_v51  ;;  %v1273_v9 = vadd.s32 127, %v1272_v53 }
 0x34a   : > { %v1177_v15 = vxor.u32 2147483648, %v1176_v5  ;;  %v1271_v21 = vor.u32 %v1270_v19, %v1269_v16  ;;  %v1274_v22 = vshll.u32 %v1273_v9, 23 }
 0x34c   : > { %v1178_v20 = vsel %vm1095_vm15, %v1177_v15, %v1176_v5  ;;  %v1275_v13 = vor.u32 4788187, %v1274_v22  ;;  %v1278_v23 = vcvt.s32.f32 %v1271_v21  ;;  %vm1507_vm15 = vcmp.eq.s32.totalorder %v1505_v41, 0  ;;  %v2146_v22 = vld [vmem:[#allocation6 + $0x180] sm:$0xff] }
 0x34d   : > { %v1181_v7 = vsel %vm1094_vm0, %v4018_v48, %v1178_v20  ;;  %vm1506_vm0 = vcmp.lt.s32.totalorder %v1505_v41, 2  ;;  %v2158_v20 = vld [vmem:[#allocation6 + $0x1e0] sm:$0xff] }
 0x34e   : > { %3694 = vcosq.f32 %v1181_v7  ;;  %v1276_v17 = vand.u32 2147483647, %v1275_v13 }
 0x34f   : > { %3696 = vsinq.f32 %v1181_v7  ;;  %v2150_v7 = vld [vmem:[#allocation6 + $0x1a0] sm:$0xff] }
 0x350   : > { %v1279_v24 = vmul.f32 %v1278_v23, %v1276_v17  ;;  %v3350_v13 = vcombine.high %v2146_v22, %v2150_v7  ;;  %v3349_v14 = vcombine.low %v2146_v22, %v2150_v7  ;;  %v2138_v17 = vld [vmem:[#allocation6 + $0x140] sm:$0xff] }
 0x351   : > { %v2142_v23 = vld [vmem:[#allocation6 + $0x160] sm:$0xff] }
 0x352   : > { %v1280_v8 = vxor.u32 2147483648, %v1279_v24 }
 0x354   : > { %v1281_v26 = vsel %vm1198_vm1, %v1280_v8, %v1279_v24  ;;  %vm1288_vm1 = vweird.f32 %v4022_v52  ;;  %v3342_v24 = vcombine.high %v2138_v17, %v2142_v23  ;;  %v2134_v8 = vld [vmem:[#allocation6 + $0x120] sm:$0xff] }
 0x355   : > { %v1284_v50 = vsel %vm1197_vm2, %v4022_v52, %v1281_v26  ;;  %v3334_v18 = vcombine.high %v2130_v25, %v2134_v8  ;;  %v3333_v11 = vcombine.low %v2130_v25, %v2134_v8  ;;  %v2122_v26 = vld [vmem:[#allocation6 + $0xc0] sm:$0xff] }
 0x356   : > { %3698 = vcosq.f32 %v1284_v50 }
 0x357   : > { %3700 = vsinq.f32 %v1284_v50  ;;  %v2126_v50 = vld [vmem:[#allocation6 + $0xe0] sm:$0xff] }
 0x358   : > { %v3326_v27 = vcombine.high %v2122_v26, %v2126_v50  ;;  %v3325_v28 = vcombine.low %v2122_v26, %v2126_v50 }
 0x35b   : > { %v3695_v29 = vpop.eup %3694 }
 0x35c   : > { %v3697_v12 = vpop.eup %3696  ;;  %v1192_v31 = vxor.u32 2147483648, %v3695_v29 }
 0x35d   : > { %v1189_v33 = vxor.u32 2147483648, %v3697_v12 }
 0x35e   : > { %v1408_v34 = vsel %vm1406_vm3, %v1192_v31, %v3697_v12  ;;  %v1193_v39 = vsel %vm1191_vm9, %v1192_v31, %v3697_v12  ;;  %v2118_v12 = vld [vmem:[#allocation6 + $0xa0] sm:$0xff] }
 0x35f   : > { %v1405_v36 = vsel %vm1403_vm4, %v3695_v29, %v1189_v33  ;;  %v1190_v38 = vsel %vm1188_vm7, %v3695_v29, %v1189_v33  ;;  %v2114_v29 = vld [vmem:[#allocation6 + $0x80] sm:$0xff] }
 0x360   : > { %v1409_v60 = vsel %vm1402_vm5, %v1405_v36, %v1408_v34  ;;  %v1194_v44 = vsel %vm1187_vm10, %v1190_v38, %v1193_v39  ;;  %v3318_v30 = vcombine.high %v2114_v29, %v2118_v12  ;;  %v3317_v31 = vcombine.low %v2114_v29, %v2118_v12  ;;  %v2110_v33 = vld [vmem:[#allocation6 + $0x60] sm:$0xff] }
 0x361   : > { %v1410_v40 = vsel %vm1185_vm6, nan, %v1409_v60  ;;  %v1195_v55 = vsel %vm1185_vm6, nan, %v1194_v44  ;;  %v3310_v34 = vcombine.high %v2106_v32, %v2110_v33  ;;  %v3309_v35 = vcombine.low %v2106_v32, %v2110_v33  ;;  %v2098_v36 = vld [vmem:[#allocation6] sm:$0xff] }
 0x362   : > { %v1517_v45 = vrot.slane %v1410_v40, 4  ;;  %v1301_v0 = vrot.slane %v1195_v55, 4  ;;  %v2102_v60 = vld [vmem:[#allocation6 + $0x20] sm:$0xff]  ;;  %vm2048_vm5 = vcmask 1041408   ;;  %vm2044_vm6 = vcmask 31744  }
 0x363   : > { %v3699_v42 = vpop.eup %3698  ;;  %v3302_v37 = vcombine.high %v2098_v36, %v2102_v60  ;;  %v3301_v38 = vcombine.low %v2098_v36, %v2102_v60  ;;  %v2218_v39 = vld [vmem:[#allocation6 + $0x3c0] sm:$0xff] }
 0x364   : > { %v3701_v46 = vpop.eup %3700  ;;  %v1295_v47 = vxor.u32 2147483648, %v3699_v42  ;;  %v1521_v58 = vmul.f32 %v1517_v45, %v4018_v48  ;;  %v1305_v6 = vmul.f32 %v1301_v0, %v4018_v48  ;;  %v2154_v48 = vld [vmem:[#allocation6 + $0x1c0] sm:$0xff] }
 0x365   : > { %v1292_v49 = vxor.u32 2147483648, %v3701_v46  ;;  %v3358_v21 = vcombine.high %v2154_v48, %v2158_v20  ;;  %v2222_v40 = vld [vmem:[#allocation6 + $0x3e0] sm:$0xff] }
 0x366   : > { %v1296_v43 = vsel %vm1294_vm13, %v1295_v47, %v3701_v46  ;;  %v1512_v54 = vsel %vm1510_vm14, %v1295_v47, %v3701_v46  ;;  %v1525_v3 = vrot.slane %v1521_v58, 4  ;;  %v3422_v41 = vcombine.high %v2218_v39, %v2222_v40  ;;  %v2210_v44 = vld [vmem:[#allocation6 + $0x380] sm:$0xff] }
 0x367   : > { %v1293_v56 = vsel %vm1291_vm12, %v3699_v42, %v1292_v49  ;;  %v1509_v57 = vsel %vm1507_vm15, %v3699_v42, %v1292_v49  ;;  %2866 = vmatprep.subr.bf16.mxu1 %v3358_v21  ;;  %v3421_v42 = vcombine.low %v2218_v39, %v2222_v40  ;;  %v2214_v45 = vld [vmem:[#allocation6 + $0x3a0] sm:$0xff]  ;;  %v2147_v40 = vld [vmem:[#allocation6 + $0x188] sm:$0xff] }
 0x368   : > { %v1297_v59 = vsel %vm1290_vm11, %v1293_v56, %v1296_v43  ;;  %v1513_v61 = vsel %vm1506_vm0, %v1509_v57, %v1512_v54  ;;  %v1529_v15 = vsel %vm965_vm8, %v1305_v6, %v1525_v3  ;;  %v3414_v46 = vcombine.high %v2210_v44, %v2214_v45  ;;  %v2202_v49 = vld [vmem:[#allocation6 + $0x340] sm:$0xff] }
 0x369   : > { %v1298_v62 = vsel %vm1288_vm1, nan, %v1297_v59  ;;  %v1514_v63 = vsel %vm1288_vm1, nan, %v1513_v61  ;;  %v1531_v9 = vpack.c.bf16 %v1529_v15, %v1529_v15  ;;  %v3413_v47 = vcombine.low %v2210_v44, %v2214_v45  ;;  %v2206_v43 = vld [vmem:[#allocation6 + $0x360] sm:$0xff] }
 0x36a   : > { %v1302_v1 = vrot.slane %v1298_v62, 4  ;;  %v1518_v2 = vrot.slane %v1514_v63, 4  ;;  %v3406_v54 = vcombine.high %v2202_v49, %v2206_v43  ;;  %v3405_v55 = vcombine.low %v2202_v49, %v2206_v43  ;;  %v2194_v56 = vld [vmem:[#allocation6 + $0x300] sm:$0xff]  ;;  %v2143_v49 = vld [vmem:[#allocation6 + $0x168] sm:$0xff] }
 0x36b   : > { %v2198_v57 = vld [vmem:[#allocation6 + $0x320] sm:$0xff] }
 0x36c   : > { %v1522_v5 = vmul.f32 %v1518_v2, %v4022_v52  ;;  %v1306_v51 = vmul.f32 %v1302_v1, %v4022_v52  ;;  %v3357_v52 = vcombine.low %v2154_v48, %v2158_v20  ;;  %v3398_v58 = vcombine.high %v2194_v56, %v2198_v57  ;;  %v2186_v61 = vld [vmem:[#allocation6 + $0x2c0] sm:$0xff] }
 0x36d   : > { %v3397_v59 = vcombine.low %v2194_v56, %v2198_v57  ;;  %v2190_v62 = vld [vmem:[#allocation6 + $0x2e0] sm:$0xff]  ;;  %v2135_v56 = vld [vmem:[#allocation6 + $0x128] sm:$0xff] }
 0x36e   : > { %v1526_v53 = vrot.slane %v1522_v5, 4  ;;  %v3390_v63 = vcombine.high %v2186_v61, %v2190_v62  ;;  %v3389_v0 = vcombine.low %v2186_v61, %v2190_v62  ;;  %v2178_v1 = vld [vmem:[#allocation6 + $0x280] sm:$0xff]  ;;  %v2127_v61 = vld [vmem:[#allocation6 + $0xe8] sm:$0xff] }
 0x36f   : > { %v2182_v2 = vld [vmem:[#allocation6 + $0x2a0] sm:$0xff] }
 0x370   : > { %v1530_v16 = vsel %vm965_vm8, %v1306_v51, %v1526_v53  ;;  %v3382_v3 = vcombine.high %v2178_v1, %v2182_v2  ;;  %v3381_v5 = vcombine.low %v2178_v1, %v2182_v2  ;;  %v2170_v6 = vld [vmem:[#allocation6 + $0x240] sm:$0xff]  ;;  %v2119_v1 = vld [vmem:[#allocation6 + $0xa8] sm:$0xff] }
 0x371   : > { %v1532_v19 = vpack.c.bf16 %v1530_v16, %v1530_v16  ;;  %v2174_v51 = vld [vmem:[#allocation6 + $0x260] sm:$0xff] }
 0x372   : > { %v3374_v53 = vcombine.high %v2170_v6, %v2174_v51  ;;  %v3373_v15 = vcombine.low %v2170_v6, %v2174_v51  ;;  %v2035_v44 = vld [vmem:[%s4105_s7] sm:$0x3]  ;;  %v2111_v6 = vld [vmem:[#allocation6 + $0x68] sm:$0xff] }
 0x373   : > { %1949 = vmatprep.mubr.bf16.mxu0 %v1532_v19  ;;  %1990 = vmatprep.mubr.bf16.mxu1 %v1532_v19 }
 0x374   : > { %1950 = vmatmul.mubr.bf16.vlgmr.msra.gmra.mxu0 %v1531_v9  ;;  %1991 = vmatmul.mubr.bf16.vlgmr.msra.gmra.mxu1 %v1531_v9 }
 0x375   : > { %2087 = vmatprep.mubr.bf16.mxu0 %v3807_v4  ;;  %2867 = vmatpush1.bf16.msra.mxu1 %v3357_v52  ;;  %v3341_v4 = vcombine.low %v2138_v17, %v2142_v23 }
 0x376   : > { %2868 = vmatprep.subr.bf16.mxu1 %v3350_v13 }
 0x379   : > { %2869 = vmatpush1.bf16.msra.mxu1 %v3349_v14 }
 0x37a   : > { %2870 = vmatprep.subr.bf16.mxu1 %v3342_v24 }
 0x37d   : > { %2871 = vmatpush1.bf16.msra.mxu1 %v3341_v4 }
 0x37e   : > { %2872 = vmatprep.subr.bf16.mxu1 %v3334_v18 }
 0x381   : > { %2873 = vmatpush1.bf16.msra.mxu1 %v3333_v11 }
 0x382   : > { %2874 = vmatprep.subr.bf16.mxu1 %v3326_v27 }
 0x385   : > { %2875 = vmatpush1.bf16.msra.mxu1 %v3325_v28 }
 0x386   : > { %2876 = vmatprep.subr.bf16.mxu1 %v3318_v30 }
 0x389   : > { %2877 = vmatpush1.bf16.msra.mxu1 %v3317_v31 }
 0x38a   : > { %2878 = vmatprep.subr.bf16.mxu1 %v3310_v34  ;;  %v2155_v34 = vld [vmem:[#allocation6 + $0x1c8] sm:$0xff] }
 0x38d   : > { %2879 = vmatpush1.bf16.msra.mxu1 %v3309_v35  ;;  %v2159_v35 = vld [vmem:[#allocation6 + $0x1e8] sm:$0xff] }
 0x38e   : > { %2880 = vmatprep.subr.bf16.mxu1 %v3302_v37  ;;  %v3360_v39 = vcombine.high %v2155_v34, %v2159_v35  ;;  %v3359_v45 = vcombine.low %v2155_v34, %v2159_v35 }
 0x391   : > { %2881 = vmatpush1.bf16.msra.mxu1 %v3301_v38 }
 0x392   : > { %2882 = vmatprep.subr.bf16.mxu1 %v3422_v41  ;;  %v2151_v41 = vld [vmem:[#allocation6 + $0x1a8] sm:$0xff] }
 0x393   : > { %v3351_v43 = vcombine.low %v2147_v40, %v2151_v41 }
 0x395   : > { %2883 = vmatpush2.bf16.msra.mxu1 %v3421_v42 }
 0x396   : > { %2884 = vmatprep.subr.bf16.mxu1 %v3414_v46  ;;  %v3352_v46 = vcombine.high %v2147_v40, %v2151_v41  ;;  %v2167_v40 = vld [vmem:[#allocation6 + $0x228] sm:$0xff] }
 0x399   : > { %2885 = vmatpush2.bf16.msra.mxu1 %v3413_v47  ;;  %v2139_v47 = vld [vmem:[#allocation6 + $0x148] sm:$0xff] }
 0x39a   : > { %2886 = vmatprep.subr.bf16.mxu1 %v3406_v54  ;;  %v3344_v54 = vcombine.high %v2139_v47, %v2143_v49  ;;  %v3343_v57 = vcombine.low %v2139_v47, %v2143_v49 }
 0x39d   : > { %2887 = vmatpush2.bf16.msra.mxu1 %v3405_v55  ;;  %v2131_v55 = vld [vmem:[#allocation6 + $0x108] sm:$0xff] }
 0x39e   : > { %2888 = vmatprep.subr.bf16.mxu1 %v3398_v58  ;;  %v3336_v58 = vcombine.high %v2131_v55, %v2135_v56  ;;  %v3335_v62 = vcombine.low %v2131_v55, %v2135_v56 }
 0x3a1   : > { %2889 = vmatpush2.bf16.msra.mxu1 %v3397_v59  ;;  %v2123_v59 = vld [vmem:[#allocation6 + $0xc8] sm:$0xff] }
 0x3a2   : > { %2890 = vmatprep.subr.bf16.mxu1 %v3390_v63  ;;  %v3328_v63 = vcombine.high %v2123_v59, %v2127_v61  ;;  %v3327_v2 = vcombine.low %v2123_v59, %v2127_v61 }
 0x3a5   : > { %2891 = vmatpush2.bf16.msra.mxu1 %v3389_v0  ;;  %v2115_v0 = vld [vmem:[#allocation6 + $0x88] sm:$0xff] }
 0x3a6   : > { %2892 = vmatprep.subr.bf16.mxu1 %v3382_v3  ;;  %v3320_v3 = vcombine.high %v2115_v0, %v2119_v1  ;;  %v3319_v51 = vcombine.low %v2115_v0, %v2119_v1  ;;  %v2152_v0 = vld [vmem:[#allocation6 + $0x1b0] sm:$0xff]  ;;  %v2149_v1 = vld [vmem:[#allocation6 + $0x198] sm:$0xff] }
 0x3a9   : > { %2893 = vmatpush2.bf16.msra.mxu1 %v3381_v5  ;;  %v2107_v5 = vld [vmem:[#allocation6 + $0x48] sm:$0xff] }
 0x3aa   : > { %2894 = vmatprep.subr.bf16.mxu1 %v3374_v53  ;;  %v3312_v53 = vcombine.high %v2107_v5, %v2111_v6 }
 0x3ad   : > { %2895 = vmatpush2.bf16.msra.mxu1 %v3373_v15  ;;  %v2099_v15 = vld [vmem:[#allocation6 + $0x8] sm:$0xff] }
 0x3ae   : > { %v2042_v56 = vpop.permute.xlu1 %2041 }
 0x434   : > { %v1951_v16 = vpop.f32.mrf.mxu0  ;;  %v1992_v19 = vpop.f32.mrf.mxu1 }
 0x435   : > { %v2009_v9 = vrot.slane %v1951_v16, 4  ;;  %v2001_v10 = vrot.slane %v1992_v19, 4 }
 0x436   : > { %v1953_v48 = vpop.f32.mrf.mxu0  ;;  %v1994_v20 = vpop.f32.mrf.mxu1 }
 0x437   : > { %v2005_v52 = vsub.f32 %v1951_v16, %v2001_v10  ;;  %v2013_v21 = vadd.f32 %v2009_v9, %v1992_v19  ;;  %v2010_v22 = vrot.slane %v1953_v48, 4  ;;  %v2002_v7 = vrot.slane %v1994_v20, 4  ;;  %v2103_v16 = vld [vmem:[#allocation6 + $0x28] sm:$0xff] }
 0x438   : > { %v1955_v13 = vpop.f32.mrf.mxu0  ;;  %v1996_v14 = vpop.f32.mrf.mxu1  ;;  %v3311_v19 = vcombine.low %v2107_v5, %v2111_v6  ;;  %v3304_v9 = vcombine.high %v2099_v15, %v2103_v16  ;;  %v2219_v10 = vld [vmem:[#allocation6 + $0x3c8] sm:$0xff] }
 0x439   : > { %v2015_v17 = vmul.f32 %v2005_v52, %v2005_v52  ;;  %v2017_v23 = vmul.f32 %v2013_v21, %v2013_v21  ;;  %v2006_v24 = vsub.f32 %v1953_v48, %v2002_v7  ;;  %v2014_v4 = vadd.f32 %v2010_v22, %v1994_v20  ;;  %v2223_v48 = vld [vmem:[#allocation6 + $0x3e8] sm:$0xff] }
 0x43a   : > { %v1956_v25 = vpop.f32.mrf.mxu0  ;;  %v1997_v8 = vpop.f32.mrf.mxu1  ;;  %v3303_v20 = vcombine.low %v2099_v15, %v2103_v16  ;;  %v3424_v52 = vcombine.high %v2219_v10, %v2223_v48  ;;  %v2211_v21 = vld [vmem:[#allocation6 + $0x388] sm:$0xff]  ;;  %v3423_v7 = vcombine.low %v2219_v10, %v2223_v48  ;;  %v2144_v16 = vld [vmem:[#allocation6 + $0x170] sm:$0xff] }
 0x43b   : > { %v2019_v18 = vadd.f32 %v2017_v23, %v2015_v17  ;;  %v2016_v11 = vmul.f32 %v2006_v24, %v2006_v24  ;;  %v2018_v26 = vmul.f32 %v2014_v4, %v2014_v4  ;;  %v2215_v22 = vld [vmem:[#allocation6 + $0x3a8] sm:$0xff] }
 0x43c   : > { %v3416_v13 = vcombine.high %v2211_v21, %v2215_v22  ;;  %v2203_v14 = vld [vmem:[#allocation6 + $0x348] sm:$0xff]  ;;  %v3415_v23 = vcombine.low %v2211_v21, %v2215_v22  ;;  %v2132_v21 = vld [vmem:[#allocation6 + $0x110] sm:$0xff] }
 0x43d   : > { %3702 = vrsqrt.f32 %v2019_v18  ;;  %v2020_v50 = vadd.f32 %v2018_v26, %v2016_v11  ;;  %vm2023_vm8 = vcmp.eq.f32.partialorder %v2019_v18, inf  ;;  %v2026_v12 = vand.u32 2147483648, %v2019_v18  ;;  %v2207_v17 = vld [vmem:[#allocation6 + $0x368] sm:$0xff]  ;;  %v2136_v22 = vld [vmem:[#allocation6 + $0x130] sm:$0xff] }
 0x43e   : > { %vm2025_vm2 = vcmp.eq.f32.partialorder %v2019_v18, 0.0  ;;  %v3408_v24 = vcombine.high %v2203_v14, %v2207_v17  ;;  %v2195_v4 = vld [vmem:[#allocation6 + $0x308] sm:$0xff]  ;;  %v3407_v8 = vcombine.low %v2203_v14, %v2207_v17 }
 0x43f   : > { %3704 = vrsqrt.f32 %v2020_v50  ;;  %vm2030_vm3 = vcmp.eq.f32.partialorder %v2020_v50, inf  ;;  %v2033_v32 = vand.u32 2147483648, %v2020_v50  ;;  %vm2032_vm4 = vcmp.eq.f32.partialorder %v2020_v50, 0.0  ;;  %v2199_v25 = vld [vmem:[#allocation6 + $0x328] sm:$0xff] }
 0x440   : > { %v2187_v11 = vld [vmem:[#allocation6 + $0x2c8] sm:$0xff] }
 0x441   : > { %v2191_v26 = vld [vmem:[#allocation6 + $0x2e8] sm:$0xff] }
 0x44a   : > { %v3703_v27 = vpop.eup %3702 }
 0x44b   : > { %v2022_v28 = vmul.f32 %v3703_v27, %v2019_v18  ;;  %v3392_v27 = vcombine.high %v2187_v11, %v2191_v26 }
 0x44c   : > { %v3705_v29 = vpop.eup %3704 }
 0x44d   : > { %v2029_v30 = vmul.f32 %v3705_v29, %v2020_v50  ;;  %v2024_v31 = vsel %vm2023_vm8, %v2019_v18, %v2022_v28  ;;  %v3400_v18 = vcombine.high %v2195_v4, %v2199_v25  ;;  %v2179_v28 = vld [vmem:[#allocation6 + $0x288] sm:$0xff] }
 0x44e   : > { %v2027_v33 = vsel %vm2025_vm2, %v2026_v12, %v2024_v31  ;;  %v2183_v29 = vld [vmem:[#allocation6 + $0x2a8] sm:$0xff]  ;;  %v3391_v12 = vcombine.low %v2187_v11, %v2191_v26  ;;  %v3337_v11 = vcombine.low %v2132_v21, %v2136_v22 }
 0x44f   : > { %v2031_v36 = vsel %vm2030_vm3, %v2020_v50, %v2029_v30  ;;  %v2036_v60 = vpack.c.bf16 %v2027_v33, %v2027_v33  ;;  %v3399_v50 = vcombine.low %v2195_v4, %v2199_v25  ;;  %v3384_v30 = vcombine.high %v2179_v28, %v2183_v29  ;;  %v2171_v31 = vld [vmem:[#allocation6 + $0x248] sm:$0xff]  ;;  %v2124_v4 = vld [vmem:[#allocation6 + $0xd0] sm:$0xff] }
 0x450   : > { %v2034_v37 = vsel %vm2032_vm4, %v2033_v32, %v2031_v36  ;;  %v2175_v32 = vld [vmem:[#allocation6 + $0x268] sm:$0xff]  ;;  %v3383_v33 = vcombine.low %v2179_v28, %v2183_v29  ;;  %v2162_v36 = vld [vmem:[#allocation6 + $0x200] sm:$0xff]  ;;  %v2128_v25 = vld [vmem:[#allocation6 + $0xf0] sm:$0xff] }
 0x451   : > { %v2037_v38 = vpack.c.bf16 %v2034_v37, %v2034_v37  ;;  %v2050_v42 = vsel %vm2048_vm5, %v2036_v60, 0  ;;  %v3376_v34 = vcombine.high %v2171_v31, %v2175_v32  ;;  %v3375_v35 = vcombine.low %v2171_v31, %v2175_v32  ;;  %v2166_v60 = vld [vmem:[#allocation6 + $0x220] sm:$0xff]  ;;  %v2163_v37 = vld [vmem:[#allocation6 + $0x208] sm:$0xff]  ;;  %v2116_v28 = vld [vmem:[#allocation6 + $0x90] sm:$0xff] }
 0x452   : > { %v3367_v41 = vcombine.low %v2163_v37, %v2167_v40  ;;  %v2120_v29 = vld [vmem:[#allocation6 + $0xb0] sm:$0xff]  ;;  %v3329_v31 = vcombine.low %v2124_v4, %v2128_v25 }
 0x453   : > { %3299 = vmatprep.subr.msk.bf16.mxu0 %vm2048_vm5, %v2037_v38  ;;  %v3365_v38 = vcombine.low %v2162_v36, %v2166_v60 }
 0x454   : > { %2070 = vmatpush1.bf16.msra.mxu0 %v2050_v42  ;;  %v3368_v42 = vcombine.high %v2163_v37, %v2167_v40  ;;  %v2113_v37 = vld [vmem:[#allocation6 + $0x78] sm:$0xff] }
 0x455   : > { %2907 = vmatprep.subr.bf16.mxu0 %v3360_v39  ;;  %v3366_v39 = vcombine.high %v2162_v36, %v2166_v60  ;;  %v2112_v36 = vld [vmem:[#allocation6 + $0x70] sm:$0xff]  ;;  %v2109_v60 = vld [vmem:[#allocation6 + $0x58] sm:$0xff] }
 0x457   : > { %3300 = vmatmul.mubr.msk.bf16.vlgmr.msra.gmra.mxu0 %vm2044_vm6, %v2035_v44  ;;  %2896 = vmatprep.subr.bf16.mxu1 %v3366_v39  ;;  %v2156_v44 = vld [vmem:[#allocation6 + $0x1d0] sm:$0xff] }
 0x458   : > { %2908 = vmatpush1.bf16.msra.mxu0 %v3359_v45  ;;  %v2160_v45 = vld [vmem:[#allocation6 + $0x1f0] sm:$0xff]  ;;  %2897 = vmatpush2.bf16.msra.mxu1 %v3365_v38  ;;  %v3321_v38 = vcombine.low %v2116_v28, %v2120_v29 }
 0x459   : > { %2909 = vmatprep.subr.bf16.mxu0 %v3352_v46  ;;  %v2157_v46 = vld [vmem:[#allocation6 + $0x1d8] sm:$0xff]  ;;  %v3361_v47 = vcombine.low %v2156_v44, %v2160_v45  ;;  %v3362_v49 = vcombine.high %v2156_v44, %v2160_v45  ;;  %v2104_v44 = vld [vmem:[#allocation6 + $0x30] sm:$0xff] }
 0x45a   : > { %v2101_v45 = vld [vmem:[#allocation6 + $0x18] sm:$0xff] }
 0x45b   : > { %2948 = vmatprep.subr.bf16.mxu1 %v3362_v49  ;;  %v3315_v49 = vcombine.low %v2109_v60, %v2113_v37 }
 0x45c   : > { %2910 = vmatpush1.bf16.msra.mxu0 %v3351_v43  ;;  %v2161_v43 = vld [vmem:[#allocation6 + $0x1f8] sm:$0xff] }
 0x45d   : > { %2911 = vmatprep.subr.bf16.mxu0 %v3344_v54  ;;  %v3363_v54 = vcombine.low %v2157_v46, %v2161_v43  ;;  %v3364_v55 = vcombine.high %v2157_v46, %v2161_v43  ;;  %v2105_v46 = vld [vmem:[#allocation6 + $0x38] sm:$0xff] }
 0x460   : > { %2912 = vmatpush1.bf16.msra.mxu0 %v3343_v57 }
 0x461   : > { %2913 = vmatprep.subr.bf16.mxu0 %v3336_v58 }
 0x464   : > { %2914 = vmatpush1.bf16.msra.mxu0 %v3335_v62  ;;  %v2148_v62 = vld [vmem:[#allocation6 + $0x190] sm:$0xff] }
 0x465   : > { %2915 = vmatprep.subr.bf16.mxu0 %v3328_v63  ;;  %v3353_v10 = vcombine.low %v2148_v62, %v2152_v0 }
 0x468   : > { %2916 = vmatpush1.bf16.msra.mxu0 %v3327_v2  ;;  %v2153_v2 = vld [vmem:[#allocation6 + $0x1b8] sm:$0xff] }
 0x469   : > { %2917 = vmatprep.subr.bf16.mxu0 %v3320_v3  ;;  %v3356_v15 = vcombine.high %v2149_v1, %v2153_v2  ;;  %v3355_v48 = vcombine.low %v2149_v1, %v2153_v2  ;;  %v2216_v1 = vld [vmem:[#allocation6 + $0x3b0] sm:$0xff]  ;;  %v2213_v2 = vld [vmem:[#allocation6 + $0x398] sm:$0xff] }
 0x46c   : > { %2918 = vmatpush1.bf16.msra.mxu0 %v3319_v51  ;;  %v2140_v51 = vld [vmem:[#allocation6 + $0x150] sm:$0xff] }
 0x46d   : > { %2919 = vmatprep.subr.bf16.mxu0 %v3312_v53  ;;  %v3354_v53 = vcombine.high %v2148_v62, %v2152_v0  ;;  %v3345_v14 = vcombine.low %v2140_v51, %v2144_v16  ;;  %v2212_v0 = vld [vmem:[#allocation6 + $0x390] sm:$0xff] }
 0x470   : > { %2920 = vmatpush1.bf16.msra.mxu0 %v3311_v19  ;;  %v2141_v19 = vld [vmem:[#allocation6 + $0x158] sm:$0xff] }
 0x471   : > { %2921 = vmatprep.subr.bf16.mxu0 %v3304_v9  ;;  %v2145_v9 = vld [vmem:[#allocation6 + $0x178] sm:$0xff] }
 0x472   : > { %v3347_v17 = vcombine.low %v2141_v19, %v2145_v9 }
 0x474   : > { %2922 = vmatpush1.bf16.msra.mxu0 %v3303_v20  ;;  %v3346_v20 = vcombine.high %v2140_v51, %v2144_v16  ;;  %v2204_v16 = vld [vmem:[#allocation6 + $0x350] sm:$0xff] }
 0x475   : > { %2923 = vmatprep.subr.bf16.mxu0 %v3424_v52  ;;  %v3348_v52 = vcombine.high %v2141_v19, %v2145_v9  ;;  %v2208_v19 = vld [vmem:[#allocation6 + $0x370] sm:$0xff]  ;;  %v2205_v9 = vld [vmem:[#allocation6 + $0x358] sm:$0xff] }
 0x478   : > { %2924 = vmatpush2.bf16.msra.mxu0 %v3423_v7  ;;  %v2133_v7 = vld [vmem:[#allocation6 + $0x118] sm:$0xff] }
 0x479   : > { %2925 = vmatprep.subr.bf16.mxu0 %v3416_v13  ;;  %v2137_v13 = vld [vmem:[#allocation6 + $0x138] sm:$0xff] }
 0x47a   : > { %v3339_v26 = vcombine.low %v2133_v7, %v2137_v13 }
 0x47c   : > { %2926 = vmatpush2.bf16.msra.mxu0 %v3415_v23  ;;  %v3338_v23 = vcombine.high %v2132_v21, %v2136_v22  ;;  %v2196_v22 = vld [vmem:[#allocation6 + $0x310] sm:$0xff] }
 0x47d   : > { %2927 = vmatprep.subr.bf16.mxu0 %v3408_v24  ;;  %v3340_v24 = vcombine.high %v2133_v7, %v2137_v13  ;;  %v2200_v7 = vld [vmem:[#allocation6 + $0x330] sm:$0xff]  ;;  %v2197_v13 = vld [vmem:[#allocation6 + $0x318] sm:$0xff] }
 0x480   : > { %2928 = vmatpush2.bf16.msra.mxu0 %v3407_v8  ;;  %v2125_v8 = vld [vmem:[#allocation6 + $0xd8] sm:$0xff] }
 0x481   : > { %2929 = vmatprep.subr.bf16.mxu0 %v3400_v18  ;;  %v2129_v18 = vld [vmem:[#allocation6 + $0xf8] sm:$0xff] }
 0x482   : > { %v3331_v32 = vcombine.low %v2125_v8, %v2129_v18 }
 0x484   : > { %2930 = vmatpush2.bf16.msra.mxu0 %v3399_v50  ;;  %v3330_v50 = vcombine.high %v2124_v4, %v2128_v25  ;;  %v2188_v25 = vld [vmem:[#allocation6 + $0x2d0] sm:$0xff] }
 0x485   : > { %2931 = vmatprep.subr.bf16.mxu0 %v3392_v27  ;;  %v3332_v27 = vcombine.high %v2125_v8, %v2129_v18  ;;  %v2192_v8 = vld [vmem:[#allocation6 + $0x2f0] sm:$0xff]  ;;  %v2189_v18 = vld [vmem:[#allocation6 + $0x2d8] sm:$0xff] }
 0x488   : > { %2932 = vmatpush2.bf16.msra.mxu0 %v3391_v12  ;;  %v2117_v12 = vld [vmem:[#allocation6 + $0x98] sm:$0xff] }
 0x489   : > { %2933 = vmatprep.subr.bf16.mxu0 %v3384_v30  ;;  %v2121_v30 = vld [vmem:[#allocation6 + $0xb8] sm:$0xff] }
 0x48a   : > { %v3323_v39 = vcombine.low %v2117_v12, %v2121_v30 }
 0x48c   : > { %2934 = vmatpush2.bf16.msra.mxu0 %v3383_v33  ;;  %v3322_v33 = vcombine.high %v2116_v28, %v2120_v29  ;;  %v2180_v29 = vld [vmem:[#allocation6 + $0x290] sm:$0xff] }
 0x48d   : > { %2935 = vmatprep.subr.bf16.mxu0 %v3376_v34  ;;  %v3324_v34 = vcombine.high %v2117_v12, %v2121_v30  ;;  %v2184_v12 = vld [vmem:[#allocation6 + $0x2b0] sm:$0xff]  ;;  %v2181_v30 = vld [vmem:[#allocation6 + $0x298] sm:$0xff] }
 0x490   : > { %2936 = vmatpush2.bf16.msra.mxu0 %v3375_v35  ;;  %v2108_v35 = vld [vmem:[#allocation6 + $0x50] sm:$0xff] }
 0x491   : > { %2937 = vmatprep.subr.bf16.mxu0 %v3368_v42  ;;  %v3314_v40 = vcombine.high %v2108_v35, %v2112_v36  ;;  %v2100_v42 = vld [vmem:[#allocation6 + $0x10] sm:$0xff] }
 0x492   : > { %v3306_v43 = vcombine.high %v2100_v42, %v2104_v44 }
 0x494   : > { %2938 = vmatpush2.bf16.msra.mxu0 %v3367_v41  ;;  %v3316_v41 = vcombine.high %v2109_v60, %v2113_v37  ;;  %v2176_v60 = vld [vmem:[#allocation6 + $0x270] sm:$0xff]  ;;  %v2173_v37 = vld [vmem:[#allocation6 + $0x258] sm:$0xff] }
 0x495   : > { %2989 = vmatprep.subr.bf16.mxu0 %v3364_v55  ;;  %v2220_v55 = vld [vmem:[#allocation6 + $0x3d0] sm:$0xff] }
 0x517   : > { %v2089_v57 = vpop.f32.mrf.mxu0 }
 0x518   : > { %v2090_v58 = vadd.f32 %v2089_v57, %v2042_v56  ;;  %v2221_v57 = vld [vmem:[#allocation6 + $0x3d8] sm:$0xff] }
 0x519   : > { %v2091_v59 = vpop.f32.mrf.mxu0 }
 0x51a   : > { %v2092_v61 = vadd.f32 %v2091_v59, %v2042_v56  ;;  %v4085_v5 = vpack.c.bf16 %v2090_v58, %v2090_v58  ;;  %v2224_v56 = vld [vmem:[#allocation6 + $0x3f0] sm:$0xff]  ;;  %v2225_v58 = vld [vmem:[#allocation6 + $0x3f8] sm:$0xff]  ;;  %v3305_v59 = vcombine.low %v2100_v42, %v2104_v44 }
 0x51b   : > { %v2093_v63 = vpop.f32.mrf.mxu0  ;;  %v3426_v62 = vcombine.high %v2220_v55, %v2224_v56  ;;  %v3427_v51 = vcombine.low %v2221_v57, %v2225_v58  ;;  %v2164_v44 = vld [vmem:[#allocation6 + $0x210] sm:$0xff] }
 0x51c   : > { %v2097_v3 = vpack.c.bf16 %v2092_v61, %v2092_v61  ;;  %v3307_v61 = vcombine.low %v2101_v45, %v2105_v46  ;;  %v3428_v63 = vcombine.high %v2221_v57, %v2225_v58 }
 0x51d   : > { %v2094_v6 = vpop.f32.mrf.mxu0 }
 0x51e   : > { %2898 = vmatprep.mubr.bf16.mxu1 %v2097_v3  ;;  %2939 = vmatprep.mubr.bf16.mxu0 %v2097_v3  ;;  %v3425_v6 = vcombine.low %v2220_v55, %v2224_v56 }
 0x51f   : > { %2899 = vmatmul.mubr.bf16.vlgmr.msra.gmra.mxu1 %v4085_v5  ;;  %2940 = vmatmul.mubr.bf16.vlgmr.msra.gmra.mxu0 %v4085_v5 }
 0x520   : > { %2949 = vmatpush1.bf16.msra.mxu1 %v3361_v47  ;;  %2990 = vmatpush1.bf16.msra.mxu0 %v3363_v54  ;;  %v3313_v47 = vcombine.low %v2108_v35, %v2112_v36  ;;  %v3308_v54 = vcombine.high %v2101_v45, %v2105_v46  ;;  %v2172_v36 = vld [vmem:[#allocation6 + $0x250] sm:$0xff]  ;;  %v2165_v46 = vld [vmem:[#allocation6 + $0x218] sm:$0xff] }
 0x521   : > { %2980 = vmatprep.mubr.bf16.mxu1 %v2097_v3  ;;  %3021 = vmatprep.mubr.bf16.mxu0 %v2097_v3  ;;  %v2217_v3 = vld [vmem:[#allocation6 + $0x3b8] sm:$0xff]  ;;  %v2168_v45 = vld [vmem:[#allocation6 + $0x230] sm:$0xff] }
 0x522   : > { %2950 = vmatprep.subr.bf16.mxu1 %v3354_v53  ;;  %2991 = vmatprep.subr.bf16.mxu0 %v3356_v15  ;;  %v3418_v53 = vcombine.high %v2212_v0, %v2216_v1  ;;  %v3420_v15 = vcombine.high %v2213_v2, %v2217_v3  ;;  %v3369_v56 = vcombine.low %v2164_v44, %v2168_v45 }
 0x524   : > { %2951 = vmatpush1.bf16.msra.mxu1 %v3353_v10  ;;  %2992 = vmatpush1.bf16.msra.mxu0 %v3355_v48  ;;  %v2209_v10 = vld [vmem:[#allocation6 + $0x378] sm:$0xff]  ;;  %v3417_v48 = vcombine.low %v2212_v0, %v2216_v1 }
 0x525   : > { %2952 = vmatprep.subr.bf16.mxu1 %v3346_v20  ;;  %2993 = vmatprep.subr.bf16.mxu0 %v3348_v52  ;;  %v3419_v20 = vcombine.low %v2213_v2, %v2217_v3  ;;  %v3410_v52 = vcombine.high %v2204_v16, %v2208_v19  ;;  %v3412_v21 = vcombine.high %v2205_v9, %v2209_v10 }
 0x528   : > { %2953 = vmatpush1.bf16.msra.mxu1 %v3345_v14  ;;  %2994 = vmatpush1.bf16.msra.mxu0 %v3347_v17  ;;  %v2201_v14 = vld [vmem:[#allocation6 + $0x338] sm:$0xff]  ;;  %v3409_v17 = vcombine.low %v2204_v16, %v2208_v19 }
 0x529   : > { %2954 = vmatprep.subr.bf16.mxu1 %v3338_v23  ;;  %2995 = vmatprep.subr.bf16.mxu0 %v3340_v24  ;;  %v3411_v23 = vcombine.low %v2205_v9, %v2209_v10  ;;  %v3402_v24 = vcombine.high %v2196_v22, %v2200_v7  ;;  %v3404_v4 = vcombine.high %v2197_v13, %v2201_v14 }
 0x52c   : > { %2955 = vmatpush1.bf16.msra.mxu1 %v3337_v11  ;;  %2996 = vmatpush1.bf16.msra.mxu0 %v3339_v26  ;;  %v2193_v11 = vld [vmem:[#allocation6 + $0x2f8] sm:$0xff]  ;;  %v3401_v26 = vcombine.low %v2196_v22, %v2200_v7 }
 0x52d   : > { %2956 = vmatprep.subr.bf16.mxu1 %v3330_v50  ;;  %2997 = vmatprep.subr.bf16.mxu0 %v3332_v27  ;;  %v3403_v50 = vcombine.low %v2197_v13, %v2201_v14  ;;  %v3394_v27 = vcombine.high %v2188_v25, %v2192_v8  ;;  %v3396_v28 = vcombine.high %v2189_v18, %v2193_v11 }
 0x530   : > { %2957 = vmatpush1.bf16.msra.mxu1 %v3329_v31  ;;  %2998 = vmatpush1.bf16.msra.mxu0 %v3331_v32  ;;  %v2185_v31 = vld [vmem:[#allocation6 + $0x2b8] sm:$0xff]  ;;  %v3393_v32 = vcombine.low %v2188_v25, %v2192_v8 }
 0x531   : > { %2958 = vmatprep.subr.bf16.mxu1 %v3322_v33  ;;  %2999 = vmatprep.subr.bf16.mxu0 %v3324_v34  ;;  %v3395_v33 = vcombine.low %v2189_v18, %v2193_v11  ;;  %v3386_v34 = vcombine.high %v2180_v29, %v2184_v12  ;;  %v3388_v35 = vcombine.high %v2181_v30, %v2185_v31 }
 0x534   : > { %2959 = vmatpush1.bf16.msra.mxu1 %v3321_v38  ;;  %3000 = vmatpush1.bf16.msra.mxu0 %v3323_v39  ;;  %v2177_v38 = vld [vmem:[#allocation6 + $0x278] sm:$0xff]  ;;  %v3385_v39 = vcombine.low %v2180_v29, %v2184_v12 }
 0x535   : > { %2960 = vmatprep.subr.bf16.mxu1 %v3314_v40  ;;  %3001 = vmatprep.subr.bf16.mxu0 %v3316_v41  ;;  %v3387_v40 = vcombine.low %v2181_v30, %v2185_v31  ;;  %v3378_v41 = vcombine.high %v2172_v36, %v2176_v60  ;;  %v3380_v42 = vcombine.high %v2173_v37, %v2177_v38 }
 0x538   : > { %2961 = vmatpush1.bf16.msra.mxu1 %v3313_v47  ;;  %3002 = vmatpush1.bf16.msra.mxu0 %v3315_v49  ;;  %v2169_v47 = vld [vmem:[#allocation6 + $0x238] sm:$0xff]  ;;  %v3377_v49 = vcombine.low %v2172_v36, %v2176_v60 }
 0x539   : > { %2962 = vmatprep.subr.bf16.mxu1 %v3306_v43  ;;  %3003 = vmatprep.subr.bf16.mxu0 %v3308_v54  ;;  %v3379_v43 = vcombine.low %v2173_v37, %v2177_v38  ;;  %v3370_v54 = vcombine.high %v2164_v44, %v2168_v45  ;;  %v3372_v55 = vcombine.high %v2165_v46, %v2169_v47 }
 0x53a   : > { %v3371_v57 = vcombine.low %v2165_v46, %v2169_v47 }
 0x53c   : > { %2963 = vmatpush1.bf16.msra.mxu1 %v3305_v59  ;;  %3004 = vmatpush1.bf16.msra.mxu0 %v3307_v61 }
 0x53d   : > { %2964 = vmatprep.subr.bf16.mxu1 %v3426_v62  ;;  %3005 = vmatprep.subr.bf16.mxu0 %v3428_v63 }
 0x540   : > { %2965 = vmatpush2.bf16.msra.mxu1 %v3425_v6  ;;  %3006 = vmatpush2.bf16.msra.mxu0 %v3427_v51 }
 0x541   : > { %2966 = vmatprep.subr.bf16.mxu1 %v3418_v53  ;;  %3007 = vmatprep.subr.bf16.mxu0 %v3420_v15 }
 0x544   : > { %2967 = vmatpush2.bf16.msra.mxu1 %v3417_v48  ;;  %3008 = vmatpush2.bf16.msra.mxu0 %v3419_v20 }
 0x545   : > { %2968 = vmatprep.subr.bf16.mxu1 %v3410_v52  ;;  %3009 = vmatprep.subr.bf16.mxu0 %v3412_v21 }
 0x548   : > { %2969 = vmatpush2.bf16.msra.mxu1 %v3409_v17  ;;  %3010 = vmatpush2.bf16.msra.mxu0 %v3411_v23 }
 0x549   : > { %2970 = vmatprep.subr.bf16.mxu1 %v3402_v24  ;;  %3011 = vmatprep.subr.bf16.mxu0 %v3404_v4 }
 0x54c   : > { %2971 = vmatpush2.bf16.msra.mxu1 %v3401_v26  ;;  %3012 = vmatpush2.bf16.msra.mxu0 %v3403_v50 }
 0x54d   : > { %2972 = vmatprep.subr.bf16.mxu1 %v3394_v27  ;;  %3013 = vmatprep.subr.bf16.mxu0 %v3396_v28 }
 0x550   : > { %2973 = vmatpush2.bf16.msra.mxu1 %v3393_v32  ;;  %3014 = vmatpush2.bf16.msra.mxu0 %v3395_v33 }
 0x551   : > { %2974 = vmatprep.subr.bf16.mxu1 %v3386_v34  ;;  %3015 = vmatprep.subr.bf16.mxu0 %v3388_v35 }
 0x554   : > { %2975 = vmatpush2.bf16.msra.mxu1 %v3385_v39  ;;  %3016 = vmatpush2.bf16.msra.mxu0 %v3387_v40 }
 0x555   : > { %2976 = vmatprep.subr.bf16.mxu1 %v3378_v41  ;;  %3017 = vmatprep.subr.bf16.mxu0 %v3380_v42 }
 0x558   : > { %2977 = vmatpush2.bf16.msra.mxu1 %v3377_v49  ;;  %3018 = vmatpush2.bf16.msra.mxu0 %v3379_v43 }
 0x559   : > { %2978 = vmatprep.subr.bf16.mxu1 %v3370_v54  ;;  %3019 = vmatprep.subr.bf16.mxu0 %v3372_v55 }
 0x55c   : > { %2979 = vmatpush2.bf16.msra.mxu1 %v3369_v56  ;;  %3020 = vmatpush2.bf16.msra.mxu0 %v3371_v57 }
 0x55f   : > { %2981 = vmatmul.mubr.bf16.vlgmr.msra.gmra.mxu1 %v4085_v5  ;;  %3022 = vmatmul.mubr.bf16.vlgmr.msra.gmra.mxu0 %v4085_v5 }
 0x5df   : > { %v2900_v58 = vpop.f32.mrf.mxu1  ;;  %v2941_v59 = vpop.f32.mrf.mxu0 }
 0x5e1   : > { %v2902_v61 = vpop.f32.mrf.mxu1  ;;  %v2943_v62 = vpop.f32.mrf.mxu0 }
 0x5e2   : > { %v3038_v63 = vcombine.low %v2900_v58, %v2902_v61  ;;  %v3039_v0 = vcombine.low %v2941_v59, %v2943_v62 }
 0x5e3   : > { %v2904_v1 = vpop.f32.mrf.mxu1  ;;  %v2945_v2 = vpop.f32.mrf.mxu0 }
 0x5e4   : > { %3046 = vst [vmem:[%s403_s19] sm:$0xff] %v3038_v63  ;;  %3047 = vst [vmem:[%s403_s19 + $0x8] sm:$0xff] %v3039_v0 }
 0x5e5   : > { %v2905_v3 = vpop.f32.mrf.mxu1  ;;  %v2946_v6 = vpop.f32.mrf.mxu0 }
 0x61f   : > { %v2982_v51 = vpop.f32.mrf.mxu1  ;;  %v3023_v53 = vpop.f32.mrf.mxu0 }
 0x621   : > { %v2984_v5 = vpop.f32.mrf.mxu1  ;;  %v3025_v15 = vpop.f32.mrf.mxu0 }
 0x622   : > { %v3040_v16 = vcombine.low %v2982_v51, %v2984_v5  ;;  %v3041_v19 = vcombine.low %v3023_v53, %v3025_v15 }
 0x623   : > { %v2986_v9 = vpop.f32.mrf.mxu1  ;;  %v3027_v10 = vpop.f32.mrf.mxu0 }
 0x624   : > { %3048 = vst [vmem:[%s403_s19 + $0x10] sm:$0xff] %v3040_v16  ;;  %3049 = vst [vmem:[%s403_s19 + $0x18] sm:$0xff] %v3041_v19 }
 0x625   : > { %v2987_v48 = vpop.f32.mrf.mxu1  ;;  %v3028_v20 = vpop.f32.mrf.mxu0 }
 0x626 PF: > { %s22_s13 = sadd.s32 1, %s3798_s13  }
 0x627   : > { %p19_p3 = scmp.ge.s32.totalorder %s22_s13, 4  }
 0x629   :  { %21 = sbr.rel (!%p19_p3) target bundleno = 2 (0x2), region = 103 }
 0x62e   :  { %3071 = vsyncpa [#allocation3], 1 }
 0x62f   :  { %3073 = vsyncpa [#allocation3 + $0x1], 1 }
 0x630   :  { %3074 = vsyncpa [#allocation5], 1 }

// kernel: freup_areainterp_v2.1
= control target key start
LH: loop header
LB: loop body
LE: loop exit
PB: predicated region body
PF: predicated region fallthrough
CT: control target
= control target key end

     0   :  { %15 = vsyncpa [#allocation3], 0  ;;  %s4098_s0 = inlined_call_operand.vmem [shape: f32[2,4,256], index: 0, kind: input, shape index: {}]   ;;  %s4099_s1 = inlined_call_operand.hbm [shape: bf16[256,512], index: 1, kind: input, shape index: {}]   ;;  %s4100_s2 = inlined_call_operand.vmem [shape: bf16[8,8], index: 2, kind: input, shape index: {}]   ;;  %s4101_s3 = inlined_call_operand.vmem [shape: f32[8,1], index: 3, kind: input, shape index: {}]   ;;  %s4102_s4 = inlined_call_operand.vmem [shape: bf16[8,8], index: 4, kind: input, shape index: {}]   ;;  %s4103_s5 = inlined_call_operand.vmem [shape: f32[8,1], index: 5, kind: input, shape index: {}]   ;;  %s4104_s6 = inlined_call_operand.hbm [shape: bf16[256,512], index: 6, kind: input, shape index: {}]   ;;  %s4105_s7 = inlined_call_operand.vmem [shape: bf16[4,4], index: 7, kind: input, shape index: {}]   ;;  %s4106_s8 = inlined_call_operand.vmem [shape: f32[4,1], index: 8, kind: input, shape index: {}]   ;;  %s4107_s9 = inlined_call_operand.hbm [shape: bf16[256,1024], index: 9, kind: input, shape index: {}]   ;;  %s4108_s10 = inlined_call_operand.vmem [shape: f32[2,4,1024], index: 10, kind: output, shape index: {}]  }
   0x1   :  { %16 = vsyncpa [#allocation5], 0  ;;  %s3869_s13 = smov 0  }
   0x2 LB: > { %s3875_s14 = sadd.s32 4294967295, %s3798_s13   ;;  %p3138_p0 = scmp.ge.s32.totalorder %s3798_s13, 1  ;;  %s3798_s13 = sphi %s3869_s13, %s22_s13  }
   0x3   : > { %p268_p1 = scmp.lt.s32.totalorder %s3798_s13, 3  ;;  %p3463_p2 = scmp.eq.s32.totalorder %s3875_s14, 0 }
   0x4   : > { %s3800_s16 = smov [#allocation4]   ;;  %s3801_s18 = smov [#allocation2]  }
   0x5   : > { %p3880_p3 = pnand %p3138_p0, %p268_p1  ;;  %s305_s17 = sshll.u32 %s3800_s16, 4  ;;  %s306_s17 = int_to_ptr.vmem [resolvable:$true] %s305_s17 }
   0x6   : > { %s280_s19 = sshll.u32 %s3801_s18, 4  ;;  %s3802_s21 = smov [#allocation6]   ;;  %s3886_s19 = int_to_ptr.vmem [resolvable:$true] %s280_s19 }
   0x7   : > { %p3453_p4 = pneg %p3880_p3  ;;  %s324_s22 = sshll.u32 %s3802_s21, 4  ;;  %s3894_s22 = int_to_ptr.vmem [resolvable:$true] %s324_s22 }
   0x8   : > { %s3717_s23 = scalar_lea.vmem %s306_s17, 8192  ;;  %p3725_p10 = scmp.lt.s32.totalorder %s306_s17, %s306_s17 }
   0x9   : > { %p3890_p5 = pnand %p3463_p2, %p3453_p4  ;;  %p3718_p7 = scmp.ne.s32.totalorder %s306_s17, %s3717_s23 }
   0xa   : > { %p3726_p11 = scmp.lt.s32.totalorder %s3717_s23, %s3717_s23 }
   0xb   : > { %p3708_p6 = pneg %p3890_p5 }
   0xc   : > { %p3727_p12 = por %p3726_p11, %p3725_p10 }
   0xd   : > { %p3720_p8 = pnand %p3718_p7, %p3708_p6 }
   0xf   : > { %p3721_p9 = pneg %p3720_p8 }
  0x11   : > { %p3728_p13 = pnand %p3727_p12, %p3721_p9 }
  0x13   : > { %3731 = shalt.err (!%p3728_p13)
}
  0x14   : > { %s3803_s24 = smov 256   ;;  %s3804_s25 = smov 16  }
  0x15   : > { %3459 = dma.hbm_to_vmem [thread:$0]  (!%p3890_p5), %s4104_s6, 8192, %s306_s17, [#allocation5], %s3803_s24, %s3803_s24, %s3804_s25  }
  0x16   : > { %s3743_s28 = scalar_lea.vmem %s3886_s19, 8192  ;;  %p3751_p7 = scmp.lt.s32.totalorder %s3886_s19, %s3886_s19 }
  0x17   : > { %p3744_p0 = scmp.ne.s32.totalorder %s3886_s19, %s3743_s28  ;;  %p3752_p8 = scmp.lt.s32.totalorder %s3743_s28, %s3743_s28 }
  0x19   : > { %p3746_p1 = pnand %p3744_p0, %p3708_p6  ;;  %p3753_p9 = por %p3752_p8, %p3751_p7 }
  0x1b   : > { %p3747_p4 = pneg %p3746_p1 }
  0x1d   : > { %p3754_p10 = pnand %p3753_p9, %p3747_p4 }
  0x1f   : > { %3757 = shalt.err (!%p3754_p10)
}
  0x20   : > { %3456 = dma.hbm_to_vmem [thread:$0]  (!%p3890_p5), %s4099_s1, 8192, %s3886_s19, [#allocation3], %s3803_s24, %s3803_s24, %s3804_s25  }
  0x21   : > { %s3769_s11 = scalar_lea.vmem %s3894_s22, 16384  ;;  %p3777_p0 = scmp.lt.s32.totalorder %s3894_s22, %s3894_s22 }
  0x22   : > { %p3770_p11 = scmp.ne.s32.totalorder %s3894_s22, %s3769_s11  ;;  %p3778_p1 = scmp.lt.s32.totalorder %s3769_s11, %s3769_s11 }
  0x24   : > { %p3772_p12 = pnand %p3770_p11, %p3708_p6  ;;  %p3779_p4 = por %p3778_p1, %p3777_p0 }
  0x26   : > { %p3773_p13 = pneg %p3772_p12 }
  0x28   : > { %p3780_p7 = pnand %p3779_p4, %p3773_p13 }
  0x2a   : > { %3783 = shalt.err (!%p3780_p7)
}
  0x2b   : > { %s3805_s12 = smov 512   ;;  %s3806_s16 = smov 32  }
  0x2c   : > { %3462 = dma.hbm_to_vmem [thread:$0]  (!%p3890_p5), %s4107_s9, 16384, %s3894_s22, [#allocation5], %s3805_s12, %s3805_s12, %s3806_s16  }
  0x2d   : > { %348 = sbr.rel (%p3880_p3) target bundleno = 1574 (0x626), region = 60 }
  0x32   : > { %3789 = dma.done.wait (%p3463_p2), [#allocation3], 8192  }
  0x33   : > { %3791 = vsyncadd (%p3463_p2), [#allocation3], 4294959104 }
  0x34   : > { %3793 = dma.done.wait (%p3463_p2), [#allocation5], 24576  }
  0x35   : > { %3795 = vsyncadd (%p3463_p2), [#allocation5], 4294942720  ;;  %v3493_v0 = vld [vmem:[#allocation2 + $0xe4] ss:$16 sps:$4 sm:$0xff]   ;;  %v3495_v1 = vld [vmem:[#allocation2 + $0xec] ss:$16 sps:$4 sm:$0xff]  }
  0x36   : > { %795 = vmatprep.subr.bf16.mxu0 %v3493_v0  ;;  %v3497_v2 = vld [vmem:[#allocation2 + $0xe0] ss:$16 sps:$4 sm:$0xff]   ;;  %v3498_v3 = vld [vmem:[#allocation2 + $0xe8] ss:$16 sps:$4 sm:$0xff]   ;;  %836 = vmatprep.subr.bf16.mxu1 %v3495_v1  ;;  %v3499_v4 = vld [vmem:[#allocation2 + $0xc4] ss:$16 sps:$4 sm:$0xff]  }
  0x37   : > { %796 = vmatpush1.bf16.msra.mxu0 %v3497_v2  ;;  %837 = vmatpush1.bf16.msra.mxu1 %v3498_v3  ;;  %v3501_v5 = vld [vmem:[#allocation2 + $0xcc] ss:$16 sps:$4 sm:$0xff]   ;;  %v3503_v6 = vld [vmem:[#allocation2 + $0xc0] ss:$16 sps:$4 sm:$0xff]   ;;  %v3504_v7 = vld [vmem:[#allocation2 + $0xc8] ss:$16 sps:$4 sm:$0xff]  }
  0x38   : > { %797 = vmatprep.subr.bf16.mxu0 %v3499_v4  ;;  %838 = vmatprep.subr.bf16.mxu1 %v3501_v5  ;;  %v3505_v8 = vld [vmem:[#allocation2 + $0xa4] ss:$16 sps:$4 sm:$0xff]   ;;  %v3507_v9 = vld [vmem:[#allocation2 + $0xac] ss:$16 sps:$4 sm:$0xff]   ;;  %v3509_v10 = vld [vmem:[#allocation2 + $0xa0] ss:$16 sps:$4 sm:$0xff]  }
  0x39   : > { %v3510_v11 = vld [vmem:[#allocation2 + $0xa8] ss:$16 sps:$4 sm:$0xff]   ;;  %v3511_v12 = vld [vmem:[#allocation2 + $0x84] ss:$16 sps:$4 sm:$0xff]   ;;  %v3513_v13 = vld [vmem:[#allocation2 + $0x8c] ss:$16 sps:$4 sm:$0xff]  }
  0x3a   : > { %v3515_v14 = vld [vmem:[#allocation2 + $0x80] ss:$16 sps:$4 sm:$0xff]   ;;  %v3516_v15 = vld [vmem:[#allocation2 + $0x88] ss:$16 sps:$4 sm:$0xff]   ;;  %v3517_v16 = vld [vmem:[#allocation2 + $0x64] ss:$16 sps:$4 sm:$0xff]  }
  0x3b   : > { %798 = vmatpush1.bf16.msra.mxu0 %v3503_v6  ;;  %839 = vmatpush1.bf16.msra.mxu1 %v3504_v7  ;;  %v3519_v17 = vld [vmem:[#allocation2 + $0x6c] ss:$16 sps:$4 sm:$0xff]   ;;  %v3521_v18 = vld [vmem:[#allocation2 + $0x60] ss:$16 sps:$4 sm:$0xff]   ;;  %v3522_v19 = vld [vmem:[#allocation2 + $0x68] ss:$16 sps:$4 sm:$0xff]  }
  0x3c   : > { %799 = vmatprep.subr.bf16.mxu0 %v3505_v8  ;;  %840 = vmatprep.subr.bf16.mxu1 %v3507_v9  ;;  %v3523_v20 = vld [vmem:[#allocation2 + $0x44] ss:$16 sps:$4 sm:$0xff]   ;;  %v3525_v21 = vld [vmem:[#allocation2 + $0x4c] ss:$16 sps:$4 sm:$0xff]   ;;  %v3527_v22 = vld [vmem:[#allocation2 + $0x40] ss:$16 sps:$4 sm:$0xff]  }
  0x3d   : > { %v3528_v23 = vld [vmem:[#allocation2 + $0x48] ss:$16 sps:$4 sm:$0xff]   ;;  %v3529_v24 = vld [vmem:[#allocation2 + $0x24] ss:$16 sps:$4 sm:$0xff]   ;;  %v3531_v25 = vld [vmem:[#allocation2 + $0x2c] ss:$16 sps:$4 sm:$0xff]  }
  0x3e   : > { %v3533_v26 = vld [vmem:[#allocation2 + $0x20] ss:$16 sps:$4 sm:$0xff]   ;;  %v3534_v27 = vld [vmem:[#allocation2 + $0x28] ss:$16 sps:$4 sm:$0xff]   ;;  %v3535_v28 = vld [vmem:[#allocation2 + $0x4] ss:$16 sps:$4 sm:$0xff]  }
  0x3f   : > { %800 = vmatpush1.bf16.msra.mxu0 %v3509_v10  ;;  %841 = vmatpush1.bf16.msra.mxu1 %v3510_v11  ;;  %v3537_v29 = vld [vmem:[#allocation2 + $0xc] ss:$16 sps:$4 sm:$0xff]   ;;  %v3539_v30 = vld [vmem:[#allocation2] ss:$16 sps:$4 sm:$0xff]   ;;  %v3540_v31 = vld [vmem:[#allocation2 + $0x8] ss:$16 sps:$4 sm:$0xff]  }
  0x40   : > { %801 = vmatprep.subr.bf16.mxu0 %v3511_v12  ;;  %842 = vmatprep.subr.bf16.mxu1 %v3513_v13  ;;  %v3541_v32 = vld [vmem:[#allocation2 + $0x1e4] ss:$16 sps:$4 sm:$0xff]   ;;  %p394_p2 = scmp.lt.s32.totalorder %s3875_s14, 1  ;;  %v3543_v33 = vld [vmem:[#allocation2 + $0x1ec] ss:$16 sps:$4 sm:$0xff]   ;;  %v3807_v4 = vmov 0  }
  0x41   : > { %v3545_v34 = vld [vmem:[#allocation2 + $0x1e0] ss:$16 sps:$4 sm:$0xff]   ;;  %v3546_v35 = vld [vmem:[#allocation2 + $0x1e8] ss:$16 sps:$4 sm:$0xff]   ;;  %v3547_v36 = vld [vmem:[#allocation2 + $0x1c4] ss:$16 sps:$4 sm:$0xff]   ;;  %3491 = vset.pattern.permute.xlu0 %v3807_v4  ;;  %3492 = vset.pattern.permute.xlu1 %v3807_v4 }
  0x42   : > { %s4112_s14 = smov (!%p394_p2, %s3875_s14), 1  ;;  %v3549_v37 = vld [vmem:[#allocation2 + $0x1cc] ss:$16 sps:$4 sm:$0xff]   ;;  %v3551_v38 = vld [vmem:[#allocation2 + $0x1c0] ss:$16 sps:$4 sm:$0xff]   ;;  %vm965_vm8 = vcmask 1043456  }
  0x43   : > { %802 = vmatpush1.bf16.msra.mxu0 %v3515_v14  ;;  %843 = vmatpush1.bf16.msra.mxu1 %v3516_v15  ;;  %v3552_v39 = vld [vmem:[#allocation2 + $0x1c8] ss:$16 sps:$4 sm:$0xff]   ;;  %v3553_v40 = vld [vmem:[#allocation2 + $0x1a4] ss:$16 sps:$4 sm:$0xff]   ;;  %s3431_s15 = sshll.u32 %s4112_s14, 3  ;;  %vm977_vm13 = vcmask 64512  }
  0x44   : > { %803 = vmatprep.subr.bf16.mxu0 %v3517_v16  ;;  %844 = vmatprep.subr.bf16.mxu1 %v3519_v17  ;;  %v3555_v41 = vld [vmem:[#allocation2 + $0x1ac] ss:$16 sps:$4 sm:$0xff]   ;;  %v3557_v42 = vld [vmem:[#allocation2 + $0x1a0] ss:$16 sps:$4 sm:$0xff]   ;;  %v3558_v43 = vld [vmem:[#allocation2 + $0x1a8] ss:$16 sps:$4 sm:$0xff]   ;;  %s398_s21 = scalar_lea.vmem %s4098_s0, %s3431_s15 }
  0x45   : > { %v3559_v44 = vld [vmem:[#allocation2 + $0x184] ss:$16 sps:$4 sm:$0xff]   ;;  %v3561_v45 = vld [vmem:[#allocation2 + $0x18c] ss:$16 sps:$4 sm:$0xff]   ;;  %v3563_v46 = vld [vmem:[#allocation2 + $0x180] ss:$16 sps:$4 sm:$0xff]  }
  0x46   : > { %v3564_v47 = vld [vmem:[#allocation2 + $0x188] ss:$16 sps:$4 sm:$0xff]   ;;  %v405_v48 = vld [vmem:[%s398_s21] sm:$0xff]  ;;  %v3567_v50 = vld [vmem:[#allocation2 + $0x16c] ss:$16 sps:$4 sm:$0xff]   ;;  %s3432_s17 = sshll.u32 %s4112_s14, 5 }
  0x47   : > { %804 = vmatpush1.bf16.msra.mxu0 %v3521_v18  ;;  %845 = vmatpush1.bf16.msra.mxu1 %v3522_v19  ;;  %v3565_v49 = vld [vmem:[#allocation2 + $0x164] ss:$16 sps:$4 sm:$0xff]   ;;  %v407_v51 = vcombine.high %v405_v48, %v405_v48  ;;  %v3569_v53 = vld [vmem:[#allocation2 + $0x160] ss:$16 sps:$4 sm:$0xff]   ;;  %v3570_v54 = vld [vmem:[#allocation2 + $0x168] ss:$16 sps:$4 sm:$0xff]   ;;  %v409_v3 = vpack.c.bf16 %v405_v48, %v405_v48  ;;  %s403_s19 = scalar_lea.vmem %s4108_s10, %s3432_s17 }
  0x48   : > { %805 = vmatprep.subr.bf16.mxu0 %v3523_v20  ;;  %846 = vmatprep.subr.bf16.mxu1 %v3525_v21  ;;  %v3571_v55 = vld [vmem:[#allocation2 + $0x144] ss:$16 sps:$4 sm:$0xff]   ;;  %v3573_v56 = vld [vmem:[#allocation2 + $0x14c] ss:$16 sps:$4 sm:$0xff]   ;;  %v3575_v57 = vld [vmem:[#allocation2 + $0x140] ss:$16 sps:$4 sm:$0xff]  }
  0x49   : > { %v410_v52 = vpack.c.bf16 %v407_v51, %v407_v51  ;;  %v3576_v58 = vld [vmem:[#allocation2 + $0x148] ss:$16 sps:$4 sm:$0xff]   ;;  %v3577_v59 = vld [vmem:[#allocation2 + $0x124] ss:$16 sps:$4 sm:$0xff]   ;;  %v3579_v60 = vld [vmem:[#allocation2 + $0x12c] ss:$16 sps:$4 sm:$0xff]  }
  0x4a   : > { %v3581_v61 = vld [vmem:[#allocation2 + $0x120] ss:$16 sps:$4 sm:$0xff]   ;;  %v3582_v62 = vld [vmem:[#allocation2 + $0x128] ss:$16 sps:$4 sm:$0xff]   ;;  %v3583_v63 = vld [vmem:[#allocation2 + $0x104] ss:$16 sps:$4 sm:$0xff]  }
  0x4b   : > { %806 = vmatpush1.bf16.msra.mxu0 %v3527_v22  ;;  %847 = vmatpush1.bf16.msra.mxu1 %v3528_v23  ;;  %v3585_v0 = vld [vmem:[#allocation2 + $0x10c] ss:$16 sps:$4 sm:$0xff]   ;;  %v3587_v1 = vld [vmem:[#allocation2 + $0x100] ss:$16 sps:$4 sm:$0xff]   ;;  %v3588_v2 = vld [vmem:[#allocation2 + $0x108] ss:$16 sps:$4 sm:$0xff]  }
  0x4c   : > { %807 = vmatprep.subr.bf16.mxu0 %v3529_v24  ;;  %848 = vmatprep.subr.bf16.mxu1 %v3531_v25  ;;  %v971_v5 = vld [vmem:[%s4101_s3] sm:$0xff] }
  0x4d   : > { %827 = vmatprep.mubr.bf16.mxu0 %v410_v52  ;;  %868 = vmatprep.mubr.bf16.mxu1 %v410_v52  ;;  %v1037_v6 = vld [vmem:[%s4103_s5] sm:$0xff] }
  0x4e   : > { %974 = vperm.xlu0 %3491, %v971_v5  }
  0x4f   : > { %808 = vmatpush1.bf16.msra.mxu0 %v3533_v26  ;;  %849 = vmatpush1.bf16.msra.mxu1 %v3534_v27 }
  0x50   : > { %809 = vmatprep.subr.bf16.mxu0 %v3535_v28  ;;  %850 = vmatprep.subr.bf16.mxu1 %v3537_v29 }
  0x52   : > { %1040 = vperm.xlu0 %3491, %v1037_v6  }
  0x53   : > { %810 = vmatpush1.bf16.msra.mxu0 %v3539_v30  ;;  %851 = vmatpush1.bf16.msra.mxu1 %v3540_v31 }
  0x54   : > { %811 = vmatprep.subr.bf16.mxu0 %v3541_v32  ;;  %852 = vmatprep.subr.bf16.mxu1 %v3543_v33 }
  0x57   : > { %812 = vmatpush2.bf16.msra.mxu0 %v3545_v34  ;;  %853 = vmatpush2.bf16.msra.mxu1 %v3546_v35 }
  0x58   : > { %813 = vmatprep.subr.bf16.mxu0 %v3547_v36  ;;  %854 = vmatprep.subr.bf16.mxu1 %v3549_v37 }
  0x5b   : > { %814 = vmatpush2.bf16.msra.mxu0 %v3551_v38  ;;  %855 = vmatpush2.bf16.msra.mxu1 %v3552_v39 }
  0x5c   : > { %815 = vmatprep.subr.bf16.mxu0 %v3553_v40  ;;  %856 = vmatprep.subr.bf16.mxu1 %v3555_v41 }
  0x5f   : > { %816 = vmatpush2.bf16.msra.mxu0 %v3557_v42  ;;  %857 = vmatpush2.bf16.msra.mxu1 %v3558_v43 }
  0x60   : > { %817 = vmatprep.subr.bf16.mxu0 %v3559_v44  ;;  %858 = vmatprep.subr.bf16.mxu1 %v3561_v45 }
  0x63   : > { %818 = vmatpush2.bf16.msra.mxu0 %v3563_v46  ;;  %859 = vmatpush2.bf16.msra.mxu1 %v3564_v47 }
  0x64   : > { %819 = vmatprep.subr.bf16.mxu0 %v3565_v49  ;;  %860 = vmatprep.subr.bf16.mxu1 %v3567_v50 }
  0x67   : > { %820 = vmatpush2.bf16.msra.mxu0 %v3569_v53  ;;  %861 = vmatpush2.bf16.msra.mxu1 %v3570_v54 }
  0x68   : > { %821 = vmatprep.subr.bf16.mxu0 %v3571_v55  ;;  %862 = vmatprep.subr.bf16.mxu1 %v3573_v56 }
  0x6b   : > { %822 = vmatpush2.bf16.msra.mxu0 %v3575_v57  ;;  %863 = vmatpush2.bf16.msra.mxu1 %v3576_v58 }
  0x6c   : > { %823 = vmatprep.subr.bf16.mxu0 %v3577_v59  ;;  %864 = vmatprep.subr.bf16.mxu1 %v3579_v60 }
  0x6f   : > { %824 = vmatpush2.bf16.msra.mxu0 %v3581_v61  ;;  %865 = vmatpush2.bf16.msra.mxu1 %v3582_v62 }
  0x70   : > { %825 = vmatprep.subr.bf16.mxu0 %v3583_v63  ;;  %866 = vmatprep.subr.bf16.mxu1 %v3585_v0 }
  0x73   : > { %826 = vmatpush2.bf16.msra.mxu0 %v3587_v1  ;;  %867 = vmatpush2.bf16.msra.mxu1 %v3588_v2 }
  0x76   : > { %828 = vmatmul.mubr.bf16.vlgmr.msra.gmra.mxu0 %v409_v3  ;;  %869 = vmatmul.mubr.bf16.vlgmr.msra.gmra.mxu1 %v409_v3 }
  0x77   : > { %1019 = vmatprep.mubr.bf16.mxu0 %v3807_v4  ;;  %1084 = vmatprep.mubr.bf16.mxu1 %v3807_v4 }
 0x136   : > { %v3960_v7 = vpop.f32.mrf.mxu0  ;;  %v3962_v8 = vpop.f32.mrf.mxu1 }
 0x137   : > { %v3965_v9 = vand.u32 2147483647, %v3960_v7  ;;  %v3968_v10 = vand.u32 2147483647, %v3962_v8  ;;  %v877_v35 = vmul.f32 %v3960_v7, %v3960_v7  ;;  %v879_v36 = vmul.f32 %v3962_v8, %v3962_v8 }
 0x138   : > { %v3970_v11 = vpop.f32.mrf.mxu0  ;;  %v3972_v12 = vpop.f32.mrf.mxu1  ;;  %vm947_vm3 = vcmp.lt.f32.partialorder %v3960_v7, 0.0  ;;  %vm953_vm6 = vcmp.lt.f32.partialorder %v3962_v8, 0.0 }
 0x139   : > { %v3975_v13 = vand.u32 2147483647, %v3970_v11  ;;  %v901_v14 = vmax.f32 %v3965_v9, %v3968_v10  ;;  %v3980_v17 = vand.u32 2147483647, %v3972_v12  ;;  %v903_v23 = vmin.f32 %v3965_v9, %v3968_v10 }
 0x13a   : > { %v833_v15 = vpop.f32.mrf.mxu0  ;;  %v874_v16 = vpop.f32.mrf.mxu1  ;;  %v878_v41 = vmul.f32 %v3970_v11, %v3970_v11  ;;  %v880_v42 = vmul.f32 %v3972_v12, %v3972_v12  ;;  %v881_v43 = vadd.f32 %v879_v36, %v877_v35  ;;  %vm941_vm2 = vcmp.gt.f32.partialorder %v3968_v10, %v3965_v9 }
 0x13b   : > { %vm905_vm0 = vcmp.gt.f32.partialorder %v901_v14, 0.0  ;;  %v902_v21 = vmax.f32 %v3975_v13, %v3980_v17  ;;  %v904_v26 = vmin.f32 %v3975_v13, %v3980_v17  ;;  %vm942_vm4 = vcmp.gt.f32.partialorder %v3980_v17, %v3975_v13 }
 0x13c   : > { %v834_v18 = vpop.f32.mrf.mxu0  ;;  %v875_v19 = vpop.f32.mrf.mxu1  ;;  %v907_v20 = vsel %vm905_vm0, %v901_v14, 1.0  ;;  %v882_v48 = vadd.f32 %v880_v42, %v878_v41  ;;  %vm885_vm5 = vcmp.eq.f32.partialorder %v881_v43, inf  ;;  %vm948_vm7 = vcmp.lt.f32.partialorder %v3970_v11, 0.0 }
 0x13d   : > { %3686 = vrcp.f32 %v907_v20  ;;  %vm906_vm1 = vcmp.gt.f32.partialorder %v902_v21, 0.0  ;;  %vm887_vm10 = vcmp.eq.f32.partialorder %v881_v43, 0.0  ;;  %vm954_vm11 = vcmp.lt.f32.partialorder %v3972_v12, 0.0  ;;  %v968_v12 = vld [vmem:[%s4100_s2] sm:$0xf] }
 0x13e   : > { %v908_v22 = vsel %vm906_vm1, %v902_v21, 1.0  ;;  %v888_v21 = vand.u32 2147483648, %v881_v43  ;;  %vm892_vm9 = vcmp.eq.f32.partialorder %v882_v48, inf  ;;  %vm894_vm12 = vcmp.eq.f32.partialorder %v882_v48, 0.0 }
 0x13f   : > { %3688 = vrcp.f32 %v908_v22 }
 0x140   : > { %3690 = vrsqrt.f32 %v881_v43 }
 0x141   : > { %3692 = vrsqrt.f32 %v882_v48 }
 0x14a   : > { %v3687_v24 = vpop.eup %3686 }
 0x14b   : > { %v911_v25 = vmul.f32 %v3687_v24, %v903_v23  ;;  %v895_v24 = vand.u32 2147483648, %v882_v48 }
 0x14c   : > { %v3689_v27 = vpop.eup %3688 }
 0x14d   : > { %v913_v28 = vmul.f32 %v911_v25, %v911_v25  ;;  %v912_v29 = vmul.f32 %v3689_v27, %v904_v26  ;;  %v3691_v62 = vpop.eup %3690 }
 0x14e   : > { %v3693_v2 = vpop.eup %3692  ;;  %v884_v6 = vmul.f32 %v3691_v62, %v881_v43  ;;  %v3619_v62 = vld [vmem:[#allocation4 + $0x6c] ss:$16 sps:$4 sm:$0xff]  }
 0x14f   : > { %v915_v30 = vmul.f32 0.008405532, %v913_v28  ;;  %v914_v31 = vmul.f32 %v912_v29, %v912_v29  ;;  %v891_v19 = vmul.f32 %v3693_v2, %v882_v48  ;;  %v3625_v2 = vld [vmem:[#allocation4 + $0x4c] ss:$16 sps:$4 sm:$0xff]  }
 0x150   : > { %v886_v9 = vsel %vm885_vm5, %v881_v43, %v884_v6  ;;  %v3628_v6 = vld [vmem:[#allocation4 + $0x24] ss:$16 sps:$4 sm:$0xff]  }
 0x151   : > { %v917_v32 = vadd.f32 -0.03852766, %v915_v30  ;;  %v916_v33 = vmul.f32 0.008405532, %v914_v31  ;;  %v893_v13 = vsel %vm892_vm9, %v882_v48, %v891_v19  ;;  %v889_v17 = vsel %vm887_vm10, %v888_v21, %v886_v9  ;;  %v975_v30 = vpop.permute.xlu0 %974  ;;  %v3593_v48 = vld [vmem:[#allocation4 + $0xe8] ss:$16 sps:$4 sm:$0xff]  }
 0x152   : > { %v896_v11 = vsel %vm894_vm12, %v895_v24, %v893_v13  ;;  %v3637_v19 = vld [vmem:[#allocation4 + $0xc] ss:$16 sps:$4 sm:$0xff]   ;;  %v3632_v9 = vld [vmem:[#allocation4] ss:$16 sps:$4 sm:$0xff]   ;;  %v3646_v13 = vld [vmem:[#allocation4 + $0x1c4] ss:$16 sps:$4 sm:$0xff]  }
 0x153   : > { %v919_v34 = vmul.f32 %v917_v32, %v913_v28  ;;  %v918_v37 = vadd.f32 -0.03852766, %v916_v33  ;;  %v3643_v21 = vld [vmem:[#allocation4 + $0x1ec] ss:$16 sps:$4 sm:$0xff]   ;;  %v3647_v24 = vld [vmem:[#allocation4 + $0x1c8] ss:$16 sps:$4 sm:$0xff]  }
 0x155   : > { %v921_v38 = vadd.f32 0.08544537, %v919_v34  ;;  %v920_v39 = vmul.f32 %v918_v37, %v914_v31 }
 0x157   : > { %v923_v40 = vmul.f32 %v921_v38, %v913_v28  ;;  %v922_v44 = vadd.f32 0.08544537, %v920_v39 }
 0x159   : > { %v925_v45 = vadd.f32 -0.13561851, %v923_v40  ;;  %v924_v46 = vmul.f32 %v922_v44, %v914_v31  ;;  %v1034_v44 = vld [vmem:[%s4102_s4] sm:$0xf] }
 0x15b   : > { %v927_v47 = vmul.f32 %v925_v45, %v913_v28  ;;  %v926_v49 = vadd.f32 -0.13561851, %v924_v46  ;;  %v3592_v45 = vld [vmem:[#allocation4 + $0xe4] ss:$16 sps:$4 sm:$0xff]   ;;  %v3595_v46 = vld [vmem:[#allocation4 + $0xec] ss:$16 sps:$4 sm:$0xff]  }
 0x15d   : > { %v929_v50 = vadd.f32 0.19897287, %v927_v47  ;;  %v928_v51 = vmul.f32 %v926_v49, %v914_v31  ;;  %v3590_v47 = vld [vmem:[#allocation4 + $0xe0] ss:$16 sps:$4 sm:$0xff]   ;;  %v3598_v49 = vld [vmem:[#allocation4 + $0xc4] ss:$16 sps:$4 sm:$0xff]  }
 0x15f   : > { %v931_v52 = vmul.f32 %v929_v50, %v913_v28  ;;  %v930_v53 = vadd.f32 0.19897287, %v928_v51  ;;  %v3601_v50 = vld [vmem:[#allocation4 + $0xcc] ss:$16 sps:$4 sm:$0xff]   ;;  %v3596_v51 = vld [vmem:[#allocation4 + $0xc0] ss:$16 sps:$4 sm:$0xff]  }
 0x161   : > { %v933_v54 = vadd.f32 -0.3332772, %v931_v52  ;;  %v932_v55 = vmul.f32 %v930_v53, %v914_v31  ;;  %v3599_v52 = vld [vmem:[#allocation4 + $0xc8] ss:$16 sps:$4 sm:$0xff]   ;;  %v3604_v53 = vld [vmem:[#allocation4 + $0xa4] ss:$16 sps:$4 sm:$0xff]  }
 0x163   : > { %v935_v56 = vmul.f32 %v933_v54, %v913_v28  ;;  %v934_v57 = vadd.f32 -0.3332772, %v932_v55  ;;  %v3607_v54 = vld [vmem:[#allocation4 + $0xac] ss:$16 sps:$4 sm:$0xff]   ;;  %v3602_v55 = vld [vmem:[#allocation4 + $0xa0] ss:$16 sps:$4 sm:$0xff]  }
 0x165   : > { %v937_v58 = vadd.f32 0.99999946, %v935_v56  ;;  %v936_v59 = vmul.f32 %v934_v57, %v914_v31  ;;  %v3605_v56 = vld [vmem:[#allocation4 + $0xa8] ss:$16 sps:$4 sm:$0xff]   ;;  %v3610_v57 = vld [vmem:[#allocation4 + $0x84] ss:$16 sps:$4 sm:$0xff]  }
 0x167   : > { %v939_v60 = vmul.f32 %v937_v58, %v911_v25  ;;  %v938_v61 = vadd.f32 0.99999946, %v936_v59  ;;  %v3613_v58 = vld [vmem:[#allocation4 + $0x8c] ss:$16 sps:$4 sm:$0xff]   ;;  %v3608_v59 = vld [vmem:[#allocation4 + $0x80] ss:$16 sps:$4 sm:$0xff]  }
 0x169   : > { %v943_v63 = vsub.f32 1.5707964, %v939_v60  ;;  %v940_v0 = vmul.f32 %v938_v61, %v912_v29  ;;  %v3616_v61 = vld [vmem:[#allocation4 + $0x64] ss:$16 sps:$4 sm:$0xff]  }
 0x16b   : > { %v945_v1 = vsel %vm941_vm2, %v943_v63, %v939_v60  ;;  %v944_v5 = vsub.f32 1.5707964, %v940_v0  ;;  %v3611_v60 = vld [vmem:[#allocation4 + $0x88] ss:$16 sps:$4 sm:$0xff]   ;;  %v3614_v63 = vld [vmem:[#allocation4 + $0x60] ss:$16 sps:$4 sm:$0xff]  }
 0x16c   : > { %v949_v3 = vsub.f32 3.1415927, %v945_v1 }
 0x16d   : > { %v946_v15 = vsel %vm942_vm4, %v944_v5, %v940_v0  ;;  %v3617_v0 = vld [vmem:[#allocation4 + $0x68] ss:$16 sps:$4 sm:$0xff]  }
 0x16e   : > { %v951_v14 = vsel %vm947_vm3, %v949_v3, %v945_v1  ;;  %v950_v18 = vsub.f32 3.1415927, %v946_v15  ;;  %v3622_v1 = vld [vmem:[#allocation4 + $0x44] ss:$16 sps:$4 sm:$0xff]   ;;  %v3620_v3 = vld [vmem:[#allocation4 + $0x40] ss:$16 sps:$4 sm:$0xff]  }
 0x16f   : > { %v955_v16 = vsub.f32 0.0, %v951_v14  ;;  %v3623_v5 = vld [vmem:[#allocation4 + $0x48] ss:$16 sps:$4 sm:$0xff]  }
 0x170   : > { %v952_v20 = vsel %vm948_vm7, %v950_v18, %v946_v15  ;;  %v3626_v15 = vld [vmem:[#allocation4 + $0x20] ss:$16 sps:$4 sm:$0xff]   ;;  %v3634_v18 = vld [vmem:[#allocation4 + $0x4] ss:$16 sps:$4 sm:$0xff]  }
 0x171   : > { %v957_v10 = vsel %vm953_vm6, %v955_v16, %v951_v14  ;;  %v956_v7 = vsub.f32 0.0, %v952_v20  ;;  %v3631_v14 = vld [vmem:[#allocation4 + $0x2c] ss:$16 sps:$4 sm:$0xff]   ;;  %v3629_v16 = vld [vmem:[#allocation4 + $0x28] ss:$16 sps:$4 sm:$0xff]  }
 0x172   : > { %v961_v22 = vrot.slane %v957_v10, 4  ;;  %v3635_v10 = vld [vmem:[#allocation4 + $0x8] ss:$16 sps:$4 sm:$0xff]  }
 0x173   : > { %v958_v23 = vsel %vm954_vm11, %v956_v7, %v952_v20  ;;  %v3640_v20 = vld [vmem:[#allocation4 + $0x1e4] ss:$16 sps:$4 sm:$0xff]   ;;  %v3641_v7 = vld [vmem:[#allocation4 + $0x1e8] ss:$16 sps:$4 sm:$0xff]  }
 0x174   : > { %v966_v25 = vsel %vm965_vm8, %v889_v17, %v961_v22  ;;  %v962_v8 = vrot.slane %v958_v23, 4  ;;  %v3638_v22 = vld [vmem:[#allocation4 + $0x1e0] ss:$16 sps:$4 sm:$0xff]   ;;  %v3649_v17 = vld [vmem:[#allocation4 + $0x1cc] ss:$16 sps:$4 sm:$0xff]  }
 0x175   : > { %v969_v26 = vpack.c.bf16 %v966_v25, %v966_v25  ;;  %v3644_v23 = vld [vmem:[#allocation4 + $0x1c0] ss:$16 sps:$4 sm:$0xff]   ;;  %v3652_v25 = vld [vmem:[#allocation4 + $0x1a4] ss:$16 sps:$4 sm:$0xff]  }
 0x176   : > { %v967_v27 = vsel %vm965_vm8, %v896_v11, %v962_v8  ;;  %v3655_v8 = vld [vmem:[#allocation4 + $0x1ac] ss:$16 sps:$4 sm:$0xff]   ;;  %v3650_v11 = vld [vmem:[#allocation4 + $0x1a0] ss:$16 sps:$4 sm:$0xff]  }
 0x177   : > { %v970_v28 = vpack.c.bf16 %v967_v27, %v967_v27  ;;  %v982_v29 = vsel %vm965_vm8, %v969_v26, 0  ;;  %v3653_v26 = vld [vmem:[#allocation4 + $0x1a8] ss:$16 sps:$4 sm:$0xff]   ;;  %v3658_v27 = vld [vmem:[#allocation4 + $0x184] ss:$16 sps:$4 sm:$0xff]  }
 0x179   : > { %3215 = vmatprep.subr.msk.bf16.mxu0 %vm965_vm8, %v970_v28  ;;  %v3661_v28 = vld [vmem:[#allocation4 + $0x18c] ss:$16 sps:$4 sm:$0xff]  }
 0x17a   : > { %1002 = vmatpush1.bf16.msra.mxu0 %v982_v29  ;;  %v3656_v29 = vld [vmem:[#allocation4 + $0x180] ss:$16 sps:$4 sm:$0xff]  }
 0x17b   : > { %1917 = vmatprep.subr.bf16.mxu0 %v3592_v45  ;;  %v3683_v45 = vld [vmem:[#allocation4 + $0x108] ss:$16 sps:$4 sm:$0xff]  }
 0x17d   : > { %3216 = vmatmul.mubr.msk.bf16.vlgmr.msra.gmra.mxu0 %vm977_vm13, %v968_v12  ;;  %v3659_v12 = vld [vmem:[#allocation4 + $0x188] ss:$16 sps:$4 sm:$0xff]  }
 0x17e   : > { %1918 = vmatpush1.bf16.msra.mxu0 %v3590_v47 }
 0x17f   : > { %1919 = vmatprep.subr.bf16.mxu0 %v3598_v49 }
 0x182   : > { %1920 = vmatpush1.bf16.msra.mxu0 %v3596_v51 }
 0x183   : > { %1921 = vmatprep.subr.bf16.mxu0 %v3604_v53 }
 0x186   : > { %1922 = vmatpush1.bf16.msra.mxu0 %v3602_v55 }
 0x187   : > { %1923 = vmatprep.subr.bf16.mxu0 %v3610_v57 }
 0x18a   : > { %1924 = vmatpush1.bf16.msra.mxu0 %v3608_v59 }
 0x18b   : > { %1925 = vmatprep.subr.bf16.mxu0 %v3616_v61 }
 0x18e   : > { %1926 = vmatpush1.bf16.msra.mxu0 %v3614_v63 }
 0x18f   : > { %1927 = vmatprep.subr.bf16.mxu0 %v3622_v1 }
 0x192   : > { %1928 = vmatpush1.bf16.msra.mxu0 %v3620_v3 }
 0x193   : > { %1929 = vmatprep.subr.bf16.mxu0 %v3628_v6 }
 0x196   : > { %1930 = vmatpush1.bf16.msra.mxu0 %v3626_v15 }
 0x197   : > { %1931 = vmatprep.subr.bf16.mxu0 %v3634_v18  ;;  %v3808_v18 = vmov 683565275  }
 0x19a   : > { %1932 = vmatpush1.bf16.msra.mxu0 %v3632_v9  ;;  %v3809_v9 = vmov 2475754826  }
 0x19b   : > { %1933 = vmatprep.subr.bf16.mxu0 %v3640_v20  ;;  %v3810_v20 = vmov 2131351028  }
 0x19e   : > { %1934 = vmatpush2.bf16.msra.mxu0 %v3638_v22  ;;  %v3811_v22 = vmov 2102212464  }
 0x19f   : > { %1935 = vmatprep.subr.bf16.mxu0 %v3646_v13 }
 0x1a2   : > { %1936 = vmatpush2.bf16.msra.mxu0 %v3644_v23 }
 0x1a3   : > { %1937 = vmatprep.subr.bf16.mxu0 %v3652_v25 }
 0x1a6   : > { %1938 = vmatpush2.bf16.msra.mxu0 %v3650_v11 }
 0x1a7   : > { %1939 = vmatprep.subr.bf16.mxu0 %v3658_v27 }
 0x1aa   : > { %1940 = vmatpush2.bf16.msra.mxu0 %v3656_v29 }
 0x23d   : > { %v1021_v31 = vpop.f32.mrf.mxu0 }
 0x23e   : > { %v1022_v32 = vadd.f32 %v1021_v31, %v975_v30  ;;  %v3667_v31 = vld [vmem:[#allocation4 + $0x16c] ss:$16 sps:$4 sm:$0xff]  }
 0x23f   : > { %v1023_v33 = vpop.f32.mrf.mxu0 }
 0x240   : > { %vm1028_vm14 = vcmp.gt.f32.partialorder %v1022_v32, 0.0  ;;  %v1030_v34 = vmul.f32 0.1, %v1022_v32  ;;  %v1024_v35 = vadd.f32 %v1023_v33, %v975_v30  ;;  %v3664_v30 = vld [vmem:[#allocation4 + $0x164] ss:$16 sps:$4 sm:$0xff]  }
 0x241   : > { %v1025_v36 = vpop.f32.mrf.mxu0  ;;  %v3665_v33 = vld [vmem:[#allocation4 + $0x168] ss:$16 sps:$4 sm:$0xff]   ;;  %1941 = vmatprep.subr.bf16.mxu0 %v3664_v30 }
 0x242   : > { %v1032_v37 = vsel %vm1028_vm14, %v1022_v32, %v1030_v34  ;;  %vm1029_vm15 = vcmp.gt.f32.partialorder %v1024_v35, 0.0  ;;  %v1031_v38 = vmul.f32 0.1, %v1024_v35  ;;  %v3662_v32 = vld [vmem:[#allocation4 + $0x160] ss:$16 sps:$4 sm:$0xff]  }
 0x243   : > { %v1035_v39 = vpack.c.bf16 %v1032_v37, %v1032_v37  ;;  %v1026_v40 = vpop.f32.mrf.mxu0  ;;  %v3670_v34 = vld [vmem:[#allocation4 + $0x144] ss:$16 sps:$4 sm:$0xff]   ;;  %1942 = vmatpush2.bf16.msra.mxu0 %v3662_v32  ;;  %v3668_v36 = vld [vmem:[#allocation4 + $0x140] ss:$16 sps:$4 sm:$0xff]   ;;  %v3671_v37 = vld [vmem:[#allocation4 + $0x148] ss:$16 sps:$4 sm:$0xff]  }
 0x244   : > { %v1033_v41 = vsel %vm1029_vm15, %v1024_v35, %v1031_v38  ;;  %v3673_v35 = vld [vmem:[#allocation4 + $0x14c] ss:$16 sps:$4 sm:$0xff]   ;;  %1943 = vmatprep.subr.bf16.mxu0 %v3670_v34  ;;  %v3676_v38 = vld [vmem:[#allocation4 + $0x124] ss:$16 sps:$4 sm:$0xff]   ;;  %v3674_v40 = vld [vmem:[#allocation4 + $0x120] ss:$16 sps:$4 sm:$0xff]  }
 0x245   : > { %v1036_v42 = vpack.c.bf16 %v1033_v41, %v1033_v41  ;;  %v1047_v43 = vsel %vm965_vm8, %v1035_v39, 0  ;;  %v3679_v39 = vld [vmem:[#allocation4 + $0x12c] ss:$16 sps:$4 sm:$0xff]   ;;  %v3677_v41 = vld [vmem:[#allocation4 + $0x128] ss:$16 sps:$4 sm:$0xff]  }
 0x247   : > { %3217 = vmatprep.subr.msk.bf16.mxu1 %vm965_vm8, %v1036_v42  ;;  %1944 = vmatpush2.bf16.msra.mxu0 %v3668_v36  ;;  %v3682_v42 = vld [vmem:[#allocation4 + $0x104] ss:$16 sps:$4 sm:$0xff]  }
 0x248   : > { %1067 = vmatpush1.bf16.msra.mxu1 %v1047_v43  ;;  %1945 = vmatprep.subr.bf16.mxu0 %v3676_v38  ;;  %v3685_v43 = vld [vmem:[#allocation4 + $0x10c] ss:$16 sps:$4 sm:$0xff]  }
 0x249   : > { %1958 = vmatprep.subr.bf16.mxu1 %v3595_v46  ;;  %v1041_v46 = vpop.permute.xlu0 %1040 }
 0x24b   : > { %3218 = vmatmul.mubr.msk.bf16.vlgmr.msra.gmra.mxu1 %vm977_vm13, %v1034_v44  ;;  %1946 = vmatpush2.bf16.msra.mxu0 %v3674_v40  ;;  %v3680_v44 = vld [vmem:[#allocation4 + $0x100] ss:$16 sps:$4 sm:$0xff]  }
 0x24c   : > { %1959 = vmatpush1.bf16.msra.mxu1 %v3593_v48  ;;  %1947 = vmatprep.subr.bf16.mxu0 %v3682_v42 }
 0x24d   : > { %1960 = vmatprep.subr.bf16.mxu1 %v3601_v50 }
 0x24f   : > { %1948 = vmatpush2.bf16.msra.mxu0 %v3680_v44 }
 0x250   : > { %1961 = vmatpush1.bf16.msra.mxu1 %v3599_v52 }
 0x251   : > { %1962 = vmatprep.subr.bf16.mxu1 %v3607_v54 }
 0x254   : > { %1963 = vmatpush1.bf16.msra.mxu1 %v3605_v56 }
 0x255   : > { %1964 = vmatprep.subr.bf16.mxu1 %v3613_v58 }
 0x258   : > { %1965 = vmatpush1.bf16.msra.mxu1 %v3611_v60 }
 0x259   : > { %1966 = vmatprep.subr.bf16.mxu1 %v3619_v62 }
 0x25c   : > { %1967 = vmatpush1.bf16.msra.mxu1 %v3617_v0 }
 0x25d   : > { %1968 = vmatprep.subr.bf16.mxu1 %v3625_v2 }
 0x260   : > { %1969 = vmatpush1.bf16.msra.mxu1 %v3623_v5 }
 0x261   : > { %1970 = vmatprep.subr.bf16.mxu1 %v3631_v14 }
 0x264   : > { %1971 = vmatpush1.bf16.msra.mxu1 %v3629_v16 }
 0x265   : > { %1972 = vmatprep.subr.bf16.mxu1 %v3637_v19 }
 0x268   : > { %1973 = vmatpush1.bf16.msra.mxu1 %v3635_v10 }
 0x269   : > { %1974 = vmatprep.subr.bf16.mxu1 %v3643_v21 }
 0x26c   : > { %1975 = vmatpush2.bf16.msra.mxu1 %v3641_v7 }
 0x26d   : > { %1976 = vmatprep.subr.bf16.mxu1 %v3649_v17 }
 0x270   : > { %1977 = vmatpush2.bf16.msra.mxu1 %v3647_v24  ;;  %v3812_v24 = vmov 920167782  }
 0x271   : > { %1978 = vmatprep.subr.bf16.mxu1 %v3655_v8 }
 0x274   : > { %1979 = vmatpush2.bf16.msra.mxu1 %v3653_v26  ;;  %v3813_v26 = vmov 1326507024  }
 0x275   : > { %1980 = vmatprep.subr.bf16.mxu1 %v3661_v28 }
 0x278   : > { %1981 = vmatpush2.bf16.msra.mxu1 %v3659_v12 }
 0x279   : > { %1982 = vmatprep.subr.bf16.mxu1 %v3667_v31 }
 0x27c   : > { %1983 = vmatpush2.bf16.msra.mxu1 %v3665_v33 }
 0x27d   : > { %1984 = vmatprep.subr.bf16.mxu1 %v3673_v35 }
 0x280   : > { %1985 = vmatpush2.bf16.msra.mxu1 %v3671_v37 }
 0x281   : > { %1986 = vmatprep.subr.bf16.mxu1 %v3679_v39 }
 0x284   : > { %1987 = vmatpush2.bf16.msra.mxu1 %v3677_v41 }
 0x285   : > { %1988 = vmatprep.subr.bf16.mxu1 %v3685_v43 }
 0x288   : > { %1989 = vmatpush2.bf16.msra.mxu1 %v3683_v45 }
 0x30b   : > { %v1086_v47 = vpop.f32.mrf.mxu1 }
 0x30c   : > { %v4018_v48 = vadd.f32 %v1086_v47, %v1041_v46 }
 0x30d   : > { %v1088_v49 = vpop.f32.mrf.mxu1 }
 0x30e   : > { %v1093_v50 = vand.u32 2147483647, %v4018_v48  ;;  %v1096_v51 = vand.u32 2139095040, %v4018_v48  ;;  %v4022_v52 = vadd.f32 %v1088_v49, %v1041_v46  ;;  %vm1095_vm15 = vcmp.lt.s32.totalorder %v4018_v48, 0 }
 0x30f   : > { %v1090_v53 = vpop.f32.mrf.mxu1 }
 0x310   : > { %v1097_v54 = vshrl.u32 %v1096_v51, 23  ;;  %v1199_v55 = vand.u32 2139095040, %v4022_v52  ;;  %v1100_v58 = vand.u32 8388607, %v1093_v50  ;;  %v1196_v60 = vand.u32 2147483647, %v4022_v52 }
 0x311   : > { %v1091_v56 = vpop.f32.mrf.mxu1 }
 0x312   : > { %v3219_v57 = vadd.s32 4294967169, %v1097_v54  ;;  %v1200_v59 = vshrl.u32 %v1199_v55, 23  ;;  %v1101_v63 = vor.u32 8388608, %v1100_v58  ;;  %v1203_v1 = vand.u32 8388607, %v1196_v60 }
 0x314   : > { %v1103_v61 = vadd.s32 1, %v3219_v57  ;;  %v3223_v62 = vadd.s32 4294967169, %v1200_v59  ;;  %v4030_v14 = vshll.u32 %v1101_v63, 8  ;;  %v1204_v16 = vor.u32 8388608, %v1203_v1 }
 0x316   : > { %vm1104_vm0 = vcmp.gt.s32.totalorder %v1103_v61, 0  ;;  %v1206_v0 = vadd.s32 1, %v3223_v62  ;;  %v1244_v43 = vshll.u32 %v1204_v16, 8 }
 0x317   : > { %v1105_v2 = vsel %vm1104_vm0, %v1103_v61, 0  ;;  %vm1094_vm0 = vcmp.le.f32.partialorder %v1093_v50, 0.7853982 }
 0x318   : > { %v1107_v3 = vand.u32 31, %v1105_v2  ;;  %vm1207_vm1 = vcmp.gt.s32.totalorder %v1206_v0, 0  ;;  %v1106_v5 = vshrl.u32 %v1105_v2, 5 }
 0x319   : > { %v1208_v15 = vsel %vm1207_vm1, %v1206_v0, 0  ;;  %vm1198_vm1 = vcmp.lt.s32.totalorder %v4022_v52, 0 }
 0x31a   : > { %v1108_v6 = vsub.s32 32, %v1107_v3  ;;  %v1110_v19 = vshll.u32 %v3808_v18, %v1107_v3  ;;  %v1113_v10 = vshll.u32 %v3809_v9, %v1107_v3  ;;  %v1116_v21 = vshll.u32 %v3810_v20, %v1107_v3 }
 0x31b   : > { %v1119_v7 = vshll.u32 %v3811_v22, %v1107_v3  ;;  %v1122_v25 = vshll.u32 %v3812_v24, %v1107_v3  ;;  %vm1125_vm2 = vcmp.lt.s32.totalorder %v1106_v5, 1  ;;  %vm1127_vm3 = vcmp.lt.s32.totalorder %v1106_v5, 3 }
 0x31c   : > { %v1111_v13 = vshrl.u32 %v3809_v9, %v1108_v6  ;;  %v1114_v17 = vshrl.u32 %v3810_v20, %v1108_v6  ;;  %v1117_v23 = vshrl.u32 %v3811_v22, %v1108_v6  ;;  %v1109_v8 = vshrl.u32 %v3808_v18, %v1108_v6 }
 0x31d   : > { %v1120_v11 = vshrl.u32 %v3812_v24, %v1108_v6  ;;  %v1123_v27 = vshrl.u32 %v3813_v26, %v1108_v6  ;;  %vm1128_vm4 = vcmp.lt.s32.totalorder %v1106_v5, 4  ;;  %v1210_v32 = vand.u32 31, %v1208_v15 }
 0x31e   : > { %v1112_v28 = vor.u32 %v1111_v13, %v1110_v19  ;;  %v1115_v29 = vor.u32 %v1114_v17, %v1113_v10  ;;  %v1118_v12 = vor.u32 %v1117_v23, %v1116_v21  ;;  %vm1126_vm5 = vcmp.lt.s32.totalorder %v1106_v5, 2 }
 0x31f   : > { %v1121_v30 = vor.u32 %v1120_v11, %v1119_v7  ;;  %v1124_v31 = vor.u32 %v1123_v27, %v1122_v25  ;;  %v1211_v40 = vsub.s32 32, %v1210_v32  ;;  %v1209_v47 = vshrl.u32 %v1208_v15, 5 }
 0x320   : > { %v1129_v33 = vsel %vm1125_vm2, %v1109_v8, %v1112_v28  ;;  %v1130_v34 = vsel %vm1128_vm4, %v1118_v12, 2102212464  ;;  %v1133_v35 = vsel %vm1125_vm2, %v1112_v28, %v1115_v29  ;;  %v1137_v36 = vsel %vm1125_vm2, %v1115_v29, %v1118_v12 }
 0x321   : > { %v1131_v37 = vsel %vm1127_vm3, %v1115_v29, %v1130_v34  ;;  %v1134_v38 = vsel %vm1128_vm4, %v1121_v30, 920167782  ;;  %v1138_v39 = vsel %vm1128_vm4, %v1124_v31, 1326507024  ;;  %v1213_v55 = vshll.u32 %v3808_v18, %v1210_v32 }
 0x322   : > { %v1135_v41 = vsel %vm1127_vm3, %v1118_v12, %v1134_v38  ;;  %v1139_v42 = vsel %vm1127_vm3, %v1121_v30, %v1138_v39  ;;  %v1132_v44 = vsel %vm1126_vm5, %v1129_v33, %v1131_v37  ;;  %v1214_v56 = vshrl.u32 %v3809_v9, %v1211_v40 }
 0x323   : > { %v1136_v45 = vsel %vm1126_vm5, %v1133_v35, %v1135_v41  ;;  %v1140_v46 = vsel %vm1126_vm5, %v1137_v36, %v1139_v42  ;;  %v1216_v57 = vshll.u32 %v3809_v9, %v1210_v32  ;;  %v1217_v58 = vshrl.u32 %v3810_v20, %v1211_v40 }
 0x324   : > { %v4033_v49 = vmul.u32.u64.low %v4030_v14, %v1140_v46  ;;  %v4034_v51 = vmul.u32.u64.high %v4030_v14, %v1140_v46, %v4033_v49  ;;  %v4037_v53 = vmul.u32.u64.low %v4030_v14, %v1136_v45  ;;  %v4038_v54 = vmul.u32.u64.high %v4030_v14, %v1136_v45, %v4037_v53 }
 0x325   : > { %v1219_v59 = vshll.u32 %v3810_v20, %v1210_v32  ;;  %v1220_v61 = vshrl.u32 %v3811_v22, %v1211_v40  ;;  %v1222_v62 = vshll.u32 %v3811_v22, %v1210_v32  ;;  %v1223_v63 = vshrl.u32 %v3812_v24, %v1211_v40 }
 0x326   : > { %v1215_v0 = vor.u32 %v1214_v56, %v1213_v55  ;;  %v1218_v1 = vor.u32 %v1217_v58, %v1216_v57  ;;  %v1225_v2 = vshll.u32 %v3812_v24, %v1210_v32  ;;  %v1226_v3 = vshrl.u32 %v3813_v26, %v1211_v40 }
 0x327   : > { %v1148_v5 = vmul.u32 %v4030_v14, %v1132_v44  ;;  %vm1150_vm6 = vc.u32 %v4034_v51, %v4037_v53  ;;  %v1151_v6 = vadd.s32 1, %v4038_v54  ;;  %v1221_v15 = vor.u32 %v1220_v61, %v1219_v59 }
 0x328   : > { %v1212_v16 = vshrl.u32 %v3808_v18, %v1211_v40  ;;  %v1224_v19 = vor.u32 %v1223_v63, %v1222_v62  ;;  %v1227_v9 = vor.u32 %v1226_v3, %v1225_v2  ;;  %vm1228_vm7 = vcmp.lt.s32.totalorder %v1209_v47, 1 }
 0x329   : > { %v1152_v10 = vsel %vm1150_vm6, %v1151_v6, %v4038_v54  ;;  %vm1230_vm9 = vcmp.lt.s32.totalorder %v1209_v47, 3  ;;  %vm1231_vm10 = vcmp.lt.s32.totalorder %v1209_v47, 4  ;;  %v1236_v20 = vsel %vm1228_vm7, %v1215_v0, %v1218_v1 }
 0x32a   : > { %v1153_v21 = vadd.s32 %v1152_v10, %v1148_v5  ;;  %v1233_v22 = vsel %vm1231_vm10, %v1221_v15, 2102212464  ;;  %v1237_v7 = vsel %vm1231_vm10, %v1224_v19, 920167782  ;;  %v1240_v13 = vsel %vm1228_vm7, %v1218_v1, %v1221_v15 }
 0x32b   : > { %vm1229_vm11 = vcmp.lt.s32.totalorder %v1209_v47, 2  ;;  %v1232_v14 = vsel %vm1228_vm7, %v1212_v16, %v1215_v0  ;;  %v1238_v17 = vsel %vm1230_vm9, %v1221_v15, %v1237_v7  ;;  %v1241_v23 = vsel %vm1231_vm10, %v1227_v9, 1326507024 }
 0x32c   : > { %v1154_v24 = vadd.s32 536870912, %v1153_v21  ;;  %v1234_v25 = vsel %vm1230_vm9, %v1218_v1, %v1233_v22  ;;  %v1239_v8 = vsel %vm1229_vm11, %v1236_v20, %v1238_v17  ;;  %v1242_v18 = vsel %vm1230_vm9, %v1224_v19, %v1241_v23 }
 0x32d   : > { %v1243_v11 = vsel %vm1229_vm11, %v1240_v13, %v1242_v18  ;;  %v4046_v26 = vmul.u32.u64.low %v1244_v43, %v1239_v8  ;;  %v4047_v27 = vmul.u32.u64.high %v1244_v43, %v1239_v8, %v4046_v26  ;;  %v1235_v30 = vsel %vm1229_vm11, %v1232_v14, %v1234_v25 }
 0x32e   : > { %v1155_v28 = vshrl.u32 %v1154_v24, 30  ;;  %v4049_v29 = vmul.u32.u64.low %v1244_v43, %v1243_v11  ;;  %v4050_v12 = vmul.u32.u64.high %v1244_v43, %v1243_v11, %v4049_v29  ;;  %v1251_v34 = vmul.u32 %v1244_v43, %v1235_v30 }
 0x32f   : > { %v1254_v32 = vadd.s32 1, %v4047_v27  ;;  %v1149_v47 = vadd.s32 %v4037_v53, %v4034_v51  ;;  %vm1197_vm2 = vcmp.le.f32.partialorder %v1196_v60, 0.7853982  ;;  %vm1185_vm6 = vweird.f32 %v4018_v48 }
 0x330   : > { %v1156_v31 = vshll.u32 %v1155_v28, 30  ;;  %vm1253_vm12 = vc.u32 %v4050_v12, %v4046_v26  ;;  %v1252_v6 = vadd.s32 %v4046_v26, %v4050_v12  ;;  %v1179_v10 = vsub.s32 4, %v1155_v28 }
 0x331   : > { %v1255_v35 = vsel %vm1253_vm12, %v1254_v32, %v4047_v27 }
 0x332   : > { %v1157_v33 = vsub.s32 %v1153_v21, %v1156_v31  ;;  %v1256_v37 = vadd.s32 %v1255_v35, %v1251_v34  ;;  %v1180_v14 = vsel %vm1095_vm15, %v1179_v10, %v1155_v28  ;;  %v2038_v10 = vld [vmem:[%s4106_s8] sm:$0xf] }
 0x333   : > { %v1182_v25 = vsel %vm1094_vm0, 0, %v1180_v14  ;;  %2041 = vperm.xlu1 %3492, %v2038_v10  }
 0x334   : > { %v1159_v36 = vsub.s32 0, %v1157_v33  ;;  %v1257_v39 = vadd.s32 536870912, %v1256_v37  ;;  %v1400_v11 = vadd.s32 3, %v1182_v25  ;;  %v1186_v32 = vand.u32 3, %v1182_v25  ;;  %v2130_v25 = vld [vmem:[#allocation6 + $0x100] sm:$0xff] }
 0x336   : > { %v3220_v38 = vmin.u32 %v1159_v36, %v1157_v33  ;;  %v1258_v41 = vshrl.u32 %v1257_v39, 30  ;;  %v1401_v28 = vand.u32 3, %v1400_v11  ;;  %vm1188_vm7 = vcmp.eq.s32.totalorder %v1186_v32, 0 }
 0x337   : > { %vm1191_vm9 = vcmp.eq.s32.totalorder %v1186_v32, 2  ;;  %vm1187_vm10 = vcmp.lt.s32.totalorder %v1186_v32, 2  ;;  %v2106_v32 = vld [vmem:[#allocation6 + $0x40] sm:$0xff] }
 0x338   : > { %v1161_v40 = vclz %v3220_v38  ;;  %v1259_v44 = vshll.u32 %v1258_v41, 30  ;;  %v1282_v18 = vsub.s32 4, %v1258_v41  ;;  %vm1406_vm3 = vcmp.eq.s32.totalorder %v1401_v28, 2 }
 0x339   : > { %vm1403_vm4 = vcmp.eq.s32.totalorder %v1401_v28, 0  ;;  %vm1402_vm5 = vcmp.lt.s32.totalorder %v1401_v28, 2 }
 0x33a   : > { %v3221_v42 = vadd.s32 4294967294, %v1161_v40  ;;  %v1260_v45 = vsub.s32 %v1256_v37, %v1259_v44  ;;  %v1283_v27 = vsel %vm1198_vm1, %v1282_v18, %v1258_v41 }
 0x33b   : > { %v1285_v30 = vsel %vm1197_vm2, 0, %v1283_v27 }
 0x33c   : > { %vm3222_vm13 = vcmp.lt.s32.totalorder %v3221_v42, 0  ;;  %v1262_v54 = vsub.s32 0, %v1260_v45  ;;  %v1504_v35 = vadd.s32 3, %v1285_v30  ;;  %v1289_v37 = vand.u32 3, %v1285_v30 }
 0x33d   : > { %v1164_v46 = vsel %vm3222_vm13, 0, %v3221_v42 }
 0x33e   : > { %v1165_v49 = vsub.s32 32, %v1164_v46  ;;  %v1169_v43 = vsub.s32 4294967266, %v1164_v46  ;;  %v1166_v55 = vshll.u32 %v1157_v33, %v1164_v46  ;;  %v3224_v58 = vmin.u32 %v1262_v54, %v1260_v45 }
 0x33f   : > { %v1505_v41 = vand.u32 3, %v1504_v35  ;;  %vm1290_vm11 = vcmp.lt.s32.totalorder %v1289_v37, 2  ;;  %vm1291_vm12 = vcmp.eq.s32.totalorder %v1289_v37, 0  ;;  %vm1294_vm13 = vcmp.eq.s32.totalorder %v1289_v37, 2 }
 0x340   : > { %v1167_v56 = vshrl.u32 %v1149_v47, %v1165_v49  ;;  %v1170_v57 = vadd.s32 127, %v1169_v43  ;;  %v1264_v62 = vclz %v3224_v58 }
 0x342   : > { %v1168_v59 = vor.u32 %v1167_v56, %v1166_v55  ;;  %v1171_v61 = vshll.u32 %v1170_v57, 23  ;;  %v3225_v0 = vadd.s32 4294967294, %v1264_v62 }
 0x344   : > { %v1172_v63 = vor.u32 4788187, %v1171_v61  ;;  %v1175_v2 = vcvt.s32.f32 %v1168_v59  ;;  %vm3226_vm14 = vcmp.lt.s32.totalorder %v3225_v0, 0 }
 0x345   : > { %v1267_v3 = vsel %vm3226_vm14, 0, %v3225_v0  ;;  %vm1510_vm14 = vcmp.eq.s32.totalorder %v1505_v41, 2 }
 0x346   : > { %v1173_v1 = vand.u32 2147483647, %v1172_v63  ;;  %v1268_v51 = vsub.s32 32, %v1267_v3  ;;  %v1272_v53 = vsub.s32 4294967266, %v1267_v3  ;;  %v1269_v16 = vshll.u32 %v1260_v45, %v1267_v3 }
 0x348   : > { %v1176_v5 = vmul.f32 %v1175_v2, %v1173_v1  ;;  %v1270_v19 = vshrl.u32 %v1252_v6, %v1268_v51  ;;  %v1273_v9 = vadd.s32 127, %v1272_v53 }
 0x34a   : > { %v1177_v15 = vxor.u32 2147483648, %v1176_v5  ;;  %v1271_v21 = vor.u32 %v1270_v19, %v1269_v16  ;;  %v1274_v22 = vshll.u32 %v1273_v9, 23 }
 0x34c   : > { %v1178_v20 = vsel %vm1095_vm15, %v1177_v15, %v1176_v5  ;;  %v1275_v13 = vor.u32 4788187, %v1274_v22  ;;  %v1278_v23 = vcvt.s32.f32 %v1271_v21  ;;  %vm1507_vm15 = vcmp.eq.s32.totalorder %v1505_v41, 0  ;;  %v2146_v22 = vld [vmem:[#allocation6 + $0x180] sm:$0xff] }
 0x34d   : > { %v1181_v7 = vsel %vm1094_vm0, %v4018_v48, %v1178_v20  ;;  %vm1506_vm0 = vcmp.lt.s32.totalorder %v1505_v41, 2  ;;  %v2158_v20 = vld [vmem:[#allocation6 + $0x1e0] sm:$0xff] }
 0x34e   : > { %3694 = vcosq.f32 %v1181_v7  ;;  %v1276_v17 = vand.u32 2147483647, %v1275_v13 }
 0x34f   : > { %3696 = vsinq.f32 %v1181_v7  ;;  %v2150_v7 = vld [vmem:[#allocation6 + $0x1a0] sm:$0xff] }
 0x350   : > { %v1279_v24 = vmul.f32 %v1278_v23, %v1276_v17  ;;  %v3350_v13 = vcombine.high %v2146_v22, %v2150_v7  ;;  %v3349_v14 = vcombine.low %v2146_v22, %v2150_v7  ;;  %v2138_v17 = vld [vmem:[#allocation6 + $0x140] sm:$0xff] }
 0x351   : > { %v2142_v23 = vld [vmem:[#allocation6 + $0x160] sm:$0xff] }
 0x352   : > { %v1280_v8 = vxor.u32 2147483648, %v1279_v24 }
 0x354   : > { %v1281_v26 = vsel %vm1198_vm1, %v1280_v8, %v1279_v24  ;;  %vm1288_vm1 = vweird.f32 %v4022_v52  ;;  %v3342_v24 = vcombine.high %v2138_v17, %v2142_v23  ;;  %v2134_v8 = vld [vmem:[#allocation6 + $0x120] sm:$0xff] }
 0x355   : > { %v1284_v50 = vsel %vm1197_vm2, %v4022_v52, %v1281_v26  ;;  %v3334_v18 = vcombine.high %v2130_v25, %v2134_v8  ;;  %v3333_v11 = vcombine.low %v2130_v25, %v2134_v8  ;;  %v2122_v26 = vld [vmem:[#allocation6 + $0xc0] sm:$0xff] }
 0x356   : > { %3698 = vcosq.f32 %v1284_v50 }
 0x357   : > { %3700 = vsinq.f32 %v1284_v50  ;;  %v2126_v50 = vld [vmem:[#allocation6 + $0xe0] sm:$0xff] }
 0x358   : > { %v3326_v27 = vcombine.high %v2122_v26, %v2126_v50  ;;  %v3325_v28 = vcombine.low %v2122_v26, %v2126_v50 }
 0x35b   : > { %v3695_v29 = vpop.eup %3694 }
 0x35c   : > { %v3697_v12 = vpop.eup %3696  ;;  %v1192_v31 = vxor.u32 2147483648, %v3695_v29 }
 0x35d   : > { %v1189_v33 = vxor.u32 2147483648, %v3697_v12 }
 0x35e   : > { %v1408_v34 = vsel %vm1406_vm3, %v1192_v31, %v3697_v12  ;;  %v1193_v39 = vsel %vm1191_vm9, %v1192_v31, %v3697_v12  ;;  %v2118_v12 = vld [vmem:[#allocation6 + $0xa0] sm:$0xff] }
 0x35f   : > { %v1405_v36 = vsel %vm1403_vm4, %v3695_v29, %v1189_v33  ;;  %v1190_v38 = vsel %vm1188_vm7, %v3695_v29, %v1189_v33  ;;  %v2114_v29 = vld [vmem:[#allocation6 + $0x80] sm:$0xff] }
 0x360   : > { %v1409_v60 = vsel %vm1402_vm5, %v1405_v36, %v1408_v34  ;;  %v1194_v44 = vsel %vm1187_vm10, %v1190_v38, %v1193_v39  ;;  %v3318_v30 = vcombine.high %v2114_v29, %v2118_v12  ;;  %v3317_v31 = vcombine.low %v2114_v29, %v2118_v12  ;;  %v2110_v33 = vld [vmem:[#allocation6 + $0x60] sm:$0xff] }
 0x361   : > { %v1410_v40 = vsel %vm1185_vm6, nan, %v1409_v60  ;;  %v1195_v55 = vsel %vm1185_vm6, nan, %v1194_v44  ;;  %v3310_v34 = vcombine.high %v2106_v32, %v2110_v33  ;;  %v3309_v35 = vcombine.low %v2106_v32, %v2110_v33  ;;  %v2098_v36 = vld [vmem:[#allocation6] sm:$0xff] }
 0x362   : > { %v1517_v45 = vrot.slane %v1410_v40, 4  ;;  %v1301_v0 = vrot.slane %v1195_v55, 4  ;;  %v2102_v60 = vld [vmem:[#allocation6 + $0x20] sm:$0xff]  ;;  %vm2048_vm5 = vcmask 1041408   ;;  %vm2044_vm6 = vcmask 31744  }
 0x363   : > { %v3699_v42 = vpop.eup %3698  ;;  %v3302_v37 = vcombine.high %v2098_v36, %v2102_v60  ;;  %v3301_v38 = vcombine.low %v2098_v36, %v2102_v60  ;;  %v2218_v39 = vld [vmem:[#allocation6 + $0x3c0] sm:$0xff] }
 0x364   : > { %v3701_v46 = vpop.eup %3700  ;;  %v1295_v47 = vxor.u32 2147483648, %v3699_v42  ;;  %v1521_v58 = vmul.f32 %v1517_v45, %v4018_v48  ;;  %v1305_v6 = vmul.f32 %v1301_v0, %v4018_v48  ;;  %v2154_v48 = vld [vmem:[#allocation6 + $0x1c0] sm:$0xff] }
 0x365   : > { %v1292_v49 = vxor.u32 2147483648, %v3701_v46  ;;  %v3358_v21 = vcombine.high %v2154_v48, %v2158_v20  ;;  %v2222_v40 = vld [vmem:[#allocation6 + $0x3e0] sm:$0xff] }
 0x366   : > { %v1296_v43 = vsel %vm1294_vm13, %v1295_v47, %v3701_v46  ;;  %v1512_v54 = vsel %vm1510_vm14, %v1295_v47, %v3701_v46  ;;  %v1525_v3 = vrot.slane %v1521_v58, 4  ;;  %v3422_v41 = vcombine.high %v2218_v39, %v2222_v40  ;;  %v2210_v44 = vld [vmem:[#allocation6 + $0x380] sm:$0xff] }
 0x367   : > { %v1293_v56 = vsel %vm1291_vm12, %v3699_v42, %v1292_v49  ;;  %v1509_v57 = vsel %vm1507_vm15, %v3699_v42, %v1292_v49  ;;  %2866 = vmatprep.subr.bf16.mxu1 %v3358_v21  ;;  %v3421_v42 = vcombine.low %v2218_v39, %v2222_v40  ;;  %v2214_v45 = vld [vmem:[#allocation6 + $0x3a0] sm:$0xff]  ;;  %v2147_v40 = vld [vmem:[#allocation6 + $0x188] sm:$0xff] }
 0x368   : > { %v1297_v59 = vsel %vm1290_vm11, %v1293_v56, %v1296_v43  ;;  %v1513_v61 = vsel %vm1506_vm0, %v1509_v57, %v1512_v54  ;;  %v1529_v15 = vsel %vm965_vm8, %v1305_v6, %v1525_v3  ;;  %v3414_v46 = vcombine.high %v2210_v44, %v2214_v45  ;;  %v2202_v49 = vld [vmem:[#allocation6 + $0x340] sm:$0xff] }
 0x369   : > { %v1298_v62 = vsel %vm1288_vm1, nan, %v1297_v59  ;;  %v1514_v63 = vsel %vm1288_vm1, nan, %v1513_v61  ;;  %v1531_v9 = vpack.c.bf16 %v1529_v15, %v1529_v15  ;;  %v3413_v47 = vcombine.low %v2210_v44, %v2214_v45  ;;  %v2206_v43 = vld [vmem:[#allocation6 + $0x360] sm:$0xff] }
 0x36a   : > { %v1302_v1 = vrot.slane %v1298_v62, 4  ;;  %v1518_v2 = vrot.slane %v1514_v63, 4  ;;  %v3406_v54 = vcombine.high %v2202_v49, %v2206_v43  ;;  %v3405_v55 = vcombine.low %v2202_v49, %v2206_v43  ;;  %v2194_v56 = vld [vmem:[#allocation6 + $0x300] sm:$0xff]  ;;  %v2143_v49 = vld [vmem:[#allocation6 + $0x168] sm:$0xff] }
 0x36b   : > { %v2198_v57 = vld [vmem:[#allocation6 + $0x320] sm:$0xff] }
 0x36c   : > { %v1522_v5 = vmul.f32 %v1518_v2, %v4022_v52  ;;  %v1306_v51 = vmul.f32 %v1302_v1, %v4022_v52  ;;  %v3357_v52 = vcombine.low %v2154_v48, %v2158_v20  ;;  %v3398_v58 = vcombine.high %v2194_v56, %v2198_v57  ;;  %v2186_v61 = vld [vmem:[#allocation6 + $0x2c0] sm:$0xff] }
 0x36d   : > { %v3397_v59 = vcombine.low %v2194_v56, %v2198_v57  ;;  %v2190_v62 = vld [vmem:[#allocation6 + $0x2e0] sm:$0xff]  ;;  %v2135_v56 = vld [vmem:[#allocation6 + $0x128] sm:$0xff] }
 0x36e   : > { %v1526_v53 = vrot.slane %v1522_v5, 4  ;;  %v3390_v63 = vcombine.high %v2186_v61, %v2190_v62  ;;  %v3389_v0 = vcombine.low %v2186_v61, %v2190_v62  ;;  %v2178_v1 = vld [vmem:[#allocation6 + $0x280] sm:$0xff]  ;;  %v2127_v61 = vld [vmem:[#allocation6 + $0xe8] sm:$0xff] }
 0x36f   : > { %v2182_v2 = vld [vmem:[#allocation6 + $0x2a0] sm:$0xff] }
 0x370   : > { %v1530_v16 = vsel %vm965_vm8, %v1306_v51, %v1526_v53  ;;  %v3382_v3 = vcombine.high %v2178_v1, %v2182_v2  ;;  %v3381_v5 = vcombine.low %v2178_v1, %v2182_v2  ;;  %v2170_v6 = vld [vmem:[#allocation6 + $0x240] sm:$0xff]  ;;  %v2119_v1 = vld [vmem:[#allocation6 + $0xa8] sm:$0xff] }
 0x371   : > { %v1532_v19 = vpack.c.bf16 %v1530_v16, %v1530_v16  ;;  %v2174_v51 = vld [vmem:[#allocation6 + $0x260] sm:$0xff] }
 0x372   : > { %v3374_v53 = vcombine.high %v2170_v6, %v2174_v51  ;;  %v3373_v15 = vcombine.low %v2170_v6, %v2174_v51  ;;  %v2035_v44 = vld [vmem:[%s4105_s7] sm:$0x3]  ;;  %v2111_v6 = vld [vmem:[#allocation6 + $0x68] sm:$0xff] }
 0x373   : > { %1949 = vmatprep.mubr.bf16.mxu0 %v1532_v19  ;;  %1990 = vmatprep.mubr.bf16.mxu1 %v1532_v19 }
 0x374   : > { %1950 = vmatmul.mubr.bf16.vlgmr.msra.gmra.mxu0 %v1531_v9  ;;  %1991 = vmatmul.mubr.bf16.vlgmr.msra.gmra.mxu1 %v1531_v9 }
 0x375   : > { %2087 = vmatprep.mubr.bf16.mxu0 %v3807_v4  ;;  %2867 = vmatpush1.bf16.msra.mxu1 %v3357_v52  ;;  %v3341_v4 = vcombine.low %v2138_v17, %v2142_v23 }
 0x376   : > { %2868 = vmatprep.subr.bf16.mxu1 %v3350_v13 }
 0x379   : > { %2869 = vmatpush1.bf16.msra.mxu1 %v3349_v14 }
 0x37a   : > { %2870 = vmatprep.subr.bf16.mxu1 %v3342_v24 }
 0x37d   : > { %2871 = vmatpush1.bf16.msra.mxu1 %v3341_v4 }
 0x37e   : > { %2872 = vmatprep.subr.bf16.mxu1 %v3334_v18 }
 0x381   : > { %2873 = vmatpush1.bf16.msra.mxu1 %v3333_v11 }
 0x382   : > { %2874 = vmatprep.subr.bf16.mxu1 %v3326_v27 }
 0x385   : > { %2875 = vmatpush1.bf16.msra.mxu1 %v3325_v28 }
 0x386   : > { %2876 = vmatprep.subr.bf16.mxu1 %v3318_v30 }
 0x389   : > { %2877 = vmatpush1.bf16.msra.mxu1 %v3317_v31 }
 0x38a   : > { %2878 = vmatprep.subr.bf16.mxu1 %v3310_v34  ;;  %v2155_v34 = vld [vmem:[#allocation6 + $0x1c8] sm:$0xff] }
 0x38d   : > { %2879 = vmatpush1.bf16.msra.mxu1 %v3309_v35  ;;  %v2159_v35 = vld [vmem:[#allocation6 + $0x1e8] sm:$0xff] }
 0x38e   : > { %2880 = vmatprep.subr.bf16.mxu1 %v3302_v37  ;;  %v3360_v39 = vcombine.high %v2155_v34, %v2159_v35  ;;  %v3359_v45 = vcombine.low %v2155_v34, %v2159_v35 }
 0x391   : > { %2881 = vmatpush1.bf16.msra.mxu1 %v3301_v38 }
 0x392   : > { %2882 = vmatprep.subr.bf16.mxu1 %v3422_v41  ;;  %v2151_v41 = vld [vmem:[#allocation6 + $0x1a8] sm:$0xff] }
 0x393   : > { %v3351_v43 = vcombine.low %v2147_v40, %v2151_v41 }
 0x395   : > { %2883 = vmatpush2.bf16.msra.mxu1 %v3421_v42 }
 0x396   : > { %2884 = vmatprep.subr.bf16.mxu1 %v3414_v46  ;;  %v3352_v46 = vcombine.high %v2147_v40, %v2151_v41  ;;  %v2167_v40 = vld [vmem:[#allocation6 + $0x228] sm:$0xff] }
 0x399   : > { %2885 = vmatpush2.bf16.msra.mxu1 %v3413_v47  ;;  %v2139_v47 = vld [vmem:[#allocation6 + $0x148] sm:$0xff] }
 0x39a   : > { %2886 = vmatprep.subr.bf16.mxu1 %v3406_v54  ;;  %v3344_v54 = vcombine.high %v2139_v47, %v2143_v49  ;;  %v3343_v57 = vcombine.low %v2139_v47, %v2143_v49 }
 0x39d   : > { %2887 = vmatpush2.bf16.msra.mxu1 %v3405_v55  ;;  %v2131_v55 = vld [vmem:[#allocation6 + $0x108] sm:$0xff] }
 0x39e   : > { %2888 = vmatprep.subr.bf16.mxu1 %v3398_v58  ;;  %v3336_v58 = vcombine.high %v2131_v55, %v2135_v56  ;;  %v3335_v62 = vcombine.low %v2131_v55, %v2135_v56 }
 0x3a1   : > { %2889 = vmatpush2.bf16.msra.mxu1 %v3397_v59  ;;  %v2123_v59 = vld [vmem:[#allocation6 + $0xc8] sm:$0xff] }
 0x3a2   : > { %2890 = vmatprep.subr.bf16.mxu1 %v3390_v63  ;;  %v3328_v63 = vcombine.high %v2123_v59, %v2127_v61  ;;  %v3327_v2 = vcombine.low %v2123_v59, %v2127_v61 }
 0x3a5   : > { %2891 = vmatpush2.bf16.msra.mxu1 %v3389_v0  ;;  %v2115_v0 = vld [vmem:[#allocation6 + $0x88] sm:$0xff] }
 0x3a6   : > { %2892 = vmatprep.subr.bf16.mxu1 %v3382_v3  ;;  %v3320_v3 = vcombine.high %v2115_v0, %v2119_v1  ;;  %v3319_v51 = vcombine.low %v2115_v0, %v2119_v1  ;;  %v2152_v0 = vld [vmem:[#allocation6 + $0x1b0] sm:$0xff]  ;;  %v2149_v1 = vld [vmem:[#allocation6 + $0x198] sm:$0xff] }
 0x3a9   : > { %2893 = vmatpush2.bf16.msra.mxu1 %v3381_v5  ;;  %v2107_v5 = vld [vmem:[#allocation6 + $0x48] sm:$0xff] }
 0x3aa   : > { %2894 = vmatprep.subr.bf16.mxu1 %v3374_v53  ;;  %v3312_v53 = vcombine.high %v2107_v5, %v2111_v6 }
 0x3ad   : > { %2895 = vmatpush2.bf16.msra.mxu1 %v3373_v15  ;;  %v2099_v15 = vld [vmem:[#allocation6 + $0x8] sm:$0xff] }
 0x3ae   : > { %v2042_v56 = vpop.permute.xlu1 %2041 }
 0x434   : > { %v1951_v16 = vpop.f32.mrf.mxu0  ;;  %v1992_v19 = vpop.f32.mrf.mxu1 }
 0x435   : > { %v2009_v9 = vrot.slane %v1951_v16, 4  ;;  %v2001_v10 = vrot.slane %v1992_v19, 4 }
 0x436   : > { %v1953_v48 = vpop.f32.mrf.mxu0  ;;  %v1994_v20 = vpop.f32.mrf.mxu1 }
 0x437   : > { %v2005_v52 = vsub.f32 %v1951_v16, %v2001_v10  ;;  %v2013_v21 = vadd.f32 %v2009_v9, %v1992_v19  ;;  %v2010_v22 = vrot.slane %v1953_v48, 4  ;;  %v2002_v7 = vrot.slane %v1994_v20, 4  ;;  %v2103_v16 = vld [vmem:[#allocation6 + $0x28] sm:$0xff] }
 0x438   : > { %v1955_v13 = vpop.f32.mrf.mxu0  ;;  %v1996_v14 = vpop.f32.mrf.mxu1  ;;  %v3311_v19 = vcombine.low %v2107_v5, %v2111_v6  ;;  %v3304_v9 = vcombine.high %v2099_v15, %v2103_v16  ;;  %v2219_v10 = vld [vmem:[#allocation6 + $0x3c8] sm:$0xff] }
 0x439   : > { %v2015_v17 = vmul.f32 %v2005_v52, %v2005_v52  ;;  %v2017_v23 = vmul.f32 %v2013_v21, %v2013_v21  ;;  %v2006_v24 = vsub.f32 %v1953_v48, %v2002_v7  ;;  %v2014_v4 = vadd.f32 %v2010_v22, %v1994_v20  ;;  %v2223_v48 = vld [vmem:[#allocation6 + $0x3e8] sm:$0xff] }
 0x43a   : > { %v1956_v25 = vpop.f32.mrf.mxu0  ;;  %v1997_v8 = vpop.f32.mrf.mxu1  ;;  %v3303_v20 = vcombine.low %v2099_v15, %v2103_v16  ;;  %v3424_v52 = vcombine.high %v2219_v10, %v2223_v48  ;;  %v2211_v21 = vld [vmem:[#allocation6 + $0x388] sm:$0xff]  ;;  %v3423_v7 = vcombine.low %v2219_v10, %v2223_v48  ;;  %v2144_v16 = vld [vmem:[#allocation6 + $0x170] sm:$0xff] }
 0x43b   : > { %v2019_v18 = vadd.f32 %v2017_v23, %v2015_v17  ;;  %v2016_v11 = vmul.f32 %v2006_v24, %v2006_v24  ;;  %v2018_v26 = vmul.f32 %v2014_v4, %v2014_v4  ;;  %v2215_v22 = vld [vmem:[#allocation6 + $0x3a8] sm:$0xff] }
 0x43c   : > { %v3416_v13 = vcombine.high %v2211_v21, %v2215_v22  ;;  %v2203_v14 = vld [vmem:[#allocation6 + $0x348] sm:$0xff]  ;;  %v3415_v23 = vcombine.low %v2211_v21, %v2215_v22  ;;  %v2132_v21 = vld [vmem:[#allocation6 + $0x110] sm:$0xff] }
 0x43d   : > { %3702 = vrsqrt.f32 %v2019_v18  ;;  %v2020_v50 = vadd.f32 %v2018_v26, %v2016_v11  ;;  %vm2023_vm8 = vcmp.eq.f32.partialorder %v2019_v18, inf  ;;  %v2026_v12 = vand.u32 2147483648, %v2019_v18  ;;  %v2207_v17 = vld [vmem:[#allocation6 + $0x368] sm:$0xff]  ;;  %v2136_v22 = vld [vmem:[#allocation6 + $0x130] sm:$0xff] }
 0x43e   : > { %vm2025_vm2 = vcmp.eq.f32.partialorder %v2019_v18, 0.0  ;;  %v3408_v24 = vcombine.high %v2203_v14, %v2207_v17  ;;  %v2195_v4 = vld [vmem:[#allocation6 + $0x308] sm:$0xff]  ;;  %v3407_v8 = vcombine.low %v2203_v14, %v2207_v17 }
 0x43f   : > { %3704 = vrsqrt.f32 %v2020_v50  ;;  %vm2030_vm3 = vcmp.eq.f32.partialorder %v2020_v50, inf  ;;  %v2033_v32 = vand.u32 2147483648, %v2020_v50  ;;  %vm2032_vm4 = vcmp.eq.f32.partialorder %v2020_v50, 0.0  ;;  %v2199_v25 = vld [vmem:[#allocation6 + $0x328] sm:$0xff] }
 0x440   : > { %v2187_v11 = vld [vmem:[#allocation6 + $0x2c8] sm:$0xff] }
 0x441   : > { %v2191_v26 = vld [vmem:[#allocation6 + $0x2e8] sm:$0xff] }
 0x44a   : > { %v3703_v27 = vpop.eup %3702 }
 0x44b   : > { %v2022_v28 = vmul.f32 %v3703_v27, %v2019_v18  ;;  %v3392_v27 = vcombine.high %v2187_v11, %v2191_v26 }
 0x44c   : > { %v3705_v29 = vpop.eup %3704 }
 0x44d   : > { %v2029_v30 = vmul.f32 %v3705_v29, %v2020_v50  ;;  %v2024_v31 = vsel %vm2023_vm8, %v2019_v18, %v2022_v28  ;;  %v3400_v18 = vcombine.high %v2195_v4, %v2199_v25  ;;  %v2179_v28 = vld [vmem:[#allocation6 + $0x288] sm:$0xff] }
 0x44e   : > { %v2027_v33 = vsel %vm2025_vm2, %v2026_v12, %v2024_v31  ;;  %v2183_v29 = vld [vmem:[#allocation6 + $0x2a8] sm:$0xff]  ;;  %v3391_v12 = vcombine.low %v2187_v11, %v2191_v26  ;;  %v3337_v11 = vcombine.low %v2132_v21, %v2136_v22 }
 0x44f   : > { %v2031_v36 = vsel %vm2030_vm3, %v2020_v50, %v2029_v30  ;;  %v2036_v60 = vpack.c.bf16 %v2027_v33, %v2027_v33  ;;  %v3399_v50 = vcombine.low %v2195_v4, %v2199_v25  ;;  %v3384_v30 = vcombine.high %v2179_v28, %v2183_v29  ;;  %v2171_v31 = vld [vmem:[#allocation6 + $0x248] sm:$0xff]  ;;  %v2124_v4 = vld [vmem:[#allocation6 + $0xd0] sm:$0xff] }
 0x450   : > { %v2034_v37 = vsel %vm2032_vm4, %v2033_v32, %v2031_v36  ;;  %v2175_v32 = vld [vmem:[#allocation6 + $0x268] sm:$0xff]  ;;  %v3383_v33 = vcombine.low %v2179_v28, %v2183_v29  ;;  %v2162_v36 = vld [vmem:[#allocation6 + $0x200] sm:$0xff]  ;;  %v2128_v25 = vld [vmem:[#allocation6 + $0xf0] sm:$0xff] }
 0x451   : > { %v2037_v38 = vpack.c.bf16 %v2034_v37, %v2034_v37  ;;  %v2050_v42 = vsel %vm2048_vm5, %v2036_v60, 0  ;;  %v3376_v34 = vcombine.high %v2171_v31, %v2175_v32  ;;  %v3375_v35 = vcombine.low %v2171_v31, %v2175_v32  ;;  %v2166_v60 = vld [vmem:[#allocation6 + $0x220] sm:$0xff]  ;;  %v2163_v37 = vld [vmem:[#allocation6 + $0x208] sm:$0xff]  ;;  %v2116_v28 = vld [vmem:[#allocation6 + $0x90] sm:$0xff] }
 0x452   : > { %v3367_v41 = vcombine.low %v2163_v37, %v2167_v40  ;;  %v2120_v29 = vld [vmem:[#allocation6 + $0xb0] sm:$0xff]  ;;  %v3329_v31 = vcombine.low %v2124_v4, %v2128_v25 }
 0x453   : > { %3299 = vmatprep.subr.msk.bf16.mxu0 %vm2048_vm5, %v2037_v38  ;;  %v3365_v38 = vcombine.low %v2162_v36, %v2166_v60 }
 0x454   : > { %2070 = vmatpush1.bf16.msra.mxu0 %v2050_v42  ;;  %v3368_v42 = vcombine.high %v2163_v37, %v2167_v40  ;;  %v2113_v37 = vld [vmem:[#allocation6 + $0x78] sm:$0xff] }
 0x455   : > { %2907 = vmatprep.subr.bf16.mxu0 %v3360_v39  ;;  %v3366_v39 = vcombine.high %v2162_v36, %v2166_v60  ;;  %v2112_v36 = vld [vmem:[#allocation6 + $0x70] sm:$0xff]  ;;  %v2109_v60 = vld [vmem:[#allocation6 + $0x58] sm:$0xff] }
 0x457   : > { %3300 = vmatmul.mubr.msk.bf16.vlgmr.msra.gmra.mxu0 %vm2044_vm6, %v2035_v44  ;;  %2896 = vmatprep.subr.bf16.mxu1 %v3366_v39  ;;  %v2156_v44 = vld [vmem:[#allocation6 + $0x1d0] sm:$0xff] }
 0x458   : > { %2908 = vmatpush1.bf16.msra.mxu0 %v3359_v45  ;;  %v2160_v45 = vld [vmem:[#allocation6 + $0x1f0] sm:$0xff]  ;;  %2897 = vmatpush2.bf16.msra.mxu1 %v3365_v38  ;;  %v3321_v38 = vcombine.low %v2116_v28, %v2120_v29 }
 0x459   : > { %2909 = vmatprep.subr.bf16.mxu0 %v3352_v46  ;;  %v2157_v46 = vld [vmem:[#allocation6 + $0x1d8] sm:$0xff]  ;;  %v3361_v47 = vcombine.low %v2156_v44, %v2160_v45  ;;  %v3362_v49 = vcombine.high %v2156_v44, %v2160_v45  ;;  %v2104_v44 = vld [vmem:[#allocation6 + $0x30] sm:$0xff] }
 0x45a   : > { %v2101_v45 = vld [vmem:[#allocation6 + $0x18] sm:$0xff] }
 0x45b   : > { %2948 = vmatprep.subr.bf16.mxu1 %v3362_v49  ;;  %v3315_v49 = vcombine.low %v2109_v60, %v2113_v37 }
 0x45c   : > { %2910 = vmatpush1.bf16.msra.mxu0 %v3351_v43  ;;  %v2161_v43 = vld [vmem:[#allocation6 + $0x1f8] sm:$0xff] }
 0x45d   : > { %2911 = vmatprep.subr.bf16.mxu0 %v3344_v54  ;;  %v3363_v54 = vcombine.low %v2157_v46, %v2161_v43  ;;  %v3364_v55 = vcombine.high %v2157_v46, %v2161_v43  ;;  %v2105_v46 = vld [vmem:[#allocation6 + $0x38] sm:$0xff] }
 0x460   : > { %2912 = vmatpush1.bf16.msra.mxu0 %v3343_v57 }
 0x461   : > { %2913 = vmatprep.subr.bf16.mxu0 %v3336_v58 }
 0x464   : > { %2914 = vmatpush1.bf16.msra.mxu0 %v3335_v62  ;;  %v2148_v62 = vld [vmem:[#allocation6 + $0x190] sm:$0xff] }
 0x465   : > { %2915 = vmatprep.subr.bf16.mxu0 %v3328_v63  ;;  %v3353_v10 = vcombine.low %v2148_v62, %v2152_v0 }
 0x468   : > { %2916 = vmatpush1.bf16.msra.mxu0 %v3327_v2  ;;  %v2153_v2 = vld [vmem:[#allocation6 + $0x1b8] sm:$0xff] }
 0x469   : > { %2917 = vmatprep.subr.bf16.mxu0 %v3320_v3  ;;  %v3356_v15 = vcombine.high %v2149_v1, %v2153_v2  ;;  %v3355_v48 = vcombine.low %v2149_v1, %v2153_v2  ;;  %v2216_v1 = vld [vmem:[#allocation6 + $0x3b0] sm:$0xff]  ;;  %v2213_v2 = vld [vmem:[#allocation6 + $0x398] sm:$0xff] }
 0x46c   : > { %2918 = vmatpush1.bf16.msra.mxu0 %v3319_v51  ;;  %v2140_v51 = vld [vmem:[#allocation6 + $0x150] sm:$0xff] }
 0x46d   : > { %2919 = vmatprep.subr.bf16.mxu0 %v3312_v53  ;;  %v3354_v53 = vcombine.high %v2148_v62, %v2152_v0  ;;  %v3345_v14 = vcombine.low %v2140_v51, %v2144_v16  ;;  %v2212_v0 = vld [vmem:[#allocation6 + $0x390] sm:$0xff] }
 0x470   : > { %2920 = vmatpush1.bf16.msra.mxu0 %v3311_v19  ;;  %v2141_v19 = vld [vmem:[#allocation6 + $0x158] sm:$0xff] }
 0x471   : > { %2921 = vmatprep.subr.bf16.mxu0 %v3304_v9  ;;  %v2145_v9 = vld [vmem:[#allocation6 + $0x178] sm:$0xff] }
 0x472   : > { %v3347_v17 = vcombine.low %v2141_v19, %v2145_v9 }
 0x474   : > { %2922 = vmatpush1.bf16.msra.mxu0 %v3303_v20  ;;  %v3346_v20 = vcombine.high %v2140_v51, %v2144_v16  ;;  %v2204_v16 = vld [vmem:[#allocation6 + $0x350] sm:$0xff] }
 0x475   : > { %2923 = vmatprep.subr.bf16.mxu0 %v3424_v52  ;;  %v3348_v52 = vcombine.high %v2141_v19, %v2145_v9  ;;  %v2208_v19 = vld [vmem:[#allocation6 + $0x370] sm:$0xff]  ;;  %v2205_v9 = vld [vmem:[#allocation6 + $0x358] sm:$0xff] }
 0x478   : > { %2924 = vmatpush2.bf16.msra.mxu0 %v3423_v7  ;;  %v2133_v7 = vld [vmem:[#allocation6 + $0x118] sm:$0xff] }
 0x479   : > { %2925 = vmatprep.subr.bf16.mxu0 %v3416_v13  ;;  %v2137_v13 = vld [vmem:[#allocation6 + $0x138] sm:$0xff] }
 0x47a   : > { %v3339_v26 = vcombine.low %v2133_v7, %v2137_v13 }
 0x47c   : > { %2926 = vmatpush2.bf16.msra.mxu0 %v3415_v23  ;;  %v3338_v23 = vcombine.high %v2132_v21, %v2136_v22  ;;  %v2196_v22 = vld [vmem:[#allocation6 + $0x310] sm:$0xff] }
 0x47d   : > { %2927 = vmatprep.subr.bf16.mxu0 %v3408_v24  ;;  %v3340_v24 = vcombine.high %v2133_v7, %v2137_v13  ;;  %v2200_v7 = vld [vmem:[#allocation6 + $0x330] sm:$0xff]  ;;  %v2197_v13 = vld [vmem:[#allocation6 + $0x318] sm:$0xff] }
 0x480   : > { %2928 = vmatpush2.bf16.msra.mxu0 %v3407_v8  ;;  %v2125_v8 = vld [vmem:[#allocation6 + $0xd8] sm:$0xff] }
 0x481   : > { %2929 = vmatprep.subr.bf16.mxu0 %v3400_v18  ;;  %v2129_v18 = vld [vmem:[#allocation6 + $0xf8] sm:$0xff] }
 0x482   : > { %v3331_v32 = vcombine.low %v2125_v8, %v2129_v18 }
 0x484   : > { %2930 = vmatpush2.bf16.msra.mxu0 %v3399_v50  ;;  %v3330_v50 = vcombine.high %v2124_v4, %v2128_v25  ;;  %v2188_v25 = vld [vmem:[#allocation6 + $0x2d0] sm:$0xff] }
 0x485   : > { %2931 = vmatprep.subr.bf16.mxu0 %v3392_v27  ;;  %v3332_v27 = vcombine.high %v2125_v8, %v2129_v18  ;;  %v2192_v8 = vld [vmem:[#allocation6 + $0x2f0] sm:$0xff]  ;;  %v2189_v18 = vld [vmem:[#allocation6 + $0x2d8] sm:$0xff] }
 0x488   : > { %2932 = vmatpush2.bf16.msra.mxu0 %v3391_v12  ;;  %v2117_v12 = vld [vmem:[#allocation6 + $0x98] sm:$0xff] }
 0x489   : > { %2933 = vmatprep.subr.bf16.mxu0 %v3384_v30  ;;  %v2121_v30 = vld [vmem:[#allocation6 + $0xb8] sm:$0xff] }
 0x48a   : > { %v3323_v39 = vcombine.low %v2117_v12, %v2121_v30 }
 0x48c   : > { %2934 = vmatpush2.bf16.msra.mxu0 %v3383_v33  ;;  %v3322_v33 = vcombine.high %v2116_v28, %v2120_v29  ;;  %v2180_v29 = vld [vmem:[#allocation6 + $0x290] sm:$0xff] }
 0x48d   : > { %2935 = vmatprep.subr.bf16.mxu0 %v3376_v34  ;;  %v3324_v34 = vcombine.high %v2117_v12, %v2121_v30  ;;  %v2184_v12 = vld [vmem:[#allocation6 + $0x2b0] sm:$0xff]  ;;  %v2181_v30 = vld [vmem:[#allocation6 + $0x298] sm:$0xff] }
 0x490   : > { %2936 = vmatpush2.bf16.msra.mxu0 %v3375_v35  ;;  %v2108_v35 = vld [vmem:[#allocation6 + $0x50] sm:$0xff] }
 0x491   : > { %2937 = vmatprep.subr.bf16.mxu0 %v3368_v42  ;;  %v3314_v40 = vcombine.high %v2108_v35, %v2112_v36  ;;  %v2100_v42 = vld [vmem:[#allocation6 + $0x10] sm:$0xff] }
 0x492   : > { %v3306_v43 = vcombine.high %v2100_v42, %v2104_v44 }
 0x494   : > { %2938 = vmatpush2.bf16.msra.mxu0 %v3367_v41  ;;  %v3316_v41 = vcombine.high %v2109_v60, %v2113_v37  ;;  %v2176_v60 = vld [vmem:[#allocation6 + $0x270] sm:$0xff]  ;;  %v2173_v37 = vld [vmem:[#allocation6 + $0x258] sm:$0xff] }
 0x495   : > { %2989 = vmatprep.subr.bf16.mxu0 %v3364_v55  ;;  %v2220_v55 = vld [vmem:[#allocation6 + $0x3d0] sm:$0xff] }
 0x517   : > { %v2089_v57 = vpop.f32.mrf.mxu0 }
 0x518   : > { %v2090_v58 = vadd.f32 %v2089_v57, %v2042_v56  ;;  %v2221_v57 = vld [vmem:[#allocation6 + $0x3d8] sm:$0xff] }
 0x519   : > { %v2091_v59 = vpop.f32.mrf.mxu0 }
 0x51a   : > { %v2092_v61 = vadd.f32 %v2091_v59, %v2042_v56  ;;  %v4085_v5 = vpack.c.bf16 %v2090_v58, %v2090_v58  ;;  %v2224_v56 = vld [vmem:[#allocation6 + $0x3f0] sm:$0xff]  ;;  %v2225_v58 = vld [vmem:[#allocation6 + $0x3f8] sm:$0xff]  ;;  %v3305_v59 = vcombine.low %v2100_v42, %v2104_v44 }
 0x51b   : > { %v2093_v63 = vpop.f32.mrf.mxu0  ;;  %v3426_v62 = vcombine.high %v2220_v55, %v2224_v56  ;;  %v3427_v51 = vcombine.low %v2221_v57, %v2225_v58  ;;  %v2164_v44 = vld [vmem:[#allocation6 + $0x210] sm:$0xff] }
 0x51c   : > { %v2097_v3 = vpack.c.bf16 %v2092_v61, %v2092_v61  ;;  %v3307_v61 = vcombine.low %v2101_v45, %v2105_v46  ;;  %v3428_v63 = vcombine.high %v2221_v57, %v2225_v58 }
 0x51d   : > { %v2094_v6 = vpop.f32.mrf.mxu0 }
 0x51e   : > { %2898 = vmatprep.mubr.bf16.mxu1 %v2097_v3  ;;  %2939 = vmatprep.mubr.bf16.mxu0 %v2097_v3  ;;  %v3425_v6 = vcombine.low %v2220_v55, %v2224_v56 }
 0x51f   : > { %2899 = vmatmul.mubr.bf16.vlgmr.msra.gmra.mxu1 %v4085_v5  ;;  %2940 = vmatmul.mubr.bf16.vlgmr.msra.gmra.mxu0 %v4085_v5 }
 0x520   : > { %2949 = vmatpush1.bf16.msra.mxu1 %v3361_v47  ;;  %2990 = vmatpush1.bf16.msra.mxu0 %v3363_v54  ;;  %v3313_v47 = vcombine.low %v2108_v35, %v2112_v36  ;;  %v3308_v54 = vcombine.high %v2101_v45, %v2105_v46  ;;  %v2172_v36 = vld [vmem:[#allocation6 + $0x250] sm:$0xff]  ;;  %v2165_v46 = vld [vmem:[#allocation6 + $0x218] sm:$0xff] }
 0x521   : > { %2980 = vmatprep.mubr.bf16.mxu1 %v2097_v3  ;;  %3021 = vmatprep.mubr.bf16.mxu0 %v2097_v3  ;;  %v2217_v3 = vld [vmem:[#allocation6 + $0x3b8] sm:$0xff]  ;;  %v2168_v45 = vld [vmem:[#allocation6 + $0x230] sm:$0xff] }
 0x522   : > { %2950 = vmatprep.subr.bf16.mxu1 %v3354_v53  ;;  %2991 = vmatprep.subr.bf16.mxu0 %v3356_v15  ;;  %v3418_v53 = vcombine.high %v2212_v0, %v2216_v1  ;;  %v3420_v15 = vcombine.high %v2213_v2, %v2217_v3  ;;  %v3369_v56 = vcombine.low %v2164_v44, %v2168_v45 }
 0x524   : > { %2951 = vmatpush1.bf16.msra.mxu1 %v3353_v10  ;;  %2992 = vmatpush1.bf16.msra.mxu0 %v3355_v48  ;;  %v2209_v10 = vld [vmem:[#allocation6 + $0x378] sm:$0xff]  ;;  %v3417_v48 = vcombine.low %v2212_v0, %v2216_v1 }
 0x525   : > { %2952 = vmatprep.subr.bf16.mxu1 %v3346_v20  ;;  %2993 = vmatprep.subr.bf16.mxu0 %v3348_v52  ;;  %v3419_v20 = vcombine.low %v2213_v2, %v2217_v3  ;;  %v3410_v52 = vcombine.high %v2204_v16, %v2208_v19  ;;  %v3412_v21 = vcombine.high %v2205_v9, %v2209_v10 }
 0x528   : > { %2953 = vmatpush1.bf16.msra.mxu1 %v3345_v14  ;;  %2994 = vmatpush1.bf16.msra.mxu0 %v3347_v17  ;;  %v2201_v14 = vld [vmem:[#allocation6 + $0x338] sm:$0xff]  ;;  %v3409_v17 = vcombine.low %v2204_v16, %v2208_v19 }
 0x529   : > { %2954 = vmatprep.subr.bf16.mxu1 %v3338_v23  ;;  %2995 = vmatprep.subr.bf16.mxu0 %v3340_v24  ;;  %v3411_v23 = vcombine.low %v2205_v9, %v2209_v10  ;;  %v3402_v24 = vcombine.high %v2196_v22, %v2200_v7  ;;  %v3404_v4 = vcombine.high %v2197_v13, %v2201_v14 }
 0x52c   : > { %2955 = vmatpush1.bf16.msra.mxu1 %v3337_v11  ;;  %2996 = vmatpush1.bf16.msra.mxu0 %v3339_v26  ;;  %v2193_v11 = vld [vmem:[#allocation6 + $0x2f8] sm:$0xff]  ;;  %v3401_v26 = vcombine.low %v2196_v22, %v2200_v7 }
 0x52d   : > { %2956 = vmatprep.subr.bf16.mxu1 %v3330_v50  ;;  %2997 = vmatprep.subr.bf16.mxu0 %v3332_v27  ;;  %v3403_v50 = vcombine.low %v2197_v13, %v2201_v14  ;;  %v3394_v27 = vcombine.high %v2188_v25, %v2192_v8  ;;  %v3396_v28 = vcombine.high %v2189_v18, %v2193_v11 }
 0x530   : > { %2957 = vmatpush1.bf16.msra.mxu1 %v3329_v31  ;;  %2998 = vmatpush1.bf16.msra.mxu0 %v3331_v32  ;;  %v2185_v31 = vld [vmem:[#allocation6 + $0x2b8] sm:$0xff]  ;;  %v3393_v32 = vcombine.low %v2188_v25, %v2192_v8 }
 0x531   : > { %2958 = vmatprep.subr.bf16.mxu1 %v3322_v33  ;;  %2999 = vmatprep.subr.bf16.mxu0 %v3324_v34  ;;  %v3395_v33 = vcombine.low %v2189_v18, %v2193_v11  ;;  %v3386_v34 = vcombine.high %v2180_v29, %v2184_v12  ;;  %v3388_v35 = vcombine.high %v2181_v30, %v2185_v31 }
 0x534   : > { %2959 = vmatpush1.bf16.msra.mxu1 %v3321_v38  ;;  %3000 = vmatpush1.bf16.msra.mxu0 %v3323_v39  ;;  %v2177_v38 = vld [vmem:[#allocation6 + $0x278] sm:$0xff]  ;;  %v3385_v39 = vcombine.low %v2180_v29, %v2184_v12 }
 0x535   : > { %2960 = vmatprep.subr.bf16.mxu1 %v3314_v40  ;;  %3001 = vmatprep.subr.bf16.mxu0 %v3316_v41  ;;  %v3387_v40 = vcombine.low %v2181_v30, %v2185_v31  ;;  %v3378_v41 = vcombine.high %v2172_v36, %v2176_v60  ;;  %v3380_v42 = vcombine.high %v2173_v37, %v2177_v38 }
 0x538   : > { %2961 = vmatpush1.bf16.msra.mxu1 %v3313_v47  ;;  %3002 = vmatpush1.bf16.msra.mxu0 %v3315_v49  ;;  %v2169_v47 = vld [vmem:[#allocation6 + $0x238] sm:$0xff]  ;;  %v3377_v49 = vcombine.low %v2172_v36, %v2176_v60 }
 0x539   : > { %2962 = vmatprep.subr.bf16.mxu1 %v3306_v43  ;;  %3003 = vmatprep.subr.bf16.mxu0 %v3308_v54  ;;  %v3379_v43 = vcombine.low %v2173_v37, %v2177_v38  ;;  %v3370_v54 = vcombine.high %v2164_v44, %v2168_v45  ;;  %v3372_v55 = vcombine.high %v2165_v46, %v2169_v47 }
 0x53a   : > { %v3371_v57 = vcombine.low %v2165_v46, %v2169_v47 }
 0x53c   : > { %2963 = vmatpush1.bf16.msra.mxu1 %v3305_v59  ;;  %3004 = vmatpush1.bf16.msra.mxu0 %v3307_v61 }
 0x53d   : > { %2964 = vmatprep.subr.bf16.mxu1 %v3426_v62  ;;  %3005 = vmatprep.subr.bf16.mxu0 %v3428_v63 }
 0x540   : > { %2965 = vmatpush2.bf16.msra.mxu1 %v3425_v6  ;;  %3006 = vmatpush2.bf16.msra.mxu0 %v3427_v51 }
 0x541   : > { %2966 = vmatprep.subr.bf16.mxu1 %v3418_v53  ;;  %3007 = vmatprep.subr.bf16.mxu0 %v3420_v15 }
 0x544   : > { %2967 = vmatpush2.bf16.msra.mxu1 %v3417_v48  ;;  %3008 = vmatpush2.bf16.msra.mxu0 %v3419_v20 }
 0x545   : > { %2968 = vmatprep.subr.bf16.mxu1 %v3410_v52  ;;  %3009 = vmatprep.subr.bf16.mxu0 %v3412_v21 }
 0x548   : > { %2969 = vmatpush2.bf16.msra.mxu1 %v3409_v17  ;;  %3010 = vmatpush2.bf16.msra.mxu0 %v3411_v23 }
 0x549   : > { %2970 = vmatprep.subr.bf16.mxu1 %v3402_v24  ;;  %3011 = vmatprep.subr.bf16.mxu0 %v3404_v4 }
 0x54c   : > { %2971 = vmatpush2.bf16.msra.mxu1 %v3401_v26  ;;  %3012 = vmatpush2.bf16.msra.mxu0 %v3403_v50 }
 0x54d   : > { %2972 = vmatprep.subr.bf16.mxu1 %v3394_v27  ;;  %3013 = vmatprep.subr.bf16.mxu0 %v3396_v28 }
 0x550   : > { %2973 = vmatpush2.bf16.msra.mxu1 %v3393_v32  ;;  %3014 = vmatpush2.bf16.msra.mxu0 %v3395_v33 }
 0x551   : > { %2974 = vmatprep.subr.bf16.mxu1 %v3386_v34  ;;  %3015 = vmatprep.subr.bf16.mxu0 %v3388_v35 }
 0x554   : > { %2975 = vmatpush2.bf16.msra.mxu1 %v3385_v39  ;;  %3016 = vmatpush2.bf16.msra.mxu0 %v3387_v40 }
 0x555   : > { %2976 = vmatprep.subr.bf16.mxu1 %v3378_v41  ;;  %3017 = vmatprep.subr.bf16.mxu0 %v3380_v42 }
 0x558   : > { %2977 = vmatpush2.bf16.msra.mxu1 %v3377_v49  ;;  %3018 = vmatpush2.bf16.msra.mxu0 %v3379_v43 }
 0x559   : > { %2978 = vmatprep.subr.bf16.mxu1 %v3370_v54  ;;  %3019 = vmatprep.subr.bf16.mxu0 %v3372_v55 }
 0x55c   : > { %2979 = vmatpush2.bf16.msra.mxu1 %v3369_v56  ;;  %3020 = vmatpush2.bf16.msra.mxu0 %v3371_v57 }
 0x55f   : > { %2981 = vmatmul.mubr.bf16.vlgmr.msra.gmra.mxu1 %v4085_v5  ;;  %3022 = vmatmul.mubr.bf16.vlgmr.msra.gmra.mxu0 %v4085_v5 }
 0x5df   : > { %v2900_v58 = vpop.f32.mrf.mxu1  ;;  %v2941_v59 = vpop.f32.mrf.mxu0 }
 0x5e1   : > { %v2902_v61 = vpop.f32.mrf.mxu1  ;;  %v2943_v62 = vpop.f32.mrf.mxu0 }
 0x5e2   : > { %v3038_v63 = vcombine.low %v2900_v58, %v2902_v61  ;;  %v3039_v0 = vcombine.low %v2941_v59, %v2943_v62 }
 0x5e3   : > { %v2904_v1 = vpop.f32.mrf.mxu1  ;;  %v2945_v2 = vpop.f32.mrf.mxu0 }
 0x5e4   : > { %3046 = vst [vmem:[%s403_s19] sm:$0xff] %v3038_v63  ;;  %3047 = vst [vmem:[%s403_s19 + $0x8] sm:$0xff] %v3039_v0 }
 0x5e5   : > { %v2905_v3 = vpop.f32.mrf.mxu1  ;;  %v2946_v6 = vpop.f32.mrf.mxu0 }
 0x61f   : > { %v2982_v51 = vpop.f32.mrf.mxu1  ;;  %v3023_v53 = vpop.f32.mrf.mxu0 }
 0x621   : > { %v2984_v5 = vpop.f32.mrf.mxu1  ;;  %v3025_v15 = vpop.f32.mrf.mxu0 }
 0x622   : > { %v3040_v16 = vcombine.low %v2982_v51, %v2984_v5  ;;  %v3041_v19 = vcombine.low %v3023_v53, %v3025_v15 }
 0x623   : > { %v2986_v9 = vpop.f32.mrf.mxu1  ;;  %v3027_v10 = vpop.f32.mrf.mxu0 }
 0x624   : > { %3048 = vst [vmem:[%s403_s19 + $0x10] sm:$0xff] %v3040_v16  ;;  %3049 = vst [vmem:[%s403_s19 + $0x18] sm:$0xff] %v3041_v19 }
 0x625   : > { %v2987_v48 = vpop.f32.mrf.mxu1  ;;  %v3028_v20 = vpop.f32.mrf.mxu0 }
 0x626 PF: > { %s22_s13 = sadd.s32 1, %s3798_s13  }
 0x627   : > { %p19_p3 = scmp.ge.s32.totalorder %s22_s13, 4  }
 0x629   :  { %21 = sbr.rel (!%p19_p3) target bundleno = 2 (0x2), region = 103 }
 0x62e   :  { %3071 = vsyncpa [#allocation3], 1 }
 0x62f   :  { %3073 = vsyncpa [#allocation3 + $0x1], 1 }
 0x630   :  { %3074 = vsyncpa [#allocation5], 1 }

</bundles_post_ra>
